<compile_context>
chip_gen: v7x
topology: tpu7x:2x2x1
jax: 0.10.0
libtpu: 0.0.40
codegen_flags: <defaults>
</compile_context>

<pallas_src>
import functools

import jax
import jax.numpy as jnp
from jax import lax
from jax.experimental import pallas as pl
from jax.experimental.pallas import tpu as pltpu

VMEM_SPEC = pl.BlockSpec(memory_space=pltpu.MemorySpace.VMEM)
LN_EPS = 1e-5
NEG_BIG = -1e30  # finite "masked" bias (avoids NaN rows that -inf can produce)


# ----------------------------------------------------------------------------
# In-kernel helpers (operate on values already loaded from refs)
# ----------------------------------------------------------------------------

def _layernorm(z, g, b):
    """LayerNorm over the last dim, PyTorch semantics (eps=1e-5), f32 stats."""
    mean = jnp.mean(z, axis=-1, keepdims=True)
    zc = z - mean
    var = jnp.mean(zc * zc, axis=-1, keepdims=True)
    return zc * lax.rsqrt(var + LN_EPS) * g + b


def _attention(xq2, ks2, vs2, wq, bq, wk, bk, wv, bv, wp, bp,
               *, B, Tq, Tk, num_heads, head_size, causal, use_padding):
    """Multi-head (self or cross) attention + single output projection.

    xq2: (B*Tq, C) f32   - queries (and padding-mask source)
    ks2: (B*Tk, C) f32/bf16 - key source   (== xq2 for self attention)
    vs2: (B*Tk, C) f32/bf16 - value source (== xq2 for self attention)
    Weights are bf16 (C, C); biases f32 (1, C). Returns f32 (B*Tq, C).
    """
    C = num_heads * head_size
    scale = float(head_size) ** -0.5

    xb = xq2.astype(jnp.bfloat16)
    kb = ks2.astype(jnp.bfloat16)
    vb = vs2.astype(jnp.bfloat16)

    # scale folded into Q once (hoisted out of the per-head loop)
    Q = (jnp.dot(xb, wq, preferred_element_type=jnp.float32) + bq) * scale
    K = jnp.dot(kb, wk, preferred_element_type=jnp.float32) + bk
    V = jnp.dot(vb, wv, preferred_element_type=jnp.float32) + bv

    Q3 = Q.astype(jnp.bfloat16).reshape(B, Tq, C)
    K3 = K.astype(jnp.bfloat16).reshape(B, Tk, C)
    V3 = V.astype(jnp.bfloat16).reshape(B, Tk, C)

    # Additive mask bias built ONCE (shared by all heads).
    bias = None
    if use_padding:
        # padding mask based on first embedding channel (as in the PyTorch
        # Head); self-attn only (Tk == Tq).
        x3 = xq2.reshape(B, Tq, C)
        pm = x3[:, :, 0] != 0.0                        # (B, Tq)
        pmask = pm[:, :, None] & pm[:, None, :]        # (B, Tq, Tk)
        bias = jnp.where(pmask, 0.0, NEG_BIG)
    if causal:
        row = lax.broadcasted_iota(jnp.int32, (Tq, Tk), 0)
        col = lax.broadcasted_iota(jnp.int32, (Tq, Tk), 1)
        cbias = jnp.where(col <= row, 0.0, NEG_BIG)[None, :, :]
        bias = cbias if bias is None else bias + cbias

    head_outs = []
    for h in range(num_heads):
        lo = h * head_size
        hi = lo + head_size
        s = jnp.einsum('bqd,bkd->bqk', Q3[:, :, lo:hi], K3[:, :, lo:hi],
                       preferred_element_type=jnp.float32)
        if bias is not None:
            s = s + bias
        m = jnp.max(s, axis=-1, keepdims=True)
        e = jnp.exp(s - m)
        p = e * pl.reciprocal(jnp.sum(e, axis=-1, keepdims=True), approx=True)
        head_outs.append(jnp.einsum('bqk,bkd->bqd', p.astype(jnp.bfloat16),
                                    V3[:, :, lo:hi],
                                    preferred_element_type=jnp.float32))

    # concat(heads) -> one full-C output projection on the MXU
    att = jnp.concatenate(head_outs, axis=-1).astype(jnp.bfloat16)
    att = att.reshape(B * Tq, C)
    return jnp.dot(att, wp, preferred_element_type=jnp.float32) + bp


def _ffwd(h2, w1, b1, w2, b2, lng, lnb):
    """FeedForward: ln(x + W2 relu(W1 x)) on flattened (BT, C). Dropout = id."""
    a = jnp.dot(h2.astype(jnp.bfloat16), w1, preferred_element_type=jnp.float32) + b1
    a = jnp.maximum(a, 0.0)
    o = jnp.dot(a.astype(jnp.bfloat16), w2, preferred_element_type=jnp.float32) + b2
    return _layernorm(h2 + o, lng, lnb)


# ----------------------------------------------------------------------------
# Fused stack kernels (grid = (n_layers,), weight stacks streamed per layer)
# ----------------------------------------------------------------------------

def _encoder_stack_kernel(x0_ref,
                          wq_ref, bq_ref, wk_ref, bk_ref, wv_ref, bv_ref,
                          wp_ref, bp_ref,
                          g1_ref, be1_ref,
                          fw1_ref, fb1_ref, fw2_ref, fb2_ref, fg_ref, fbb_ref,
                          g2_ref, be2_ref,
                          k_out_ref, v_out_ref,
                          x_carry,
                          *, num_heads, head_size, B, T):
    l = pl.program_id(0)
    nl = pl.num_programs(0)

    @pl.when(l == 0)
    def _():
        x_carry[...] = x0_ref[...]

    x = x_carry[...]                                  # (B*T, C) f32

    # Full block for layers 0 .. nl-2
    @pl.when(l < nl - 1)
    def _():
        att = _attention(x, x, x,
                         wq_ref[0], bq_ref[0], wk_ref[0], bk_ref[0],
                         wv_ref[0], bv_ref[0], wp_ref[0], bp_ref[0],
                         B=B, Tq=T, Tk=T, num_heads=num_heads,
                         head_size=head_size, causal=False, use_padding=True)
        h1 = _layernorm(x + att, g1_ref[0], be1_ref[0])
        ff = _ffwd(h1, fw1_ref[0], fb1_ref[0], fw2_ref[0], fb2_ref[0],
                   fg_ref[0], fbb_ref[0])
        x_carry[...] = _layernorm(h1 + ff, g2_ref[0], be2_ref[0])

    # KV-only fast path for the LAST layer: only K, V of this layer's INPUT are
    # consumed by the model (encoder hidden state is discarded).
    @pl.when(l == nl - 1)
    def _():
        xb = x.astype(jnp.bfloat16)
        K = jnp.dot(xb, wk_ref[0], preferred_element_type=jnp.float32) + bk_ref[0]
        V = jnp.dot(xb, wv_ref[0], preferred_element_type=jnp.float32) + bv_ref[0]
        k_out_ref[...] = K.astype(jnp.bfloat16)
        v_out_ref[...] = V.astype(jnp.bfloat16)


def _decoder_stack_kernel(x0_ref, kenc_ref, venc_ref,
                          swq_ref, sbq_ref, swk_ref, sbk_ref, swv_ref, sbv_ref,
                          swp_ref, sbp_ref,
                          g1_ref, be1_ref,
                          cwq_ref, cbq_ref, cwk_ref, cbk_ref, cwv_ref, cbv_ref,
                          cwp_ref, cbp_ref,
                          g2_ref, be2_ref,
                          fw1_ref, fb1_ref, fw2_ref, fb2_ref, fg_ref, fbb_ref,
                          g3_ref, be3_ref,
                          x_out_ref,
                          x_carry,
                          *, num_heads, head_size, B, Td, Te):
    l = pl.program_id(0)
    nl = pl.num_programs(0)

    @pl.when(l == 0)
    def _():
        x_carry[...] = x0_ref[...]

    x = x_carry[...]                                  # (B*Td, C) f32

    # masked (causal + padding) self attention
    att = _attention(x, x, x,
                     swq_ref[0], sbq_ref[0], swk_ref[0], sbk_ref[0],
                     swv_ref[0], sbv_ref[0], swp_ref[0], sbp_ref[0],
                     B=B, Tq=Td, Tk=Td, num_heads=num_heads,
                     head_size=head_size, causal=True, use_padding=True)
    h1 = _layernorm(x + att, g1_ref[0], be1_ref[0])

    # cross attention: queries from h1; K/V re-projected from encoder K/V
    catt = _attention(h1, kenc_ref[...], venc_ref[...],
                      cwq_ref[0], cbq_ref[0], cwk_ref[0], cbk_ref[0],
                      cwv_ref[0], cbv_ref[0], cwp_ref[0], cbp_ref[0],
                      B=B, Tq=Td, Tk=Te, num_heads=num_heads,
                      head_size=head_size, causal=False, use_padding=False)
    h2 = _layernorm(h1 + catt, g2_ref[0], be2_ref[0])

    ff = _ffwd(h2, fw1_ref[0], fb1_ref[0], fw2_ref[0], fb2_ref[0],
               fg_ref[0], fbb_ref[0])
    out = _layernorm(h2 + ff, g3_ref[0], be3_ref[0])
    x_carry[...] = out

    @pl.when(l == nl - 1)
    def _():
        x_out_ref[...] = out.astype(jnp.bfloat16)


def _lmhead_ce_kernel(x_ref, w_ref, b_ref, tgt_ref, logits_ref, loss_ref,
                      *, pad_id):
    """logits = x @ W + b; masked mean cross-entropy (no one-hot)."""
    x = x_ref[...]                                     # (N, C) bf16
    logits = (jnp.dot(x.astype(jnp.bfloat16), w_ref[...],
                      preferred_element_type=jnp.float32) + b_ref[...])
    logits_ref[...] = logits

    tgt = tgt_ref[...]                                 # (N, 1) int32
    lane = lax.broadcasted_iota(jnp.int32, logits.shape, 1)     # (N, V)
    m = jnp.max(logits, axis=-1, keepdims=True)
    lse = jnp.log(jnp.sum(jnp.exp(logits - m), axis=-1, keepdims=True)) + m
    tlogit = jnp.sum(jnp.where(lane == tgt, logits, 0.0), axis=-1, keepdims=True)
    nll = lse - tlogit                                 # (N, 1)
    mask = (tgt != pad_id).astype(jnp.float32)         # (N, 1)
    num = jnp.sum(nll * mask, axis=0, keepdims=True)   # (1, 1)
    den = jnp.sum(mask, axis=0, keepdims=True)
    loss_ref[...] = num / den


# ----------------------------------------------------------------------------
# BlockSpec helpers + pallas_call wrappers
# ----------------------------------------------------------------------------

def _layer_spec(arr):
    """Stream one layer-slice of a (L, ...)-stacked weight per grid step."""
    rest = tuple(arr.shape[1:])
    return pl.BlockSpec((1,) + rest, lambda l, _n=len(rest): (l,) + (0,) * _n)


def _whole_spec(shape):
    """Whole array resident in VMEM, same block for every grid step."""
    nd = len(shape)
    return pl.BlockSpec(tuple(shape), lambda l, _n=nd: (0,) * _n)


def encoder_stack_forward(x_emb, stack, *, num_heads, head_size):
    B, T, C = x_emb.shape
    a, f = stack['attn'], stack['ffwd']
    L = a['wq'].shape[0]
    x0 = x_emb.reshape(B * T, C)
    weights = [a['wq'], a['bq'], a['wk'], a['bk'], a['wv'], a['bv'],
               a['wp'], a['bp'],
               stack['ln1']['g'], stack['ln1']['b'],
               f['w1'], f['b1'], f['w2'], f['b2'], f['ln_g'], f['ln_b'],
               stack['ln2']['g'], stack['ln2']['b']]
    kern = functools.partial(_encoder_stack_kernel, num_heads=num_heads,
                             head_size=head_size, B=B, T=T)
    flops_layer = 8 * B * T * C * C + 4 * B * T * T * C + 16 * B * T * C * C
    cost = pl.CostEstimate(
        flops=int((L - 1) * flops_layer + 4 * B * T * C * C),
        transcendentals=int(max(L - 1, 0) * B * num_heads * T * T),
        bytes_accessed=int(x0.nbytes + sum(w.nbytes for w in weights)
                           + 2 * B * T * C * 2))
    K, V = pl.pallas_call(
        kern,
        grid=(L,),
        out_shape=(jax.ShapeDtypeStruct((B * T, C), jnp.bfloat16),
                   jax.ShapeDtypeStruct((B * T, C), jnp.bfloat16)),
        in_specs=[_whole_spec((B * T, C))] + [_layer_spec(w) for w in weights],
        out_specs=(_whole_spec((B * T, C)), _whole_spec((B * T, C))),
        scratch_shapes=[pltpu.VMEM((B * T, C), jnp.float32)],
        compiler_params=pltpu.CompilerParams(dimension_semantics=("arbitrary",)),
        cost_estimate=cost,
    )(x0, *weights)
    return K, V                                        # (B*T, C) bf16 each


def decoder_stack_forward(x_emb, k_enc, v_enc, stack, *, num_heads, head_size):
    B, Td, C = x_emb.shape
    Te = k_enc.shape[0] // B
    sa, ca, f = stack['self_attn'], stack['cross_attn'], stack['ffwd']
    L = sa['wq'].shape[0]
    x0 = x_emb.reshape(B * Td, C)
    weights = [sa['wq'], sa['bq'], sa['wk'], sa['bk'], sa['wv'], sa['bv'],
               sa['wp'], sa['bp'],
               stack['ln1']['g'], stack['ln1']['b'],
               ca['wq'], ca['bq'], ca['wk'], ca['bk'], ca['wv'], ca['bv'],
               ca['wp'], ca['bp'],
               stack['ln2']['g'], stack['ln2']['b'],
               f['w1'], f['b1'], f['w2'], f['b2'], f['ln_g'], f['ln_b'],
               stack['ln3']['g'], stack['ln3']['b']]
    kern = functools.partial(_decoder_stack_kernel, num_heads=num_heads,
                             head_size=head_size, B=B, Td=Td, Te=Te)
    flops_layer = (16 * B * Td * C * C + 4 * B * Td * Td * C
                   + 4 * B * Td * Te * C + 16 * B * Td * C * C)
    cost = pl.CostEstimate(
        flops=int(L * flops_layer),
        transcendentals=int(L * B * num_heads * (Td * Td + Td * Te)),
        bytes_accessed=int(x0.nbytes + k_enc.nbytes + v_enc.nbytes
                           + sum(w.nbytes for w in weights) + B * Td * C * 2))
    x_out = pl.pallas_call(
        kern,
        grid=(L,),
        out_shape=jax.ShapeDtypeStruct((B * Td, C), jnp.bfloat16),
        in_specs=[_whole_spec((B * Td, C)),
                  _whole_spec((B * Te, C)),
                  _whole_spec((B * Te, C))] + [_layer_spec(w) for w in weights],
        out_specs=_whole_spec((B * Td, C)),
        scratch_shapes=[pltpu.VMEM((B * Td, C), jnp.float32)],
        compiler_params=pltpu.CompilerParams(dimension_semantics=("arbitrary",)),
        cost_estimate=cost,
    )(x0, k_enc, v_enc, *weights)
    return x_out                                       # (B*Td, C) bf16


def lm_head_and_loss(x_flat, w, b, targets, pad_id):
    N, C = x_flat.shape
    V = w.shape[1]
    tgt = targets.reshape(N, 1).astype(jnp.int32)
    kern = functools.partial(_lmhead_ce_kernel, pad_id=pad_id)
    cost = pl.CostEstimate(
        flops=int(2 * N * C * V),
        transcendentals=int(N * V),
        bytes_accessed=int(x_flat.nbytes + w.nbytes + b.nbytes + tgt.nbytes
                           + N * V * 4 + 4))
    logits, loss = pl.pallas_call(
        kern,
        out_shape=(jax.ShapeDtypeStruct((N, V), jnp.float32),
                   jax.ShapeDtypeStruct((1, 1), jnp.float32)),
        in_specs=[VMEM_SPEC] * 4,
        out_specs=(VMEM_SPEC, VMEM_SPEC),
        cost_estimate=cost,
    )(x_flat, w, b, tgt)
    return logits, loss[0, 0]


# ----------------------------------------------------------------------------
# Parameters (PyTorch nn.Linear weights stored transposed as (in, out), bf16;
# per-layer params stacked along a leading layer axis for the stack kernels)
# ----------------------------------------------------------------------------

def _uniform(key, shape, bound):
    return jax.random.uniform(key, shape, jnp.float32, -bound, bound)


def init_linear(key, fan_in, fan_out):
    kw, kb = jax.random.split(key)
    bound = 1.0 / (fan_in ** 0.5)
    w = _uniform(kw, (fan_in, fan_out), bound).astype(jnp.bfloat16)
    b = _uniform(kb, (1, fan_out), bound)                       # bias stays f32
    return w, b


def init_attn(key, n_embd):
    ks = jax.random.split(key, 4)
    wq, bq = init_linear(ks[0], n_embd, n_embd)
    wk, bk = init_linear(ks[1], n_embd, n_embd)
    wv, bv = init_linear(ks[2], n_embd, n_embd)
    wp, bp = init_linear(ks[3], n_embd, n_embd)
    return dict(wq=wq, bq=bq, wk=wk, bk=bk, wv=wv, bv=bv, wp=wp, bp=bp)


def init_ln(n_embd):
    return dict(g=jnp.ones((1, n_embd), jnp.float32),
                b=jnp.zeros((1, n_embd), jnp.float32))


def init_ffwd(key, n_embd):
    k1, k2 = jax.random.split(key)
    w1, b1 = init_linear(k1, n_embd, 4 * n_embd)
    w2, b2 = init_linear(k2, 4 * n_embd, n_embd)
    return dict(w1=w1, b1=b1, w2=w2, b2=b2,
                ln_g=jnp.ones((1, n_embd), jnp.float32),
                ln_b=jnp.zeros((1, n_embd), jnp.float32))


def _stack_layers(layer_dicts):
    return jax.tree_util.tree_map(lambda *xs: jnp.stack(xs, axis=0),
                                  *layer_dicts)


def init_params(key, n_embd, voc_size, block_size, n_heads, n_layers):
    keys = jax.random.split(key, 6 + 2 * n_layers)
    params = dict(
        enc_emb=jax.random.normal(keys[0], (voc_size, n_embd), jnp.float32),
        dec_emb=jax.random.normal(keys[1], (voc_size, n_embd), jnp.float32),
        pos_emb=jax.random.normal(keys[2], (block_size, n_embd), jnp.float32),
    )
    lm_w, lm_b = init_linear(keys[3], n_embd, voc_size)
    params['lm_head'] = dict(w=lm_w, b=lm_b)
    enc_blocks, dec_blocks = [], []
    for i in range(n_layers):
        ek = jax.random.split(keys[4 + i], 2)
        enc_blocks.append(dict(attn=init_attn(ek[0], n_embd),
                               ln1=init_ln(n_embd),
                               ffwd=init_ffwd(ek[1], n_embd),
                               ln2=init_ln(n_embd)))
        dk = jax.random.split(keys[4 + n_layers + i], 3)
        dec_blocks.append(dict(self_attn=init_attn(dk[0], n_embd),
                               ln1=init_ln(n_embd),
                               cross_attn=init_attn(dk[1], n_embd),
                               ln2=init_ln(n_embd),
                               ffwd=init_ffwd(dk[2], n_embd),
                               ln3=init_ln(n_embd)))
    params['enc_stack'] = _stack_layers(enc_blocks)
    params['dec_stack'] = _stack_layers(dec_blocks)
    return params


# ----------------------------------------------------------------------------
# Model glue (embedding gathers / concat left in XLA; hot path is the kernels)
# ----------------------------------------------------------------------------

def encoder_forward(params, src, cfg):
    T = src.shape[1]
    tok = jnp.take(params['enc_emb'], src, axis=0)
    pos_idx = jnp.clip(jnp.arange(T), 0, cfg['block_size'] - 1)
    x = tok + jnp.take(params['pos_emb'], pos_idx, axis=0)
    return encoder_stack_forward(x, params['enc_stack'],
                                 num_heads=cfg['n_heads'],
                                 head_size=cfg['head_size'])


def decoder_forward(params, dec_ids, k_enc, v_enc, cfg):
    T = dec_ids.shape[1]
    tok = jnp.take(params['dec_emb'], dec_ids, axis=0)
    pos_idx = jnp.clip(jnp.arange(T), 0, cfg['block_size'] - 1)
    x = tok + jnp.take(params['pos_emb'], pos_idx, axis=0)
    return decoder_stack_forward(x, k_enc, v_enc, params['dec_stack'],
                                 num_heads=cfg['n_heads'],
                                 head_size=cfg['head_size'])


def aiayn_forward(params, src, tgt, cfg):
    """Training-mode forward: returns (flattened logits, masked CE loss)."""
    B, _ = tgt.shape
    k_enc, v_enc = encoder_forward(params, src, cfg)       # (B*Te, C) bf16
    bos = jnp.full((B, 1), cfg['BOS'], dtype=tgt.dtype)
    dec_in = jnp.concatenate([bos, tgt[:, :-1]], axis=1)
    x_dec = decoder_forward(params, dec_in, k_enc, v_enc, cfg)   # (B*Td, C) bf16
    Td = dec_in.shape[1]
    C = cfg['n_embd']
    # last position's logits are discarded by the reference -> skip computing it
    x_flat = x_dec.reshape(B, Td, C)[:, :-1, :].reshape(-1, C)
    targets = tgt[:, 1:].reshape(-1)
    logits_flat, loss = lm_head_and_loss(x_flat, params['lm_head']['w'],
                                         params['lm_head']['b'], targets,
                                         cfg['PAD'])
    return logits_flat, loss


# ----------------------------------------------------------------------------

if __name__ == "__main__":
    n_embd, voc_size, block_size, n_heads, n_layers = 32, 128, 8, 4, 2
    cfg = dict(n_embd=n_embd, voc_size=voc_size, block_size=block_size,
               n_heads=n_heads, head_size=n_embd // n_heads,
               BOS=100, EOS=102, PAD=0)

    key = jax.random.PRNGKey(0)
    kp, ks, kt = jax.random.split(key, 3)
    params = init_params(kp, n_embd, voc_size, block_size, n_heads, n_layers)

    B, T_src, T_tgt = 2, 8, 8
    src = jax.random.randint(ks, (B, T_src), 1, voc_size, dtype=jnp.int32)
    tgt = jax.random.randint(kt, (B, T_tgt), 1, voc_size, dtype=jnp.int32)

    fwd = jax.jit(functools.partial(aiayn_forward, cfg=cfg))
    logits, loss = fwd(params, src, tgt)
    jax.block_until_ready((logits, loss))

    assert logits.shape == (B * (T_tgt - 1), voc_size)
    assert bool(jnp.isfinite(loss))
    print("KERNEL_OK")
</pallas_src>

<mosaic_0001>
module attributes {stable_mosaic.version = 11 : i64} {
  func.func @_encoder_stack_kernel(%arg0: i32, %arg1: memref<16x32xf32, #tpu.memory_space<vmem>>, %arg2: memref<1x32x32xbf16, #tpu.memory_space<vmem>>, %arg3: memref<1x1x32xf32, #tpu.memory_space<vmem>>, %arg4: memref<1x32x32xbf16, #tpu.memory_space<vmem>>, %arg5: memref<1x1x32xf32, #tpu.memory_space<vmem>>, %arg6: memref<1x32x32xbf16, #tpu.memory_space<vmem>>, %arg7: memref<1x1x32xf32, #tpu.memory_space<vmem>>, %arg8: memref<1x32x32xbf16, #tpu.memory_space<vmem>>, %arg9: memref<1x1x32xf32, #tpu.memory_space<vmem>>, %arg10: memref<1x1x32xf32, #tpu.memory_space<vmem>>, %arg11: memref<1x1x32xf32, #tpu.memory_space<vmem>>, %arg12: memref<1x32x128xbf16, #tpu.memory_space<vmem>>, %arg13: memref<1x1x128xf32, #tpu.memory_space<vmem>>, %arg14: memref<1x128x32xbf16, #tpu.memory_space<vmem>>, %arg15: memref<1x1x32xf32, #tpu.memory_space<vmem>>, %arg16: memref<1x1x32xf32, #tpu.memory_space<vmem>>, %arg17: memref<1x1x32xf32, #tpu.memory_space<vmem>>, %arg18: memref<1x1x32xf32, #tpu.memory_space<vmem>>, %arg19: memref<1x1x32xf32, #tpu.memory_space<vmem>>, %arg20: memref<16x32xbf16, #tpu.memory_space<vmem>>, %arg21: memref<16x32xbf16, #tpu.memory_space<vmem>>, %arg22: memref<16x32xf32, #tpu.memory_space<vmem>>) attributes {dimension_semantics = [#tpu.dimension_semantics<arbitrary>], iteration_bounds = array<i64: 2>, scalar_prefetch = 0 : i64, scratch_operands = 1 : i64, tpu.core_type = #tpu.core_type<tc>, window_params = [{pipeline_mode = #tpu.pipeline_mode<synchronous>, transform_indices = @transform_0, window_bounds = array<i64: 16, 32>}, {transform_indices = @transform_1, window_bounds = array<i64: 1, 32, 32>}, {transform_indices = @transform_2, window_bounds = array<i64: 1, 1, 32>}, {transform_indices = @transform_3, window_bounds = array<i64: 1, 32, 32>}, {transform_indices = @transform_4, window_bounds = array<i64: 1, 1, 32>}, {transform_indices = @transform_5, window_bounds = array<i64: 1, 32, 32>}, {transform_indices = @transform_6, window_bounds = array<i64: 1, 1, 32>}, {transform_indices = @transform_7, window_bounds = array<i64: 1, 32, 32>}, {transform_indices = @transform_8, window_bounds = array<i64: 1, 1, 32>}, {transform_indices = @transform_9, window_bounds = array<i64: 1, 1, 32>}, {transform_indices = @transform_10, window_bounds = array<i64: 1, 1, 32>}, {transform_indices = @transform_11, window_bounds = array<i64: 1, 32, 128>}, {transform_indices = @transform_12, window_bounds = array<i64: 1, 1, 128>}, {transform_indices = @transform_13, window_bounds = array<i64: 1, 128, 32>}, {transform_indices = @transform_14, window_bounds = array<i64: 1, 1, 32>}, {transform_indices = @transform_15, window_bounds = array<i64: 1, 1, 32>}, {transform_indices = @transform_16, window_bounds = array<i64: 1, 1, 32>}, {transform_indices = @transform_17, window_bounds = array<i64: 1, 1, 32>}, {transform_indices = @transform_18, window_bounds = array<i64: 1, 1, 32>}, {pipeline_mode = #tpu.pipeline_mode<synchronous>, transform_indices = @transform_19, window_bounds = array<i64: 16, 32>}, {pipeline_mode = #tpu.pipeline_mode<synchronous>, transform_indices = @transform_20, window_bounds = array<i64: 16, 32>}]} {
    %c0_i32 = arith.constant 0 : i32
    %0 = arith.cmpi eq, %arg0, %c0_i32 : i32
    %1 = arith.extui %0 : i1 to i32
    %c0_i32_0 = arith.constant 0 : i32
    %2 = arith.cmpi ne, %1, %c0_i32_0 : i32
    scf.if %2 {
      %c0_5 = arith.constant 0 : index
      %c0_6 = arith.constant 0 : index
      %10 = vector.load %arg1[%c0_5, %c0_6] : memref<16x32xf32, #tpu.memory_space<vmem>>, vector<16x32xf32>
      %c0_7 = arith.constant 0 : index
      %c0_8 = arith.constant 0 : index
      %11 = vector.load %arg22[%c0_7, %c0_8] : memref<16x32xf32, #tpu.memory_space<vmem>>, vector<16x32xf32>
      tpu.vector_store %arg22[%c0_7, %c0_8], %10 {strides = array<i32>} : memref<16x32xf32, #tpu.memory_space<vmem>>, vector<16x32xf32>,
    } else {
    }
    %c0 = arith.constant 0 : index
    %c0_1 = arith.constant 0 : index
    %3 = vector.load %arg22[%c0, %c0_1] : memref<16x32xf32, #tpu.memory_space<vmem>>, vector<16x32xf32>
    %c1_i32 = arith.constant 1 : i32
    %4 = arith.cmpi slt, %arg0, %c1_i32 : i32
    %5 = arith.extui %4 : i1 to i32
    %c0_i32_2 = arith.constant 0 : i32
    %6 = arith.cmpi ne, %5, %c0_i32_2 : i32
    scf.if %6 {
      %c0_5 = arith.constant 0 : index
      %c0_6 = arith.constant 0 : index
      %c0_7 = arith.constant 0 : index
      %10 = vector.load %arg2[%c0_5, %c0_6, %c0_7] : memref<1x32x32xbf16, #tpu.memory_space<vmem>>, vector<1x32x32xbf16>
      %11 = vector.shape_cast %10 : vector<1x32x32xbf16> to vector<32x32xbf16>
      %c0_8 = arith.constant 0 : index
      %c0_9 = arith.constant 0 : index
      %c0_10 = arith.constant 0 : index
      %12 = vector.load %arg3[%c0_8, %c0_9, %c0_10] : memref<1x1x32xf32, #tpu.memory_space<vmem>>, vector<1x1x32xf32>
      %13 = vector.shape_cast %12 : vector<1x1x32xf32> to vector<1x32xf32>
      %c0_11 = arith.constant 0 : index
      %c0_12 = arith.constant 0 : index
      %c0_13 = arith.constant 0 : index
      %14 = vector.load %arg4[%c0_11, %c0_12, %c0_13] : memref<1x32x32xbf16, #tpu.memory_space<vmem>>, vector<1x32x32xbf16>
      %15 = vector.shape_cast %14 : vector<1x32x32xbf16> to vector<32x32xbf16>
      %c0_14 = arith.constant 0 : index
      %c0_15 = arith.constant 0 : index
      %c0_16 = arith.constant 0 : index
      %16 = vector.load %arg5[%c0_14, %c0_15, %c0_16] : memref<1x1x32xf32, #tpu.memory_space<vmem>>, vector<1x1x32xf32>
      %17 = vector.shape_cast %16 : vector<1x1x32xf32> to vector<1x32xf32>
      %c0_17 = arith.constant 0 : index
      %c0_18 = arith.constant 0 : index
      %c0_19 = arith.constant 0 : index
      %18 = vector.load %arg6[%c0_17, %c0_18, %c0_19] : memref<1x32x32xbf16, #tpu.memory_space<vmem>>, vector<1x32x32xbf16>
      %19 = vector.shape_cast %18 : vector<1x32x32xbf16> to vector<32x32xbf16>
      %c0_20 = arith.constant 0 : index
      %c0_21 = arith.constant 0 : index
      %c0_22 = arith.constant 0 : index
      %20 = vector.load %arg7[%c0_20, %c0_21, %c0_22] : memref<1x1x32xf32, #tpu.memory_space<vmem>>, vector<1x1x32xf32>
      %21 = vector.shape_cast %20 : vector<1x1x32xf32> to vector<1x32xf32>
      %c0_23 = arith.constant 0 : index
      %c0_24 = arith.constant 0 : index
      %c0_25 = arith.constant 0 : index
      %22 = vector.load %arg8[%c0_23, %c0_24, %c0_25] : memref<1x32x32xbf16, #tpu.memory_space<vmem>>, vector<1x32x32xbf16>
      %23 = vector.shape_cast %22 : vector<1x32x32xbf16> to vector<32x32xbf16>
      %c0_26 = arith.constant 0 : index
      %c0_27 = arith.constant 0 : index
      %c0_28 = arith.constant 0 : index
      %24 = vector.load %arg9[%c0_26, %c0_27, %c0_28] : memref<1x1x32xf32, #tpu.memory_space<vmem>>, vector<1x1x32xf32>
      %25 = vector.shape_cast %24 : vector<1x1x32xf32> to vector<1x32xf32>
      %26 = arith.truncf %3 : vector<16x32xf32> to vector<16x32xbf16>
      %27 = arith.truncf %3 : vector<16x32xf32> to vector<16x32xbf16>
      %28 = arith.truncf %3 : vector<16x32xf32> to vector<16x32xbf16>
      %cst = arith.constant dense<0.000000e+00> : vector<16x32xf32>
      %29 = tpu.matmul %26, %11, %cst {dimension_numbers = #tpu.dot_dimension_numbers<[1], [0], [0], [1], [0, 0, 1, 1], [], []>} : vector<16x32xbf16>, vector<32x32xbf16>, vector<16x32xf32> -> vector<16x32xf32>
      %30 = vector.broadcast %13 : vector<1x32xf32> to vector<16x32xf32>
      %31 = arith.addf %29, %30 : vector<16x32xf32>
      %cst_29 = arith.constant 0.353553385 : f32
      %32 = vector.broadcast %cst_29 : f32 to vector<16x32xf32>
      %33 = arith.mulf %31, %32 : vector<16x32xf32>
      %cst_30 = arith.constant dense<0.000000e+00> : vector<16x32xf32>
      %34 = tpu.matmul %27, %15, %cst_30 {dimension_numbers = #tpu.dot_dimension_numbers<[1], [0], [0], [1], [0, 0, 1, 1], [], []>} : vector<16x32xbf16>, vector<32x32xbf16>, vector<16x32xf32> -> vector<16x32xf32>
      %35 = vector.broadcast %17 : vector<1x32xf32> to vector<16x32xf32>
      %36 = arith.addf %34, %35 : vector<16x32xf32>
      %cst_31 = arith.constant dense<0.000000e+00> : vector<16x32xf32>
      %37 = tpu.matmul %28, %19, %cst_31 {dimension_numbers = #tpu.dot_dimension_numbers<[1], [0], [0], [1], [0, 0, 1, 1], [], []>} : vector<16x32xbf16>, vector<32x32xbf16>, vector<16x32xf32> -> vector<16x32xf32>
      %38 = vector.broadcast %21 : vector<1x32xf32> to vector<16x32xf32>
      %39 = arith.addf %37, %38 : vector<16x32xf32>
      %40 = arith.truncf %33 : vector<16x32xf32> to vector<16x32xbf16>
      %41 = vector.shape_cast %40 : vector<16x32xbf16> to vector<2x8x32xbf16>
      %42 = arith.truncf %36 : vector<16x32xf32> to vector<16x32xbf16>
      %43 = vector.shape_cast %42 : vector<16x32xbf16> to vector<2x8x32xbf16>
      %44 = arith.truncf %39 : vector<16x32xf32> to vector<16x32xbf16>
      %45 = vector.shape_cast %44 : vector<16x32xbf16> to vector<2x8x32xbf16>
      %46 = vector.shape_cast %3 : vector<16x32xf32> to vector<2x8x32xf32>
      %47 = vector.extract_strided_slice %46 {offsets = [0, 0, 0], sizes = [2, 8, 1], strides = [1, 1, 1]} : vector<2x8x32xf32> to vector<2x8x1xf32>
      %48 = vector.shape_cast %47 : vector<2x8x1xf32> to vector<2x8xf32>
      %cst_32 = arith.constant 0.000000e+00 : f32
      %49 = vector.broadcast %cst_32 : f32 to vector<2x8xf32>
      %50 = arith.cmpf one, %48, %49 : vector<2x8xf32>
      %51 = vector.shape_cast %50 : vector<2x8xi1> to vector<2x8x1xi1>
      %52 = vector.shape_cast %50 : vector<2x8xi1> to vector<2x1x8xi1>
      %53 = vector.broadcast %51 : vector<2x8x1xi1> to vector<2x8x8xi1>
      %54 = vector.broadcast %52 : vector<2x1x8xi1> to vector<2x8x8xi1>
      %55 = arith.andi %53, %54 : vector<2x8x8xi1>
      %cst_33 = arith.constant 0.000000e+00 : f32
      %cst_34 = arith.constant -1.000000e+30 : f32
      %56 = vector.broadcast %cst_33 : f32 to vector<2x8x8xf32>
      %57 = vector.broadcast %cst_34 : f32 to vector<2x8x8xf32>
      %58 = arith.select %55, %56, %57 : vector<2x8x8xi1>, vector<2x8x8xf32>
      %59 = vector.extract_strided_slice %41 {offsets = [0, 0, 0], sizes = [2, 8, 8], strides = [1, 1, 1]} : vector<2x8x32xbf16> to vector<2x8x8xbf16>
      %60 = vector.extract_strided_slice %43 {offsets = [0, 0, 0], sizes = [2, 8, 8], strides = [1, 1, 1]} : vector<2x8x32xbf16> to vector<2x8x8xbf16>
      "tpu.trace_start"() <{level = 10 : i32, message = "bqd,bkd->bqk"}> : () -> ()
      %cst_35 = arith.constant dense<0.000000e+00> : vector<2x8x8xf32>
      %61 = tpu.matmul %59, %60, %cst_35 {dimension_numbers = #tpu.dot_dimension_numbers<[2], [2], [1], [1], [0, 0, 0, 1, 1, 1], [0], [0]>} : vector<2x8x8xbf16>, vector<2x8x8xbf16>, vector<2x8x8xf32> -> vector<2x8x8xf32>
      "tpu.trace_stop"() : () -> ()
      %62 = arith.addf %61, %58 : vector<2x8x8xf32>
      %cst_36 = arith.constant dense<0xFF800000> : vector<2x8xf32>
      %63 = vector.multi_reduction <maximumf>, %62, %cst_36 [2] : vector<2x8x8xf32> to vector<2x8xf32>
      %64 = vector.shape_cast %63 : vector<2x8xf32> to vector<2x8x1xf32>
      %65 = vector.broadcast %64 : vector<2x8x1xf32> to vector<2x8x8xf32>
      %66 = arith.subf %62, %65 : vector<2x8x8xf32>
      %67 = math.exp %66 : vector<2x8x8xf32>
      %cst_37 = arith.constant dense<0.000000e+00> : vector<2x8xf32>
      %68 = vector.multi_reduction <add>, %67, %cst_37 [2] : vector<2x8x8xf32> to vector<2x8xf32>
      %69 = vector.shape_cast %68 : vector<2x8xf32> to vector<2x8x1xf32>
      %70 = tpu.reciprocal %69 {approx = true} : vector<2x8x1xf32> -> vector<2x8x1xf32>
      %71 = vector.broadcast %70 : vector<2x8x1xf32> to vector<2x8x8xf32>
      %72 = arith.mulf %67, %71 : vector<2x8x8xf32>
      %73 = arith.truncf %72 : vector<2x8x8xf32> to vector<2x8x8xbf16>
      %74 = vector.extract_strided_slice %45 {offsets = [0, 0, 0], sizes = [2, 8, 8], strides = [1, 1, 1]} : vector<2x8x32xbf16> to vector<2x8x8xbf16>
      "tpu.trace_start"() <{level = 10 : i32, message = "bqk,bkd->bqd"}> : () -> ()
      %cst_38 = arith.constant dense<0.000000e+00> : vector<2x8x8xf32>
      %75 = tpu.matmul %73, %74, %cst_38 {dimension_numbers = #tpu.dot_dimension_numbers<[2], [1], [1], [2], [0, 0, 0, 1, 1, 2], [0], [0]>} : vector<2x8x8xbf16>, vector<2x8x8xbf16>, vector<2x8x8xf32> -> vector<2x8x8xf32>
      "tpu.trace_stop"() : () -> ()
      %76 = vector.extract_strided_slice %41 {offsets = [0, 0, 8], sizes = [2, 8, 8], strides = [1, 1, 1]} : vector<2x8x32xbf16> to vector<2x8x8xbf16>
      %77 = vector.extract_strided_slice %43 {offsets = [0, 0, 8], sizes = [2, 8, 8], strides = [1, 1, 1]} : vector<2x8x32xbf16> to vector<2x8x8xbf16>
      "tpu.trace_start"() <{level = 10 : i32, message = "bqd,bkd->bqk"}> : () -> ()
      %cst_39 = arith.constant dense<0.000000e+00> : vector<2x8x8xf32>
      %78 = tpu.matmul %76, %77, %cst_39 {dimension_numbers = #tpu.dot_dimension_numbers<[2], [2], [1], [1], [0, 0, 0, 1, 1, 1], [0], [0]>} : vector<2x8x8xbf16>, vector<2x8x8xbf16>, vector<2x8x8xf32> -> vector<2x8x8xf32>
      "tpu.trace_stop"() : () -> ()
      %79 = arith.addf %78, %58 : vector<2x8x8xf32>
      %cst_40 = arith.constant dense<0xFF800000> : vector<2x8xf32>
      %80 = vector.multi_reduction <maximumf>, %79, %cst_40 [2] : vector<2x8x8xf32> to vector<2x8xf32>
      %81 = vector.shape_cast %80 : vector<2x8xf32> to vector<2x8x1xf32>
      %82 = vector.broadcast %81 : vector<2x8x1xf32> to vector<2x8x8xf32>
      %83 = arith.subf %79, %82 : vector<2x8x8xf32>
      %84 = math.exp %83 : vector<2x8x8xf32>
      %cst_41 = arith.constant dense<0.000000e+00> : vector<2x8xf32>
      %85 = vector.multi_reduction <add>, %84, %cst_41 [2] : vector<2x8x8xf32> to vector<2x8xf32>
      %86 = vector.shape_cast %85 : vector<2x8xf32> to vector<2x8x1xf32>
      %87 = tpu.reciprocal %86 {approx = true} : vector<2x8x1xf32> -> vector<2x8x1xf32>
      %88 = vector.broadcast %87 : vector<2x8x1xf32> to vector<2x8x8xf32>
      %89 = arith.mulf %84, %88 : vector<2x8x8xf32>
      %90 = arith.truncf %89 : vector<2x8x8xf32> to vector<2x8x8xbf16>
      %91 = vector.extract_strided_slice %45 {offsets = [0, 0, 8], sizes = [2, 8, 8], strides = [1, 1, 1]} : vector<2x8x32xbf16> to vector<2x8x8xbf16>
      "tpu.trace_start"() <{level = 10 : i32, message = "bqk,bkd->bqd"}> : () -> ()
      %cst_42 = arith.constant dense<0.000000e+00> : vector<2x8x8xf32>
      %92 = tpu.matmul %90, %91, %cst_42 {dimension_numbers = #tpu.dot_dimension_numbers<[2], [1], [1], [2], [0, 0, 0, 1, 1, 2], [0], [0]>} : vector<2x8x8xbf16>, vector<2x8x8xbf16>, vector<2x8x8xf32> -> vector<2x8x8xf32>
      "tpu.trace_stop"() : () -> ()
      %93 = vector.extract_strided_slice %41 {offsets = [0, 0, 16], sizes = [2, 8, 8], strides = [1, 1, 1]} : vector<2x8x32xbf16> to vector<2x8x8xbf16>
      %94 = vector.extract_strided_slice %43 {offsets = [0, 0, 16], sizes = [2, 8, 8], strides = [1, 1, 1]} : vector<2x8x32xbf16> to vector<2x8x8xbf16>
      "tpu.trace_start"() <{level = 10 : i32, message = "bqd,bkd->bqk"}> : () -> ()
      %cst_43 = arith.constant dense<0.000000e+00> : vector<2x8x8xf32>
      %95 = tpu.matmul %93, %94, %cst_43 {dimension_numbers = #tpu.dot_dimension_numbers<[2], [2], [1], [1], [0, 0, 0, 1, 1, 1], [0], [0]>} : vector<2x8x8xbf16>, vector<2x8x8xbf16>, vector<2x8x8xf32> -> vector<2x8x8xf32>
      "tpu.trace_stop"() : () -> ()
      %96 = arith.addf %95, %58 : vector<2x8x8xf32>
      %cst_44 = arith.constant dense<0xFF800000> : vector<2x8xf32>
      %97 = vector.multi_reduction <maximumf>, %96, %cst_44 [2] : vector<2x8x8xf32> to vector<2x8xf32>
      %98 = vector.shape_cast %97 : vector<2x8xf32> to vector<2x8x1xf32>
      %99 = vector.broadcast %98 : vector<2x8x1xf32> to vector<2x8x8xf32>
      %100 = arith.subf %96, %99 : vector<2x8x8xf32>
      %101 = math.exp %100 : vector<2x8x8xf32>
      %cst_45 = arith.constant dense<0.000000e+00> : vector<2x8xf32>
      %102 = vector.multi_reduction <add>, %101, %cst_45 [2] : vector<2x8x8xf32> to vector<2x8xf32>
      %103 = vector.shape_cast %102 : vector<2x8xf32> to vector<2x8x1xf32>
      %104 = tpu.reciprocal %103 {approx = true} : vector<2x8x1xf32> -> vector<2x8x1xf32>
      %105 = vector.broadcast %104 : vector<2x8x1xf32> to vector<2x8x8xf32>
      %106 = arith.mulf %101, %105 : vector<2x8x8xf32>
      %107 = arith.truncf %106 : vector<2x8x8xf32> to vector<2x8x8xbf16>
      %108 = vector.extract_strided_slice %45 {offsets = [0, 0, 16], sizes = [2, 8, 8], strides = [1, 1, 1]} : vector<2x8x32xbf16> to vector<2x8x8xbf16>
      "tpu.trace_start"() <{level = 10 : i32, message = "bqk,bkd->bqd"}> : () -> ()
      %cst_46 = arith.constant dense<0.000000e+00> : vector<2x8x8xf32>
      %109 = tpu.matmul %107, %108, %cst_46 {dimension_numbers = #tpu.dot_dimension_numbers<[2], [1], [1], [2], [0, 0, 0, 1, 1, 2], [0], [0]>} : vector<2x8x8xbf16>, vector<2x8x8xbf16>, vector<2x8x8xf32> -> vector<2x8x8xf32>
      "tpu.trace_stop"() : () -> ()
      %110 = vector.extract_strided_slice %41 {offsets = [0, 0, 24], sizes = [2, 8, 8], strides = [1, 1, 1]} : vector<2x8x32xbf16> to vector<2x8x8xbf16>
      %111 = vector.extract_strided_slice %43 {offsets = [0, 0, 24], sizes = [2, 8, 8], strides = [1, 1, 1]} : vector<2x8x32xbf16> to vector<2x8x8xbf16>
      "tpu.trace_start"() <{level = 10 : i32, message = "bqd,bkd->bqk"}> : () -> ()
      %cst_47 = arith.constant dense<0.000000e+00> : vector<2x8x8xf32>
      %112 = tpu.matmul %110, %111, %cst_47 {dimension_numbers = #tpu.dot_dimension_numbers<[2], [2], [1], [1], [0, 0, 0, 1, 1, 1], [0], [0]>} : vector<2x8x8xbf16>, vector<2x8x8xbf16>, vector<2x8x8xf32> -> vector<2x8x8xf32>
      "tpu.trace_stop"() : () -> ()
      %113 = arith.addf %112, %58 : vector<2x8x8xf32>
      %cst_48 = arith.constant dense<0xFF800000> : vector<2x8xf32>
      %114 = vector.multi_reduction <maximumf>, %113, %cst_48 [2] : vector<2x8x8xf32> to vector<2x8xf32>
      %115 = vector.shape_cast %114 : vector<2x8xf32> to vector<2x8x1xf32>
      %116 = vector.broadcast %115 : vector<2x8x1xf32> to vector<2x8x8xf32>
      %117 = arith.subf %113, %116 : vector<2x8x8xf32>
      %118 = math.exp %117 : vector<2x8x8xf32>
      %cst_49 = arith.constant dense<0.000000e+00> : vector<2x8xf32>
      %119 = vector.multi_reduction <add>, %118, %cst_49 [2] : vector<2x8x8xf32> to vector<2x8xf32>
      %120 = vector.shape_cast %119 : vector<2x8xf32> to vector<2x8x1xf32>
      %121 = tpu.reciprocal %120 {approx = true} : vector<2x8x1xf32> -> vector<2x8x1xf32>
      %122 = vector.broadcast %121 : vector<2x8x1xf32> to vector<2x8x8xf32>
      %123 = arith.mulf %118, %122 : vector<2x8x8xf32>
      %124 = arith.truncf %123 : vector<2x8x8xf32> to vector<2x8x8xbf16>
      %125 = vector.extract_strided_slice %45 {offsets = [0, 0, 24], sizes = [2, 8, 8], strides = [1, 1, 1]} : vector<2x8x32xbf16> to vector<2x8x8xbf16>
      "tpu.trace_start"() <{level = 10 : i32, message = "bqk,bkd->bqd"}> : () -> ()
      %cst_50 = arith.constant dense<0.000000e+00> : vector<2x8x8xf32>
      %126 = tpu.matmul %124, %125, %cst_50 {dimension_numbers = #tpu.dot_dimension_numbers<[2], [1], [1], [2], [0, 0, 0, 1, 1, 2], [0], [0]>} : vector<2x8x8xbf16>, vector<2x8x8xbf16>, vector<2x8x8xf32> -> vector<2x8x8xf32>
      "tpu.trace_stop"() : () -> ()
      %127 = tpu.concatenate %75, %92, %109, %126 in 2 : vector<2x8x8xf32>, vector<2x8x8xf32>, vector<2x8x8xf32>, vector<2x8x8xf32> -> vector<2x8x32xf32>
      %128 = arith.truncf %127 : vector<2x8x32xf32> to vector<2x8x32xbf16>
      %129 = vector.shape_cast %128 : vector<2x8x32xbf16> to vector<16x32xbf16>
      %cst_51 = arith.constant dense<0.000000e+00> : vector<16x32xf32>
      %130 = tpu.matmul %129, %23, %cst_51 {dimension_numbers = #tpu.dot_dimension_numbers<[1], [0], [0], [1], [0, 0, 1, 1], [], []>} : vector<16x32xbf16>, vector<32x32xbf16>, vector<16x32xf32> -> vector<16x32xf32>
      %131 = vector.broadcast %25 : vector<1x32xf32> to vector<16x32xf32>
      %132 = arith.addf %130, %131 : vector<16x32xf32>
      %133 = arith.addf %3, %132 : vector<16x32xf32>
      %c0_52 = arith.constant 0 : index
      %c0_53 = arith.constant 0 : index
      %c0_54 = arith.constant 0 : index
      %134 = vector.load %arg10[%c0_52, %c0_53, %c0_54] : memref<1x1x32xf32, #tpu.memory_space<vmem>>, vector<1x1x32xf32>
      %135 = vector.shape_cast %134 : vector<1x1x32xf32> to vector<1x32xf32>
      %c0_55 = arith.constant 0 : index
      %c0_56 = arith.constant 0 : index
      %c0_57 = arith.constant 0 : index
      %136 = vector.load %arg11[%c0_55, %c0_56, %c0_57] : memref<1x1x32xf32, #tpu.memory_space<vmem>>, vector<1x1x32xf32>
      %137 = vector.shape_cast %136 : vector<1x1x32xf32> to vector<1x32xf32>
      %cst_58 = arith.constant dense<0.000000e+00> : vector<16xf32>
      %138 = vector.multi_reduction <add>, %133, %cst_58 [1] : vector<16x32xf32> to vector<16xf32>
      %139 = vector.shape_cast %138 : vector<16xf32> to vector<16x1xf32>
      %cst_59 = arith.constant 3.200000e+01 : f32
      %140 = vector.broadcast %cst_59 : f32 to vector<16x1xf32>
      %141 = arith.divf %139, %140 : vector<16x1xf32>
      %142 = vector.broadcast %141 : vector<16x1xf32> to vector<16x32xf32>
      %143 = arith.subf %133, %142 : vector<16x32xf32>
      %144 = arith.mulf %143, %143 : vector<16x32xf32>
      %cst_60 = arith.constant dense<0.000000e+00> : vector<16xf32>
      %145 = vector.multi_reduction <add>, %144, %cst_60 [1] : vector<16x32xf32> to vector<16xf32>
      %146 = vector.shape_cast %145 : vector<16xf32> to vector<16x1xf32>
      %cst_61 = arith.constant 3.200000e+01 : f32
      %147 = vector.broadcast %cst_61 : f32 to vector<16x1xf32>
      %148 = arith.divf %146, %147 : vector<16x1xf32>
      %cst_62 = arith.constant 9.99999974E-6 : f32
      %149 = vector.broadcast %cst_62 : f32 to vector<16x1xf32>
      %150 = arith.addf %148, %149 : vector<16x1xf32>
      %151 = math.rsqrt %150 : vector<16x1xf32>
      %152 = vector.broadcast %151 : vector<16x1xf32> to vector<16x32xf32>
      %153 = arith.mulf %143, %152 : vector<16x32xf32>
      %154 = vector.broadcast %135 : vector<1x32xf32> to vector<16x32xf32>
      %155 = arith.mulf %153, %154 : vector<16x32xf32>
      %156 = vector.broadcast %137 : vector<1x32xf32> to vector<16x32xf32>
      %157 = arith.addf %155, %156 : vector<16x32xf32>
      %c0_63 = arith.constant 0 : index
      %c0_64 = arith.constant 0 : index
      %c0_65 = arith.constant 0 : index
      %158 = vector.load %arg12[%c0_63, %c0_64, %c0_65] : memref<1x32x128xbf16, #tpu.memory_space<vmem>>, vector<1x32x128xbf16>
      %159 = vector.shape_cast %158 : vector<1x32x128xbf16> to vector<32x128xbf16>
      %c0_66 = arith.constant 0 : index
      %c0_67 = arith.constant 0 : index
      %c0_68 = arith.constant 0 : index
      %160 = vector.load %arg13[%c0_66, %c0_67, %c0_68] : memref<1x1x128xf32, #tpu.memory_space<vmem>>, vector<1x1x128xf32>
      %161 = vector.shape_cast %160 : vector<1x1x128xf32> to vector<1x128xf32>
      %c0_69 = arith.constant 0 : index
      %c0_70 = arith.constant 0 : index
      %c0_71 = arith.constant 0 : index
      %162 = vector.load %arg14[%c0_69, %c0_70, %c0_71] : memref<1x128x32xbf16, #tpu.memory_space<vmem>>, vector<1x128x32xbf16>
      %163 = vector.shape_cast %162 : vector<1x128x32xbf16> to vector<128x32xbf16>
      %c0_72 = arith.constant 0 : index
      %c0_73 = arith.constant 0 : index
      %c0_74 = arith.constant 0 : index
      %164 = vector.load %arg15[%c0_72, %c0_73, %c0_74] : memref<1x1x32xf32, #tpu.memory_space<vmem>>, vector<1x1x32xf32>
      %165 = vector.shape_cast %164 : vector<1x1x32xf32> to vector<1x32xf32>
      %c0_75 = arith.constant 0 : index
      %c0_76 = arith.constant 0 : index
      %c0_77 = arith.constant 0 : index
      %166 = vector.load %arg16[%c0_75, %c0_76, %c0_77] : memref<1x1x32xf32, #tpu.memory_space<vmem>>, vector<1x1x32xf32>
      %167 = vector.shape_cast %166 : vector<1x1x32xf32> to vector<1x32xf32>
      %c0_78 = arith.constant 0 : index
      %c0_79 = arith.constant 0 : index
      %c0_80 = arith.constant 0 : index
      %168 = vector.load %arg17[%c0_78, %c0_79, %c0_80] : memref<1x1x32xf32, #tpu.memory_space<vmem>>, vector<1x1x32xf32>
      %169 = vector.shape_cast %168 : vector<1x1x32xf32> to vector<1x32xf32>
      %170 = arith.truncf %157 : vector<16x32xf32> to vector<16x32xbf16>
      %cst_81 = arith.constant dense<0.000000e+00> : vector<16x128xf32>
      %171 = tpu.matmul %170, %159, %cst_81 {dimension_numbers = #tpu.dot_dimension_numbers<[1], [0], [0], [1], [0, 0, 1, 1], [], []>} : vector<16x32xbf16>, vector<32x128xbf16>, vector<16x128xf32> -> vector<16x128xf32>
      %172 = vector.broadcast %161 : vector<1x128xf32> to vector<16x128xf32>
      %173 = arith.addf %171, %172 : vector<16x128xf32>
      %cst_82 = arith.constant 0.000000e+00 : f32
      %174 = vector.broadcast %cst_82 : f32 to vector<16x128xf32>
      %175 = arith.maximumf %173, %174 : vector<16x128xf32>
      %176 = arith.truncf %175 : vector<16x128xf32> to vector<16x128xbf16>
      %cst_83 = arith.constant dense<0.000000e+00> : vector<16x32xf32>
      %177 = tpu.matmul %176, %163, %cst_83 {dimension_numbers = #tpu.dot_dimension_numbers<[1], [0], [0], [1], [0, 0, 1, 1], [], []>} : vector<16x128xbf16>, vector<128x32xbf16>, vector<16x32xf32> -> vector<16x32xf32>
      %178 = vector.broadcast %165 : vector<1x32xf32> to vector<16x32xf32>
      %179 = arith.addf %177, %178 : vector<16x32xf32>
      %180 = arith.addf %157, %179 : vector<16x32xf32>
      %cst_84 = arith.constant dense<0.000000e+00> : vector<16xf32>
      %181 = vector.multi_reduction <add>, %180, %cst_84 [1] : vector<16x32xf32> to vector<16xf32>
      %182 = vector.shape_cast %181 : vector<16xf32> to vector<16x1xf32>
      %cst_85 = arith.constant 3.200000e+01 : f32
      %183 = vector.broadcast %cst_85 : f32 to vector<16x1xf32>
      %184 = arith.divf %182, %183 : vector<16x1xf32>
      %185 = vector.broadcast %184 : vector<16x1xf32> to vector<16x32xf32>
      %186 = arith.subf %180, %185 : vector<16x32xf32>
      %187 = arith.mulf %186, %186 : vector<16x32xf32>
      %cst_86 = arith.constant dense<0.000000e+00> : vector<16xf32>
      %188 = vector.multi_reduction <add>, %187, %cst_86 [1] : vector<16x32xf32> to vector<16xf32>
      %189 = vector.shape_cast %188 : vector<16xf32> to vector<16x1xf32>
      %cst_87 = arith.constant 3.200000e+01 : f32
      %190 = vector.broadcast %cst_87 : f32 to vector<16x1xf32>
      %191 = arith.divf %189, %190 : vector<16x1xf32>
      %cst_88 = arith.constant 9.99999974E-6 : f32
      %192 = vector.broadcast %cst_88 : f32 to vector<16x1xf32>
      %193 = arith.addf %191, %192 : vector<16x1xf32>
      %194 = math.rsqrt %193 : vector<16x1xf32>
      %195 = vector.broadcast %194 : vector<16x1xf32> to vector<16x32xf32>
      %196 = arith.mulf %186, %195 : vector<16x32xf32>
      %197 = vector.broadcast %167 : vector<1x32xf32> to vector<16x32xf32>
      %198 = arith.mulf %196, %197 : vector<16x32xf32>
      %199 = vector.broadcast %169 : vector<1x32xf32> to vector<16x32xf32>
      %200 = arith.addf %198, %199 : vector<16x32xf32>
      %201 = arith.addf %157, %200 : vector<16x32xf32>
      %c0_89 = arith.constant 0 : index
      %c0_90 = arith.constant 0 : index
      %c0_91 = arith.constant 0 : index
      %202 = vector.load %arg18[%c0_89, %c0_90, %c0_91] : memref<1x1x32xf32, #tpu.memory_space<vmem>>, vector<1x1x32xf32>
      %203 = vector.shape_cast %202 : vector<1x1x32xf32> to vector<1x32xf32>
      %c0_92 = arith.constant 0 : index
      %c0_93 = arith.constant 0 : index
      %c0_94 = arith.constant 0 : index
      %204 = vector.load %arg19[%c0_92, %c0_93, %c0_94] : memref<1x1x32xf32, #tpu.memory_space<vmem>>, vector<1x1x32xf32>
      %205 = vector.shape_cast %204 : vector<1x1x32xf32> to vector<1x32xf32>
      %cst_95 = arith.constant dense<0.000000e+00> : vector<16xf32>
      %206 = vector.multi_reduction <add>, %201, %cst_95 [1] : vector<16x32xf32> to vector<16xf32>
      %207 = vector.shape_cast %206 : vector<16xf32> to vector<16x1xf32>
      %cst_96 = arith.constant 3.200000e+01 : f32
      %208 = vector.broadcast %cst_96 : f32 to vector<16x1xf32>
      %209 = arith.divf %207, %208 : vector<16x1xf32>
      %210 = vector.broadcast %209 : vector<16x1xf32> to vector<16x32xf32>
      %211 = arith.subf %201, %210 : vector<16x32xf32>
      %212 = arith.mulf %211, %211 : vector<16x32xf32>
      %cst_97 = arith.constant dense<0.000000e+00> : vector<16xf32>
      %213 = vector.multi_reduction <add>, %212, %cst_97 [1] : vector<16x32xf32> to vector<16xf32>
      %214 = vector.shape_cast %213 : vector<16xf32> to vector<16x1xf32>
      %cst_98 = arith.constant 3.200000e+01 : f32
      %215 = vector.broadcast %cst_98 : f32 to vector<16x1xf32>
      %216 = arith.divf %214, %215 : vector<16x1xf32>
      %cst_99 = arith.constant 9.99999974E-6 : f32
      %217 = vector.broadcast %cst_99 : f32 to vector<16x1xf32>
      %218 = arith.addf %216, %217 : vector<16x1xf32>
      %219 = math.rsqrt %218 : vector<16x1xf32>
      %220 = vector.broadcast %219 : vector<16x1xf32> to vector<16x32xf32>
      %221 = arith.mulf %211, %220 : vector<16x32xf32>
      %222 = vector.broadcast %203 : vector<1x32xf32> to vector<16x32xf32>
      %223 = arith.mulf %221, %222 : vector<16x32xf32>
      %224 = vector.broadcast %205 : vector<1x32xf32> to vector<16x32xf32>
      %225 = arith.addf %223, %224 : vector<16x32xf32>
      %c0_100 = arith.constant 0 : index
      %c0_101 = arith.constant 0 : index
      %226 = vector.load %arg22[%c0_100, %c0_101] : memref<16x32xf32, #tpu.memory_space<vmem>>, vector<16x32xf32>
      tpu.vector_store %arg22[%c0_100, %c0_101], %225 {strides = array<i32>} : memref<16x32xf32, #tpu.memory_space<vmem>>, vector<16x32xf32>,
    } else {
    }
    %c1_i32_3 = arith.constant 1 : i32
    %7 = arith.cmpi eq, %arg0, %c1_i32_3 : i32
    %8 = arith.extui %7 : i1 to i32
    %c0_i32_4 = arith.constant 0 : i32
    %9 = arith.cmpi ne, %8, %c0_i32_4 : i32
    scf.if %9 {
      %10 = arith.truncf %3 : vector<16x32xf32> to vector<16x32xbf16>
      %c0_5 = arith.constant 0 : index
      %c0_6 = arith.constant 0 : index
      %c0_7 = arith.constant 0 : index
      %11 = vector.load %arg4[%c0_5, %c0_6, %c0_7] : memref<1x32x32xbf16, #tpu.memory_space<vmem>>, vector<1x32x32xbf16>
      %12 = vector.shape_cast %11 : vector<1x32x32xbf16> to vector<32x32xbf16>
      %cst = arith.constant dense<0.000000e+00> : vector<16x32xf32>
      %13 = tpu.matmul %10, %12, %cst {dimension_numbers = #tpu.dot_dimension_numbers<[1], [0], [0], [1], [0, 0, 1, 1], [], []>} : vector<16x32xbf16>, vector<32x32xbf16>, vector<16x32xf32> -> vector<16x32xf32>
      %c0_8 = arith.constant 0 : index
      %c0_9 = arith.constant 0 : index
      %c0_10 = arith.constant 0 : index
      %14 = vector.load %arg5[%c0_8, %c0_9, %c0_10] : memref<1x1x32xf32, #tpu.memory_space<vmem>>, vector<1x1x32xf32>
      %15 = vector.shape_cast %14 : vector<1x1x32xf32> to vector<1x32xf32>
      %16 = vector.broadcast %15 : vector<1x32xf32> to vector<16x32xf32>
      %17 = arith.addf %13, %16 : vector<16x32xf32>
      %c0_11 = arith.constant 0 : index
      %c0_12 = arith.constant 0 : index
      %c0_13 = arith.constant 0 : index
      %18 = vector.load %arg6[%c0_11, %c0_12, %c0_13] : memref<1x32x32xbf16, #tpu.memory_space<vmem>>, vector<1x32x32xbf16>
      %19 = vector.shape_cast %18 : vector<1x32x32xbf16> to vector<32x32xbf16>
      %cst_14 = arith.constant dense<0.000000e+00> : vector<16x32xf32>
      %20 = tpu.matmul %10, %19, %cst_14 {dimension_numbers = #tpu.dot_dimension_numbers<[1], [0], [0], [1], [0, 0, 1, 1], [], []>} : vector<16x32xbf16>, vector<32x32xbf16>, vector<16x32xf32> -> vector<16x32xf32>
      %c0_15 = arith.constant 0 : index
      %c0_16 = arith.constant 0 : index
      %c0_17 = arith.constant 0 : index
      %21 = vector.load %arg7[%c0_15, %c0_16, %c0_17] : memref<1x1x32xf32, #tpu.memory_space<vmem>>, vector<1x1x32xf32>
      %22 = vector.shape_cast %21 : vector<1x1x32xf32> to vector<1x32xf32>
      %23 = vector.broadcast %22 : vector<1x32xf32> to vector<16x32xf32>
      %24 = arith.addf %20, %23 : vector<16x32xf32>
      %25 = arith.truncf %17 : vector<16x32xf32> to vector<16x32xbf16>
      %c0_18 = arith.constant 0 : index
      %c0_19 = arith.constant 0 : index
      %26 = vector.load %arg20[%c0_18, %c0_19] : memref<16x32xbf16, #tpu.memory_space<vmem>>, vector<16x32xbf16>
      tpu.vector_store %arg20[%c0_18, %c0_19], %25 {strides = array<i32>} : memref<16x32xbf16, #tpu.memory_space<vmem>>, vector<16x32xbf16>,
      %27 = arith.truncf %24 : vector<16x32xf32> to vector<16x32xbf16>
      %c0_20 = arith.constant 0 : index
      %c0_21 = arith.constant 0 : index
      %28 = vector.load %arg21[%c0_20, %c0_21] : memref<16x32xbf16, #tpu.memory_space<vmem>>, vector<16x32xbf16>
      tpu.vector_store %arg21[%c0_20, %c0_21], %27 {strides = array<i32>} : memref<16x32xbf16, #tpu.memory_space<vmem>>, vector<16x32xbf16>,
    } else {
    }
    return
  }
  func.func @transform_0(%arg0: i32) -> (i32, i32) {
    %c0_i32 = arith.constant 0 : i32
    %c0_i32_0 = arith.constant 0 : i32
    %c0_i32_1 = arith.constant 0 : i32
    return %c0_i32, %c0_i32_0 : i32, i32
  }
  func.func @transform_1(%arg0: i32) -> (i32, i32, i32) {
    %c0_i32 = arith.constant 0 : i32
    %c0_i32_0 = arith.constant 0 : i32
    %c0_i32_1 = arith.constant 0 : i32
    return %arg0, %c0_i32, %c0_i32_0 : i32, i32, i32
  }
  func.func @transform_2(%arg0: i32) -> (i32, i32, i32) {
    %c0_i32 = arith.constant 0 : i32
    %c0_i32_0 = arith.constant 0 : i32
    %c0_i32_1 = arith.constant 0 : i32
    return %arg0, %c0_i32, %c0_i32_0 : i32, i32, i32
  }
  func.func @transform_3(%arg0: i32) -> (i32, i32, i32) {
    %c0_i32 = arith.constant 0 : i32
    %c0_i32_0 = arith.constant 0 : i32
    %c0_i32_1 = arith.constant 0 : i32
    return %arg0, %c0_i32, %c0_i32_0 : i32, i32, i32
  }
  func.func @transform_4(%arg0: i32) -> (i32, i32, i32) {
    %c0_i32 = arith.constant 0 : i32
    %c0_i32_0 = arith.constant 0 : i32
    %c0_i32_1 = arith.constant 0 : i32
    return %arg0, %c0_i32, %c0_i32_0 : i32, i32, i32
  }
  func.func @transform_5(%arg0: i32) -> (i32, i32, i32) {
    %c0_i32 = arith.constant 0 : i32
    %c0_i32_0 = arith.constant 0 : i32
    %c0_i32_1 = arith.constant 0 : i32
    return %arg0, %c0_i32, %c0_i32_0 : i32, i32, i32
  }
  func.func @transform_6(%arg0: i32) -> (i32, i32, i32) {
    %c0_i32 = arith.constant 0 : i32
    %c0_i32_0 = arith.constant 0 : i32
    %c0_i32_1 = arith.constant 0 : i32
    return %arg0, %c0_i32, %c0_i32_0 : i32, i32, i32
  }
  func.func @transform_7(%arg0: i32) -> (i32, i32, i32) {
    %c0_i32 = arith.constant 0 : i32
    %c0_i32_0 = arith.constant 0 : i32
    %c0_i32_1 = arith.constant 0 : i32
    return %arg0, %c0_i32, %c0_i32_0 : i32, i32, i32
  }
  func.func @transform_8(%arg0: i32) -> (i32, i32, i32) {
    %c0_i32 = arith.constant 0 : i32
    %c0_i32_0 = arith.constant 0 : i32
    %c0_i32_1 = arith.constant 0 : i32
    return %arg0, %c0_i32, %c0_i32_0 : i32, i32, i32
  }
  func.func @transform_9(%arg0: i32) -> (i32, i32, i32) {
    %c0_i32 = arith.constant 0 : i32
    %c0_i32_0 = arith.constant 0 : i32
    %c0_i32_1 = arith.constant 0 : i32
    return %arg0, %c0_i32, %c0_i32_0 : i32, i32, i32
  }
  func.func @transform_10(%arg0: i32) -> (i32, i32, i32) {
    %c0_i32 = arith.constant 0 : i32
    %c0_i32_0 = arith.constant 0 : i32
    %c0_i32_1 = arith.constant 0 : i32
    return %arg0, %c0_i32, %c0_i32_0 : i32, i32, i32
  }
  func.func @transform_11(%arg0: i32) -> (i32, i32, i32) {
    %c0_i32 = arith.constant 0 : i32
    %c0_i32_0 = arith.constant 0 : i32
    %c0_i32_1 = arith.constant 0 : i32
    return %arg0, %c0_i32, %c0_i32_0 : i32, i32, i32
  }
  func.func @transform_12(%arg0: i32) -> (i32, i32, i32) {
    %c0_i32 = arith.constant 0 : i32
    %c0_i32_0 = arith.constant 0 : i32
    %c0_i32_1 = arith.constant 0 : i32
    return %arg0, %c0_i32, %c0_i32_0 : i32, i32, i32
  }
  func.func @transform_13(%arg0: i32) -> (i32, i32, i32) {
    %c0_i32 = arith.constant 0 : i32
    %c0_i32_0 = arith.constant 0 : i32
    %c0_i32_1 = arith.constant 0 : i32
    return %arg0, %c0_i32, %c0_i32_0 : i32, i32, i32
  }
  func.func @transform_14(%arg0: i32) -> (i32, i32, i32) {
    %c0_i32 = arith.constant 0 : i32
    %c0_i32_0 = arith.constant 0 : i32
    %c0_i32_1 = arith.constant 0 : i32
    return %arg0, %c0_i32, %c0_i32_0 : i32, i32, i32
  }
  func.func @transform_15(%arg0: i32) -> (i32, i32, i32) {
    %c0_i32 = arith.constant 0 : i32
    %c0_i32_0 = arith.constant 0 : i32
    %c0_i32_1 = arith.constant 0 : i32
    return %arg0, %c0_i32, %c0_i32_0 : i32, i32, i32
  }
  func.func @transform_16(%arg0: i32) -> (i32, i32, i32) {
    %c0_i32 = arith.constant 0 : i32
    %c0_i32_0 = arith.constant 0 : i32
    %c0_i32_1 = arith.constant 0 : i32
    return %arg0, %c0_i32, %c0_i32_0 : i32, i32, i32
  }
  func.func @transform_17(%arg0: i32) -> (i32, i32, i32) {
    %c0_i32 = arith.constant 0 : i32
    %c0_i32_0 = arith.constant 0 : i32
    %c0_i32_1 = arith.constant 0 : i32
    return %arg0, %c0_i32, %c0_i32_0 : i32, i32, i32
  }
  func.func @transform_18(%arg0: i32) -> (i32, i32, i32) {
    %c0_i32 = arith.constant 0 : i32
    %c0_i32_0 = arith.constant 0 : i32
    %c0_i32_1 = arith.constant 0 : i32
    return %arg0, %c0_i32, %c0_i32_0 : i32, i32, i32
  }
  func.func @transform_19(%arg0: i32) -> (i32, i32) {
    %c0_i32 = arith.constant 0 : i32
    %c0_i32_0 = arith.constant 0 : i32
    %c0_i32_1 = arith.constant 0 : i32
    return %c0_i32, %c0_i32_0 : i32, i32
  }
  func.func @transform_20(%arg0: i32) -> (i32, i32) {
    %c0_i32 = arith.constant 0 : i32
    %c0_i32_0 = arith.constant 0 : i32
    %c0_i32_1 = arith.constant 0 : i32
    return %c0_i32, %c0_i32_0 : i32, i32
  }
}

module attributes {stable_mosaic.version = 11 : i64} {
  func.func @_lmhead_ce_kernel(%arg0: memref<14x32xbf16, #tpu.memory_space<vmem>>, %arg1: memref<32x128xbf16, #tpu.memory_space<vmem>>, %arg2: memref<1x128xf32, #tpu.memory_space<vmem>>, %arg3: memref<14x1xi32, #tpu.memory_space<vmem>>, %arg4: memref<14x128xf32, #tpu.memory_space<vmem>>, %arg5: memref<1x1xf32, #tpu.memory_space<vmem>>) attributes {dimension_semantics = [], scalar_prefetch = 0 : i64, scratch_operands = 0 : i64, tpu.core_type = #tpu.core_type<tc>} {
    %c0 = arith.constant 0 : index
    %c0_0 = arith.constant 0 : index
    %0 = vector.load %arg0[%c0, %c0_0] : memref<14x32xbf16, #tpu.memory_space<vmem>>, vector<14x32xbf16>
    %c0_1 = arith.constant 0 : index
    %c0_2 = arith.constant 0 : index
    %1 = vector.load %arg1[%c0_1, %c0_2] : memref<32x128xbf16, #tpu.memory_space<vmem>>, vector<32x128xbf16>
    %cst = arith.constant dense<0.000000e+00> : vector<14x128xf32>
    %2 = tpu.matmul %0, %1, %cst {dimension_numbers = #tpu.dot_dimension_numbers<[1], [0], [0], [1], [0, 0, 1, 1], [], []>} : vector<14x32xbf16>, vector<32x128xbf16>, vector<14x128xf32> -> vector<14x128xf32>
    %c0_3 = arith.constant 0 : index
    %c0_4 = arith.constant 0 : index
    %3 = vector.load %arg2[%c0_3, %c0_4] : memref<1x128xf32, #tpu.memory_space<vmem>>, vector<1x128xf32>
    %4 = vector.broadcast %3 : vector<1x128xf32> to vector<14x128xf32>
    %5 = arith.addf %2, %4 : vector<14x128xf32>
    %c0_5 = arith.constant 0 : index
    %c0_6 = arith.constant 0 : index
    %6 = vector.load %arg4[%c0_5, %c0_6] : memref<14x128xf32, #tpu.memory_space<vmem>>, vector<14x128xf32>
    tpu.vector_store %arg4[%c0_5, %c0_6], %5 {strides = array<i32>} : memref<14x128xf32, #tpu.memory_space<vmem>>, vector<14x128xf32>,
    %c0_7 = arith.constant 0 : index
    %c0_8 = arith.constant 0 : index
    %7 = vector.load %arg3[%c0_7, %c0_8] : memref<14x1xi32, #tpu.memory_space<vmem>>, vector<14x1xi32>
    %8 = tpu.iota {dimensions = array<i32: 1>} : vector<14x128xi32>
    %cst_9 = arith.constant dense<0xFF800000> : vector<14xf32>
    %9 = vector.multi_reduction <maximumf>, %5, %cst_9 [1] : vector<14x128xf32> to vector<14xf32>
    %10 = vector.shape_cast %9 : vector<14xf32> to vector<14x1xf32>
    %11 = vector.broadcast %10 : vector<14x1xf32> to vector<14x128xf32>
    %12 = arith.subf %5, %11 : vector<14x128xf32>
    %13 = math.exp %12 : vector<14x128xf32>
    %cst_10 = arith.constant dense<0.000000e+00> : vector<14xf32>
    %14 = vector.multi_reduction <add>, %13, %cst_10 [1] : vector<14x128xf32> to vector<14xf32>
    %15 = vector.shape_cast %14 : vector<14xf32> to vector<14x1xf32>
    %16 = math.log %15 : vector<14x1xf32>
    %17 = arith.addf %16, %10 : vector<14x1xf32>
    %18 = vector.broadcast %7 : vector<14x1xi32> to vector<14x128xi32>
    %19 = arith.cmpi eq, %8, %18 : vector<14x128xi32>
    %cst_11 = arith.constant 0.000000e+00 : f32
    %20 = vector.broadcast %cst_11 : f32 to vector<14x128xf32>
    %21 = arith.select %19, %5, %20 : vector<14x128xi1>, vector<14x128xf32>
    %cst_12 = arith.constant dense<0.000000e+00> : vector<14xf32>
    %22 = vector.multi_reduction <add>, %21, %cst_12 [1] : vector<14x128xf32> to vector<14xf32>
    %23 = vector.shape_cast %22 : vector<14xf32> to vector<14x1xf32>
    %24 = arith.subf %17, %23 : vector<14x1xf32>
    %c0_i32 = arith.constant 0 : i32
    %25 = vector.broadcast %c0_i32 : i32 to vector<14x1xi32>
    %26 = arith.cmpi ne, %7, %25 : vector<14x1xi32>
    %27 = arith.extui %26 : vector<14x1xi1> to vector<14x1xi32>
    %28 = arith.sitofp %27 : vector<14x1xi32> to vector<14x1xf32>
    %29 = arith.mulf %24, %28 : vector<14x1xf32>
    %cst_13 = arith.constant dense<0.000000e+00> : vector<1xf32>
    %30 = vector.multi_reduction <add>, %29, %cst_13 [0] : vector<14x1xf32> to vector<1xf32>
    %31 = vector.shape_cast %30 : vector<1xf32> to vector<1x1xf32>
    %cst_14 = arith.constant dense<0.000000e+00> : vector<1xf32>
    %32 = vector.multi_reduction <add>, %28, %cst_14 [0] : vector<14x1xf32> to vector<1xf32>
    %33 = vector.shape_cast %32 : vector<1xf32> to vector<1x1xf32>
    %34 = arith.divf %31, %33 : vector<1x1xf32>
    %c0_15 = arith.constant 0 : index
    %c0_16 = arith.constant 0 : index
    %35 = vector.load %arg5[%c0_15, %c0_16] : memref<1x1xf32, #tpu.memory_space<vmem>>, vector<1x1xf32>
    tpu.vector_store %arg5[%c0_15, %c0_16], %34 {strides = array<i32>} : memref<1x1xf32, #tpu.memory_space<vmem>>, vector<1x1xf32>,
    return
  }
}

module attributes {stable_mosaic.version = 11 : i64} {
  func.func @_decoder_stack_kernel(%arg0: i32, %arg1: memref<16x32xf32, #tpu.memory_space<vmem>>, %arg2: memref<16x32xbf16, #tpu.memory_space<vmem>>, %arg3: memref<16x32xbf16, #tpu.memory_space<vmem>>, %arg4: memref<1x32x32xbf16, #tpu.memory_space<vmem>>, %arg5: memref<1x1x32xf32, #tpu.memory_space<vmem>>, %arg6: memref<1x32x32xbf16, #tpu.memory_space<vmem>>, %arg7: memref<1x1x32xf32, #tpu.memory_space<vmem>>, %arg8: memref<1x32x32xbf16, #tpu.memory_space<vmem>>, %arg9: memref<1x1x32xf32, #tpu.memory_space<vmem>>, %arg10: memref<1x32x32xbf16, #tpu.memory_space<vmem>>, %arg11: memref<1x1x32xf32, #tpu.memory_space<vmem>>, %arg12: memref<1x1x32xf32, #tpu.memory_space<vmem>>, %arg13: memref<1x1x32xf32, #tpu.memory_space<vmem>>, %arg14: memref<1x32x32xbf16, #tpu.memory_space<vmem>>, %arg15: memref<1x1x32xf32, #tpu.memory_space<vmem>>, %arg16: memref<1x32x32xbf16, #tpu.memory_space<vmem>>, %arg17: memref<1x1x32xf32, #tpu.memory_space<vmem>>, %arg18: memref<1x32x32xbf16, #tpu.memory_space<vmem>>, %arg19: memref<1x1x32xf32, #tpu.memory_space<vmem>>, %arg20: memref<1x32x32xbf16, #tpu.memory_space<vmem>>, %arg21: memref<1x1x32xf32, #tpu.memory_space<vmem>>, %arg22: memref<1x1x32xf32, #tpu.memory_space<vmem>>, %arg23: memref<1x1x32xf32, #tpu.memory_space<vmem>>, %arg24: memref<1x32x128xbf16, #tpu.memory_space<vmem>>, %arg25: memref<1x1x128xf32, #tpu.memory_space<vmem>>, %arg26: memref<1x128x32xbf16, #tpu.memory_space<vmem>>, %arg27: memref<1x1x32xf32, #tpu.memory_space<vmem>>, %arg28: memref<1x1x32xf32, #tpu.memory_space<vmem>>, %arg29: memref<1x1x32xf32, #tpu.memory_space<vmem>>, %arg30: memref<1x1x32xf32, #tpu.memory_space<vmem>>, %arg31: memref<1x1x32xf32, #tpu.memory_space<vmem>>, %arg32: memref<16x32xbf16, #tpu.memory_space<vmem>>, %arg33: memref<16x32xf32, #tpu.memory_space<vmem>>) attributes {dimension_semantics = [#tpu.dimension_semantics<arbitrary>], iteration_bounds = array<i64: 2>, scalar_prefetch = 0 : i64, scratch_operands = 1 : i64, tpu.core_type = #tpu.core_type<tc>, window_params = [{pipeline_mode = #tpu.pipeline_mode<synchronous>, transform_indices = @transform_0, window_bounds = array<i64: 16, 32>}, {pipeline_mode = #tpu.pipeline_mode<synchronous>, transform_indices = @transform_1, window_bounds = array<i64: 16, 32>}, {pipeline_mode = #tpu.pipeline_mode<synchronous>, transform_indices = @transform_2, window_bounds = array<i64: 16, 32>}, {transform_indices = @transform_3, window_bounds = array<i64: 1, 32, 32>}, {transform_indices = @transform_4, window_bounds = array<i64: 1, 1, 32>}, {transform_indices = @transform_5, window_bounds = array<i64: 1, 32, 32>}, {transform_indices = @transform_6, window_bounds = array<i64: 1, 1, 32>}, {transform_indices = @transform_7, window_bounds = array<i64: 1, 32, 32>}, {transform_indices = @transform_8, window_bounds = array<i64: 1, 1, 32>}, {transform_indices = @transform_9, window_bounds = array<i64: 1, 32, 32>}, {transform_indices = @transform_10, window_bounds = array<i64: 1, 1, 32>}, {transform_indices = @transform_11, window_bounds = array<i64: 1, 1, 32>}, {transform_indices = @transform_12, window_bounds = array<i64: 1, 1, 32>}, {transform_indices = @transform_13, window_bounds = array<i64: 1, 32, 32>}, {transform_indices = @transform_14, window_bounds = array<i64: 1, 1, 32>}, {transform_indices = @transform_15, window_bounds = array<i64: 1, 32, 32>}, {transform_indices = @transform_16, window_bounds = array<i64: 1, 1, 32>}, {transform_indices = @transform_17, window_bounds = array<i64: 1, 32, 32>}, {transform_indices = @transform_18, window_bounds = array<i64: 1, 1, 32>}, {transform_indices = @transform_19, window_bounds = array<i64: 1, 32, 32>}, {transform_indices = @transform_20, window_bounds = array<i64: 1, 1, 32>}, {transform_indices = @transform_21, window_bounds = array<i64: 1, 1, 32>}, {transform_indices = @transform_22, window_bounds = array<i64: 1, 1, 32>}, {transform_indices = @transform_23, window_bounds = array<i64: 1, 32, 128>}, {transform_indices = @transform_24, window_bounds = array<i64: 1, 1, 128>}, {transform_indices = @transform_25, window_bounds = array<i64: 1, 128, 32>}, {transform_indices = @transform_26, window_bounds = array<i64: 1, 1, 32>}, {transform_indices = @transform_27, window_bounds = array<i64: 1, 1, 32>}, {transform_indices = @transform_28, window_bounds = array<i64: 1, 1, 32>}, {transform_indices = @transform_29, window_bounds = array<i64: 1, 1, 32>}, {transform_indices = @transform_30, window_bounds = array<i64: 1, 1, 32>}, {pipeline_mode = #tpu.pipeline_mode<synchronous>, transform_indices = @transform_31, window_bounds = array<i64: 16, 32>}]} {
    %c0_i32 = arith.constant 0 : i32
    %0 = arith.cmpi eq, %arg0, %c0_i32 : i32
    %1 = arith.extui %0 : i1 to i32
    %c0_i32_0 = arith.constant 0 : i32
    %2 = arith.cmpi ne, %1, %c0_i32_0 : i32
    scf.if %2 {
      %c0_162 = arith.constant 0 : index
      %c0_163 = arith.constant 0 : index
      %364 = vector.load %arg1[%c0_162, %c0_163] : memref<16x32xf32, #tpu.memory_space<vmem>>, vector<16x32xf32>
      %c0_164 = arith.constant 0 : index
      %c0_165 = arith.constant 0 : index
      %365 = vector.load %arg33[%c0_164, %c0_165] : memref<16x32xf32, #tpu.memory_space<vmem>>, vector<16x32xf32>
      tpu.vector_store %arg33[%c0_164, %c0_165], %364 {strides = array<i32>} : memref<16x32xf32, #tpu.memory_space<vmem>>, vector<16x32xf32>,
    } else {
    }
    %c0 = arith.constant 0 : index
    %c0_1 = arith.constant 0 : index
    %3 = vector.load %arg33[%c0, %c0_1] : memref<16x32xf32, #tpu.memory_space<vmem>>, vector<16x32xf32>
    %c0_2 = arith.constant 0 : index
    %c0_3 = arith.constant 0 : index
    %c0_4 = arith.constant 0 : index
    %4 = vector.load %arg4[%c0_2, %c0_3, %c0_4] : memref<1x32x32xbf16, #tpu.memory_space<vmem>>, vector<1x32x32xbf16>
    %5 = vector.shape_cast %4 : vector<1x32x32xbf16> to vector<32x32xbf16>
    %c0_5 = arith.constant 0 : index
    %c0_6 = arith.constant 0 : index
    %c0_7 = arith.constant 0 : index
    %6 = vector.load %arg5[%c0_5, %c0_6, %c0_7] : memref<1x1x32xf32, #tpu.memory_space<vmem>>, vector<1x1x32xf32>
    %7 = vector.shape_cast %6 : vector<1x1x32xf32> to vector<1x32xf32>
    %c0_8 = arith.constant 0 : index
    %c0_9 = arith.constant 0 : index
    %c0_10 = arith.constant 0 : index
    %8 = vector.load %arg6[%c0_8, %c0_9, %c0_10] : memref<1x32x32xbf16, #tpu.memory_space<vmem>>, vector<1x32x32xbf16>
    %9 = vector.shape_cast %8 : vector<1x32x32xbf16> to vector<32x32xbf16>
    %c0_11 = arith.constant 0 : index
    %c0_12 = arith.constant 0 : index
    %c0_13 = arith.constant 0 : index
    %10 = vector.load %arg7[%c0_11, %c0_12, %c0_13] : memref<1x1x32xf32, #tpu.memory_space<vmem>>, vector<1x1x32xf32>
    %11 = vector.shape_cast %10 : vector<1x1x32xf32> to vector<1x32xf32>
    %c0_14 = arith.constant 0 : index
    %c0_15 = arith.constant 0 : index
    %c0_16 = arith.constant 0 : index
    %12 = vector.load %arg8[%c0_14, %c0_15, %c0_16] : memref<1x32x32xbf16, #tpu.memory_space<vmem>>, vector<1x32x32xbf16>
    %13 = vector.shape_cast %12 : vector<1x32x32xbf16> to vector<32x32xbf16>
    %c0_17 = arith.constant 0 : index
    %c0_18 = arith.constant 0 : index
    %c0_19 = arith.constant 0 : index
    %14 = vector.load %arg9[%c0_17, %c0_18, %c0_19] : memref<1x1x32xf32, #tpu.memory_space<vmem>>, vector<1x1x32xf32>
    %15 = vector.shape_cast %14 : vector<1x1x32xf32> to vector<1x32xf32>
    %c0_20 = arith.constant 0 : index
    %c0_21 = arith.constant 0 : index
    %c0_22 = arith.constant 0 : index
    %16 = vector.load %arg10[%c0_20, %c0_21, %c0_22] : memref<1x32x32xbf16, #tpu.memory_space<vmem>>, vector<1x32x32xbf16>
    %17 = vector.shape_cast %16 : vector<1x32x32xbf16> to vector<32x32xbf16>
    %c0_23 = arith.constant 0 : index
    %c0_24 = arith.constant 0 : index
    %c0_25 = arith.constant 0 : index
    %18 = vector.load %arg11[%c0_23, %c0_24, %c0_25] : memref<1x1x32xf32, #tpu.memory_space<vmem>>, vector<1x1x32xf32>
    %19 = vector.shape_cast %18 : vector<1x1x32xf32> to vector<1x32xf32>
    %20 = arith.truncf %3 : vector<16x32xf32> to vector<16x32xbf16>
    %21 = arith.truncf %3 : vector<16x32xf32> to vector<16x32xbf16>
    %22 = arith.truncf %3 : vector<16x32xf32> to vector<16x32xbf16>
    %cst = arith.constant dense<0.000000e+00> : vector<16x32xf32>
    %23 = tpu.matmul %20, %5, %cst {dimension_numbers = #tpu.dot_dimension_numbers<[1], [0], [0], [1], [0, 0, 1, 1], [], []>} : vector<16x32xbf16>, vector<32x32xbf16>, vector<16x32xf32> -> vector<16x32xf32>
    %24 = vector.broadcast %7 : vector<1x32xf32> to vector<16x32xf32>
    %25 = arith.addf %23, %24 : vector<16x32xf32>
    %cst_26 = arith.constant 0.353553385 : f32
    %26 = vector.broadcast %cst_26 : f32 to vector<16x32xf32>
    %27 = arith.mulf %25, %26 : vector<16x32xf32>
    %cst_27 = arith.constant dense<0.000000e+00> : vector<16x32xf32>
    %28 = tpu.matmul %21, %9, %cst_27 {dimension_numbers = #tpu.dot_dimension_numbers<[1], [0], [0], [1], [0, 0, 1, 1], [], []>} : vector<16x32xbf16>, vector<32x32xbf16>, vector<16x32xf32> -> vector<16x32xf32>
    %29 = vector.broadcast %11 : vector<1x32xf32> to vector<16x32xf32>
    %30 = arith.addf %28, %29 : vector<16x32xf32>
    %cst_28 = arith.constant dense<0.000000e+00> : vector<16x32xf32>
    %31 = tpu.matmul %22, %13, %cst_28 {dimension_numbers = #tpu.dot_dimension_numbers<[1], [0], [0], [1], [0, 0, 1, 1], [], []>} : vector<16x32xbf16>, vector<32x32xbf16>, vector<16x32xf32> -> vector<16x32xf32>
    %32 = vector.broadcast %15 : vector<1x32xf32> to vector<16x32xf32>
    %33 = arith.addf %31, %32 : vector<16x32xf32>
    %34 = arith.truncf %27 : vector<16x32xf32> to vector<16x32xbf16>
    %35 = vector.shape_cast %34 : vector<16x32xbf16> to vector<2x8x32xbf16>
    %36 = arith.truncf %30 : vector<16x32xf32> to vector<16x32xbf16>
    %37 = vector.shape_cast %36 : vector<16x32xbf16> to vector<2x8x32xbf16>
    %38 = arith.truncf %33 : vector<16x32xf32> to vector<16x32xbf16>
    %39 = vector.shape_cast %38 : vector<16x32xbf16> to vector<2x8x32xbf16>
    %40 = vector.shape_cast %3 : vector<16x32xf32> to vector<2x8x32xf32>
    %41 = vector.extract_strided_slice %40 {offsets = [0, 0, 0], sizes = [2, 8, 1], strides = [1, 1, 1]} : vector<2x8x32xf32> to vector<2x8x1xf32>
    %42 = vector.shape_cast %41 : vector<2x8x1xf32> to vector<2x8xf32>
    %cst_29 = arith.constant 0.000000e+00 : f32
    %43 = vector.broadcast %cst_29 : f32 to vector<2x8xf32>
    %44 = arith.cmpf one, %42, %43 : vector<2x8xf32>
    %45 = vector.shape_cast %44 : vector<2x8xi1> to vector<2x8x1xi1>
    %46 = vector.shape_cast %44 : vector<2x8xi1> to vector<2x1x8xi1>
    %47 = vector.broadcast %45 : vector<2x8x1xi1> to vector<2x8x8xi1>
    %48 = vector.broadcast %46 : vector<2x1x8xi1> to vector<2x8x8xi1>
    %49 = arith.andi %47, %48 : vector<2x8x8xi1>
    %cst_30 = arith.constant 0.000000e+00 : f32
    %cst_31 = arith.constant -1.000000e+30 : f32
    %50 = vector.broadcast %cst_30 : f32 to vector<2x8x8xf32>
    %51 = vector.broadcast %cst_31 : f32 to vector<2x8x8xf32>
    %52 = arith.select %49, %50, %51 : vector<2x8x8xi1>, vector<2x8x8xf32>
    %53 = tpu.iota {dimensions = array<i32: 0>} : vector<8x8xi32>
    %54 = tpu.iota {dimensions = array<i32: 1>} : vector<8x8xi32>
    %55 = arith.cmpi sle, %54, %53 : vector<8x8xi32>
    %cst_32 = arith.constant 0.000000e+00 : f32
    %cst_33 = arith.constant -1.000000e+30 : f32
    %56 = vector.broadcast %cst_32 : f32 to vector<8x8xf32>
    %57 = vector.broadcast %cst_33 : f32 to vector<8x8xf32>
    %58 = arith.select %55, %56, %57 : vector<8x8xi1>, vector<8x8xf32>
    %59 = vector.shape_cast %58 : vector<8x8xf32> to vector<1x8x8xf32>
    %60 = vector.broadcast %59 : vector<1x8x8xf32> to vector<2x8x8xf32>
    %61 = arith.addf %52, %60 : vector<2x8x8xf32>
    %62 = vector.extract_strided_slice %35 {offsets = [0, 0, 0], sizes = [2, 8, 8], strides = [1, 1, 1]} : vector<2x8x32xbf16> to vector<2x8x8xbf16>
    %63 = vector.extract_strided_slice %37 {offsets = [0, 0, 0], sizes = [2, 8, 8], strides = [1, 1, 1]} : vector<2x8x32xbf16> to vector<2x8x8xbf16>
    "tpu.trace_start"() <{level = 10 : i32, message = "bqd,bkd->bqk"}> : () -> ()
    %cst_34 = arith.constant dense<0.000000e+00> : vector<2x8x8xf32>
    %64 = tpu.matmul %62, %63, %cst_34 {dimension_numbers = #tpu.dot_dimension_numbers<[2], [2], [1], [1], [0, 0, 0, 1, 1, 1], [0], [0]>} : vector<2x8x8xbf16>, vector<2x8x8xbf16>, vector<2x8x8xf32> -> vector<2x8x8xf32>
    "tpu.trace_stop"() : () -> ()
    %65 = arith.addf %64, %61 : vector<2x8x8xf32>
    %cst_35 = arith.constant dense<0xFF800000> : vector<2x8xf32>
    %66 = vector.multi_reduction <maximumf>, %65, %cst_35 [2] : vector<2x8x8xf32> to vector<2x8xf32>
    %67 = vector.shape_cast %66 : vector<2x8xf32> to vector<2x8x1xf32>
    %68 = vector.broadcast %67 : vector<2x8x1xf32> to vector<2x8x8xf32>
    %69 = arith.subf %65, %68 : vector<2x8x8xf32>
    %70 = math.exp %69 : vector<2x8x8xf32>
    %cst_36 = arith.constant dense<0.000000e+00> : vector<2x8xf32>
    %71 = vector.multi_reduction <add>, %70, %cst_36 [2] : vector<2x8x8xf32> to vector<2x8xf32>
    %72 = vector.shape_cast %71 : vector<2x8xf32> to vector<2x8x1xf32>
    %73 = tpu.reciprocal %72 {approx = true} : vector<2x8x1xf32> -> vector<2x8x1xf32>
    %74 = vector.broadcast %73 : vector<2x8x1xf32> to vector<2x8x8xf32>
    %75 = arith.mulf %70, %74 : vector<2x8x8xf32>
    %76 = arith.truncf %75 : vector<2x8x8xf32> to vector<2x8x8xbf16>
    %77 = vector.extract_strided_slice %39 {offsets = [0, 0, 0], sizes = [2, 8, 8], strides = [1, 1, 1]} : vector<2x8x32xbf16> to vector<2x8x8xbf16>
    "tpu.trace_start"() <{level = 10 : i32, message = "bqk,bkd->bqd"}> : () -> ()
    %cst_37 = arith.constant dense<0.000000e+00> : vector<2x8x8xf32>
    %78 = tpu.matmul %76, %77, %cst_37 {dimension_numbers = #tpu.dot_dimension_numbers<[2], [1], [1], [2], [0, 0, 0, 1, 1, 2], [0], [0]>} : vector<2x8x8xbf16>, vector<2x8x8xbf16>, vector<2x8x8xf32> -> vector<2x8x8xf32>
    "tpu.trace_stop"() : () -> ()
    %79 = vector.extract_strided_slice %35 {offsets = [0, 0, 8], sizes = [2, 8, 8], strides = [1, 1, 1]} : vector<2x8x32xbf16> to vector<2x8x8xbf16>
    %80 = vector.extract_strided_slice %37 {offsets = [0, 0, 8], sizes = [2, 8, 8], strides = [1, 1, 1]} : vector<2x8x32xbf16> to vector<2x8x8xbf16>
    "tpu.trace_start"() <{level = 10 : i32, message = "bqd,bkd->bqk"}> : () -> ()
    %cst_38 = arith.constant dense<0.000000e+00> : vector<2x8x8xf32>
    %81 = tpu.matmul %79, %80, %cst_38 {dimension_numbers = #tpu.dot_dimension_numbers<[2], [2], [1], [1], [0, 0, 0, 1, 1, 1], [0], [0]>} : vector<2x8x8xbf16>, vector<2x8x8xbf16>, vector<2x8x8xf32> -> vector<2x8x8xf32>
    "tpu.trace_stop"() : () -> ()
    %82 = arith.addf %81, %61 : vector<2x8x8xf32>
    %cst_39 = arith.constant dense<0xFF800000> : vector<2x8xf32>
    %83 = vector.multi_reduction <maximumf>, %82, %cst_39 [2] : vector<2x8x8xf32> to vector<2x8xf32>
    %84 = vector.shape_cast %83 : vector<2x8xf32> to vector<2x8x1xf32>
    %85 = vector.broadcast %84 : vector<2x8x1xf32> to vector<2x8x8xf32>
    %86 = arith.subf %82, %85 : vector<2x8x8xf32>
    %87 = math.exp %86 : vector<2x8x8xf32>
    %cst_40 = arith.constant dense<0.000000e+00> : vector<2x8xf32>
    %88 = vector.multi_reduction <add>, %87, %cst_40 [2] : vector<2x8x8xf32> to vector<2x8xf32>
    %89 = vector.shape_cast %88 : vector<2x8xf32> to vector<2x8x1xf32>
    %90 = tpu.reciprocal %89 {approx = true} : vector<2x8x1xf32> -> vector<2x8x1xf32>
    %91 = vector.broadcast %90 : vector<2x8x1xf32> to vector<2x8x8xf32>
    %92 = arith.mulf %87, %91 : vector<2x8x8xf32>
    %93 = arith.truncf %92 : vector<2x8x8xf32> to vector<2x8x8xbf16>
    %94 = vector.extract_strided_slice %39 {offsets = [0, 0, 8], sizes = [2, 8, 8], strides = [1, 1, 1]} : vector<2x8x32xbf16> to vector<2x8x8xbf16>
    "tpu.trace_start"() <{level = 10 : i32, message = "bqk,bkd->bqd"}> : () -> ()
    %cst_41 = arith.constant dense<0.000000e+00> : vector<2x8x8xf32>
    %95 = tpu.matmul %93, %94, %cst_41 {dimension_numbers = #tpu.dot_dimension_numbers<[2], [1], [1], [2], [0, 0, 0, 1, 1, 2], [0], [0]>} : vector<2x8x8xbf16>, vector<2x8x8xbf16>, vector<2x8x8xf32> -> vector<2x8x8xf32>
    "tpu.trace_stop"() : () -> ()
    %96 = vector.extract_strided_slice %35 {offsets = [0, 0, 16], sizes = [2, 8, 8], strides = [1, 1, 1]} : vector<2x8x32xbf16> to vector<2x8x8xbf16>
    %97 = vector.extract_strided_slice %37 {offsets = [0, 0, 16], sizes = [2, 8, 8], strides = [1, 1, 1]} : vector<2x8x32xbf16> to vector<2x8x8xbf16>
    "tpu.trace_start"() <{level = 10 : i32, message = "bqd,bkd->bqk"}> : () -> ()
    %cst_42 = arith.constant dense<0.000000e+00> : vector<2x8x8xf32>
    %98 = tpu.matmul %96, %97, %cst_42 {dimension_numbers = #tpu.dot_dimension_numbers<[2], [2], [1], [1], [0, 0, 0, 1, 1, 1], [0], [0]>} : vector<2x8x8xbf16>, vector<2x8x8xbf16>, vector<2x8x8xf32> -> vector<2x8x8xf32>
    "tpu.trace_stop"() : () -> ()
    %99 = arith.addf %98, %61 : vector<2x8x8xf32>
    %cst_43 = arith.constant dense<0xFF800000> : vector<2x8xf32>
    %100 = vector.multi_reduction <maximumf>, %99, %cst_43 [2] : vector<2x8x8xf32> to vector<2x8xf32>
    %101 = vector.shape_cast %100 : vector<2x8xf32> to vector<2x8x1xf32>
    %102 = vector.broadcast %101 : vector<2x8x1xf32> to vector<2x8x8xf32>
    %103 = arith.subf %99, %102 : vector<2x8x8xf32>
    %104 = math.exp %103 : vector<2x8x8xf32>
    %cst_44 = arith.constant dense<0.000000e+00> : vector<2x8xf32>
    %105 = vector.multi_reduction <add>, %104, %cst_44 [2] : vector<2x8x8xf32> to vector<2x8xf32>
    %106 = vector.shape_cast %105 : vector<2x8xf32> to vector<2x8x1xf32>
    %107 = tpu.reciprocal %106 {approx = true} : vector<2x8x1xf32> -> vector<2x8x1xf32>
    %108 = vector.broadcast %107 : vector<2x8x1xf32> to vector<2x8x8xf32>
    %109 = arith.mulf %104, %108 : vector<2x8x8xf32>
    %110 = arith.truncf %109 : vector<2x8x8xf32> to vector<2x8x8xbf16>
    %111 = vector.extract_strided_slice %39 {offsets = [0, 0, 16], sizes = [2, 8, 8], strides = [1, 1, 1]} : vector<2x8x32xbf16> to vector<2x8x8xbf16>
    "tpu.trace_start"() <{level = 10 : i32, message = "bqk,bkd->bqd"}> : () -> ()
    %cst_45 = arith.constant dense<0.000000e+00> : vector<2x8x8xf32>
    %112 = tpu.matmul %110, %111, %cst_45 {dimension_numbers = #tpu.dot_dimension_numbers<[2], [1], [1], [2], [0, 0, 0, 1, 1, 2], [0], [0]>} : vector<2x8x8xbf16>, vector<2x8x8xbf16>, vector<2x8x8xf32> -> vector<2x8x8xf32>
    "tpu.trace_stop"() : () -> ()
    %113 = vector.extract_strided_slice %35 {offsets = [0, 0, 24], sizes = [2, 8, 8], strides = [1, 1, 1]} : vector<2x8x32xbf16> to vector<2x8x8xbf16>
    %114 = vector.extract_strided_slice %37 {offsets = [0, 0, 24], sizes = [2, 8, 8], strides = [1, 1, 1]} : vector<2x8x32xbf16> to vector<2x8x8xbf16>
    "tpu.trace_start"() <{level = 10 : i32, message = "bqd,bkd->bqk"}> : () -> ()
    %cst_46 = arith.constant dense<0.000000e+00> : vector<2x8x8xf32>
    %115 = tpu.matmul %113, %114, %cst_46 {dimension_numbers = #tpu.dot_dimension_numbers<[2], [2], [1], [1], [0, 0, 0, 1, 1, 1], [0], [0]>} : vector<2x8x8xbf16>, vector<2x8x8xbf16>, vector<2x8x8xf32> -> vector<2x8x8xf32>
    "tpu.trace_stop"() : () -> ()
    %116 = arith.addf %115, %61 : vector<2x8x8xf32>
    %cst_47 = arith.constant dense<0xFF800000> : vector<2x8xf32>
    %117 = vector.multi_reduction <maximumf>, %116, %cst_47 [2] : vector<2x8x8xf32> to vector<2x8xf32>
    %118 = vector.shape_cast %117 : vector<2x8xf32> to vector<2x8x1xf32>
    %119 = vector.broadcast %118 : vector<2x8x1xf32> to vector<2x8x8xf32>
    %120 = arith.subf %116, %119 : vector<2x8x8xf32>
    %121 = math.exp %120 : vector<2x8x8xf32>
    %cst_48 = arith.constant dense<0.000000e+00> : vector<2x8xf32>
    %122 = vector.multi_reduction <add>, %121, %cst_48 [2] : vector<2x8x8xf32> to vector<2x8xf32>
    %123 = vector.shape_cast %122 : vector<2x8xf32> to vector<2x8x1xf32>
    %124 = tpu.reciprocal %123 {approx = true} : vector<2x8x1xf32> -> vector<2x8x1xf32>
    %125 = vector.broadcast %124 : vector<2x8x1xf32> to vector<2x8x8xf32>
    %126 = arith.mulf %121, %125 : vector<2x8x8xf32>
    %127 = arith.truncf %126 : vector<2x8x8xf32> to vector<2x8x8xbf16>
    %128 = vector.extract_strided_slice %39 {offsets = [0, 0, 24], sizes = [2, 8, 8], strides = [1, 1, 1]} : vector<2x8x32xbf16> to vector<2x8x8xbf16>
    "tpu.trace_start"() <{level = 10 : i32, message = "bqk,bkd->bqd"}> : () -> ()
    %cst_49 = arith.constant dense<0.000000e+00> : vector<2x8x8xf32>
    %129 = tpu.matmul %127, %128, %cst_49 {dimension_numbers = #tpu.dot_dimension_numbers<[2], [1], [1], [2], [0, 0, 0, 1, 1, 2], [0], [0]>} : vector<2x8x8xbf16>, vector<2x8x8xbf16>, vector<2x8x8xf32> -> vector<2x8x8xf32>
    "tpu.trace_stop"() : () -> ()
    %130 = tpu.concatenate %78, %95, %112, %129 in 2 : vector<2x8x8xf32>, vector<2x8x8xf32>, vector<2x8x8xf32>, vector<2x8x8xf32> -> vector<2x8x32xf32>
    %131 = arith.truncf %130 : vector<2x8x32xf32> to vector<2x8x32xbf16>
    %132 = vector.shape_cast %131 : vector<2x8x32xbf16> to vector<16x32xbf16>
    %cst_50 = arith.constant dense<0.000000e+00> : vector<16x32xf32>
    %133 = tpu.matmul %132, %17, %cst_50 {dimension_numbers = #tpu.dot_dimension_numbers<[1], [0], [0], [1], [0, 0, 1, 1], [], []>} : vector<16x32xbf16>, vector<32x32xbf16>, vector<16x32xf32> -> vector<16x32xf32>
    %134 = vector.broadcast %19 : vector<1x32xf32> to vector<16x32xf32>
    %135 = arith.addf %133, %134 : vector<16x32xf32>
    %136 = arith.addf %3, %135 : vector<16x32xf32>
    %c0_51 = arith.constant 0 : index
    %c0_52 = arith.constant 0 : index
    %c0_53 = arith.constant 0 : index
    %137 = vector.load %arg12[%c0_51, %c0_52, %c0_53] : memref<1x1x32xf32, #tpu.memory_space<vmem>>, vector<1x1x32xf32>
    %138 = vector.shape_cast %137 : vector<1x1x32xf32> to vector<1x32xf32>
    %c0_54 = arith.constant 0 : index
    %c0_55 = arith.constant 0 : index
    %c0_56 = arith.constant 0 : index
    %139 = vector.load %arg13[%c0_54, %c0_55, %c0_56] : memref<1x1x32xf32, #tpu.memory_space<vmem>>, vector<1x1x32xf32>
    %140 = vector.shape_cast %139 : vector<1x1x32xf32> to vector<1x32xf32>
    %cst_57 = arith.constant dense<0.000000e+00> : vector<16xf32>
    %141 = vector.multi_reduction <add>, %136, %cst_57 [1] : vector<16x32xf32> to vector<16xf32>
    %142 = vector.shape_cast %141 : vector<16xf32> to vector<16x1xf32>
    %cst_58 = arith.constant 3.200000e+01 : f32
    %143 = vector.broadcast %cst_58 : f32 to vector<16x1xf32>
    %144 = arith.divf %142, %143 : vector<16x1xf32>
    %145 = vector.broadcast %144 : vector<16x1xf32> to vector<16x32xf32>
    %146 = arith.subf %136, %145 : vector<16x32xf32>
    %147 = arith.mulf %146, %146 : vector<16x32xf32>
    %cst_59 = arith.constant dense<0.000000e+00> : vector<16xf32>
    %148 = vector.multi_reduction <add>, %147, %cst_59 [1] : vector<16x32xf32> to vector<16xf32>
    %149 = vector.shape_cast %148 : vector<16xf32> to vector<16x1xf32>
    %cst_60 = arith.constant 3.200000e+01 : f32
    %150 = vector.broadcast %cst_60 : f32 to vector<16x1xf32>
    %151 = arith.divf %149, %150 : vector<16x1xf32>
    %cst_61 = arith.constant 9.99999974E-6 : f32
    %152 = vector.broadcast %cst_61 : f32 to vector<16x1xf32>
    %153 = arith.addf %151, %152 : vector<16x1xf32>
    %154 = math.rsqrt %153 : vector<16x1xf32>
    %155 = vector.broadcast %154 : vector<16x1xf32> to vector<16x32xf32>
    %156 = arith.mulf %146, %155 : vector<16x32xf32>
    %157 = vector.broadcast %138 : vector<1x32xf32> to vector<16x32xf32>
    %158 = arith.mulf %156, %157 : vector<16x32xf32>
    %159 = vector.broadcast %140 : vector<1x32xf32> to vector<16x32xf32>
    %160 = arith.addf %158, %159 : vector<16x32xf32>
    %c0_62 = arith.constant 0 : index
    %c0_63 = arith.constant 0 : index
    %161 = vector.load %arg2[%c0_62, %c0_63] : memref<16x32xbf16, #tpu.memory_space<vmem>>, vector<16x32xbf16>
    %c0_64 = arith.constant 0 : index
    %c0_65 = arith.constant 0 : index
    %162 = vector.load %arg3[%c0_64, %c0_65] : memref<16x32xbf16, #tpu.memory_space<vmem>>, vector<16x32xbf16>
    %c0_66 = arith.constant 0 : index
    %c0_67 = arith.constant 0 : index
    %c0_68 = arith.constant 0 : index
    %163 = vector.load %arg14[%c0_66, %c0_67, %c0_68] : memref<1x32x32xbf16, #tpu.memory_space<vmem>>, vector<1x32x32xbf16>
    %164 = vector.shape_cast %163 : vector<1x32x32xbf16> to vector<32x32xbf16>
    %c0_69 = arith.constant 0 : index
    %c0_70 = arith.constant 0 : index
    %c0_71 = arith.constant 0 : index
    %165 = vector.load %arg15[%c0_69, %c0_70, %c0_71] : memref<1x1x32xf32, #tpu.memory_space<vmem>>, vector<1x1x32xf32>
    %166 = vector.shape_cast %165 : vector<1x1x32xf32> to vector<1x32xf32>
    %c0_72 = arith.constant 0 : index
    %c0_73 = arith.constant 0 : index
    %c0_74 = arith.constant 0 : index
    %167 = vector.load %arg16[%c0_72, %c0_73, %c0_74] : memref<1x32x32xbf16, #tpu.memory_space<vmem>>, vector<1x32x32xbf16>
    %168 = vector.shape_cast %167 : vector<1x32x32xbf16> to vector<32x32xbf16>
    %c0_75 = arith.constant 0 : index
    %c0_76 = arith.constant 0 : index
    %c0_77 = arith.constant 0 : index
    %169 = vector.load %arg17[%c0_75, %c0_76, %c0_77] : memref<1x1x32xf32, #tpu.memory_space<vmem>>, vector<1x1x32xf32>
    %170 = vector.shape_cast %169 : vector<1x1x32xf32> to vector<1x32xf32>
    %c0_78 = arith.constant 0 : index
    %c0_79 = arith.constant 0 : index
    %c0_80 = arith.constant 0 : index
    %171 = vector.load %arg18[%c0_78, %c0_79, %c0_80] : memref<1x32x32xbf16, #tpu.memory_space<vmem>>, vector<1x32x32xbf16>
    %172 = vector.shape_cast %171 : vector<1x32x32xbf16> to vector<32x32xbf16>
    %c0_81 = arith.constant 0 : index
    %c0_82 = arith.constant 0 : index
    %c0_83 = arith.constant 0 : index
    %173 = vector.load %arg19[%c0_81, %c0_82, %c0_83] : memref<1x1x32xf32, #tpu.memory_space<vmem>>, vector<1x1x32xf32>
    %174 = vector.shape_cast %173 : vector<1x1x32xf32> to vector<1x32xf32>
    %c0_84 = arith.constant 0 : index
    %c0_85 = arith.constant 0 : index
    %c0_86 = arith.constant 0 : index
    %175 = vector.load %arg20[%c0_84, %c0_85, %c0_86] : memref<1x32x32xbf16, #tpu.memory_space<vmem>>, vector<1x32x32xbf16>
    %176 = vector.shape_cast %175 : vector<1x32x32xbf16> to vector<32x32xbf16>
    %c0_87 = arith.constant 0 : index
    %c0_88 = arith.constant 0 : index
    %c0_89 = arith.constant 0 : index
    %177 = vector.load %arg21[%c0_87, %c0_88, %c0_89] : memref<1x1x32xf32, #tpu.memory_space<vmem>>, vector<1x1x32xf32>
    %178 = vector.shape_cast %177 : vector<1x1x32xf32> to vector<1x32xf32>
    %179 = arith.truncf %160 : vector<16x32xf32> to vector<16x32xbf16>
    %cst_90 = arith.constant dense<0.000000e+00> : vector<16x32xf32>
    %180 = tpu.matmul %179, %164, %cst_90 {dimension_numbers = #tpu.dot_dimension_numbers<[1], [0], [0], [1], [0, 0, 1, 1], [], []>} : vector<16x32xbf16>, vector<32x32xbf16>, vector<16x32xf32> -> vector<16x32xf32>
    %181 = vector.broadcast %166 : vector<1x32xf32> to vector<16x32xf32>
    %182 = arith.addf %180, %181 : vector<16x32xf32>
    %cst_91 = arith.constant 0.353553385 : f32
    %183 = vector.broadcast %cst_91 : f32 to vector<16x32xf32>
    %184 = arith.mulf %182, %183 : vector<16x32xf32>
    %cst_92 = arith.constant dense<0.000000e+00> : vector<16x32xf32>
    %185 = tpu.matmul %161, %168, %cst_92 {dimension_numbers = #tpu.dot_dimension_numbers<[1], [0], [0], [1], [0, 0, 1, 1], [], []>} : vector<16x32xbf16>, vector<32x32xbf16>, vector<16x32xf32> -> vector<16x32xf32>
    %186 = vector.broadcast %170 : vector<1x32xf32> to vector<16x32xf32>
    %187 = arith.addf %185, %186 : vector<16x32xf32>
    %cst_93 = arith.constant dense<0.000000e+00> : vector<16x32xf32>
    %188 = tpu.matmul %162, %172, %cst_93 {dimension_numbers = #tpu.dot_dimension_numbers<[1], [0], [0], [1], [0, 0, 1, 1], [], []>} : vector<16x32xbf16>, vector<32x32xbf16>, vector<16x32xf32> -> vector<16x32xf32>
    %189 = vector.broadcast %174 : vector<1x32xf32> to vector<16x32xf32>
    %190 = arith.addf %188, %189 : vector<16x32xf32>
    %191 = arith.truncf %184 : vector<16x32xf32> to vector<16x32xbf16>
    %192 = vector.shape_cast %191 : vector<16x32xbf16> to vector<2x8x32xbf16>
    %193 = arith.truncf %187 : vector<16x32xf32> to vector<16x32xbf16>
    %194 = vector.shape_cast %193 : vector<16x32xbf16> to vector<2x8x32xbf16>
    %195 = arith.truncf %190 : vector<16x32xf32> to vector<16x32xbf16>
    %196 = vector.shape_cast %195 : vector<16x32xbf16> to vector<2x8x32xbf16>
    %197 = vector.extract_strided_slice %192 {offsets = [0, 0, 0], sizes = [2, 8, 8], strides = [1, 1, 1]} : vector<2x8x32xbf16> to vector<2x8x8xbf16>
    %198 = vector.extract_strided_slice %194 {offsets = [0, 0, 0], sizes = [2, 8, 8], strides = [1, 1, 1]} : vector<2x8x32xbf16> to vector<2x8x8xbf16>
    "tpu.trace_start"() <{level = 10 : i32, message = "bqd,bkd->bqk"}> : () -> ()
    %cst_94 = arith.constant dense<0.000000e+00> : vector<2x8x8xf32>
    %199 = tpu.matmul %197, %198, %cst_94 {dimension_numbers = #tpu.dot_dimension_numbers<[2], [2], [1], [1], [0, 0, 0, 1, 1, 1], [0], [0]>} : vector<2x8x8xbf16>, vector<2x8x8xbf16>, vector<2x8x8xf32> -> vector<2x8x8xf32>
    "tpu.trace_stop"() : () -> ()
    %cst_95 = arith.constant dense<0xFF800000> : vector<2x8xf32>
    %200 = vector.multi_reduction <maximumf>, %199, %cst_95 [2] : vector<2x8x8xf32> to vector<2x8xf32>
    %201 = vector.shape_cast %200 : vector<2x8xf32> to vector<2x8x1xf32>
    %202 = vector.broadcast %201 : vector<2x8x1xf32> to vector<2x8x8xf32>
    %203 = arith.subf %199, %202 : vector<2x8x8xf32>
    %204 = math.exp %203 : vector<2x8x8xf32>
    %cst_96 = arith.constant dense<0.000000e+00> : vector<2x8xf32>
    %205 = vector.multi_reduction <add>, %204, %cst_96 [2] : vector<2x8x8xf32> to vector<2x8xf32>
    %206 = vector.shape_cast %205 : vector<2x8xf32> to vector<2x8x1xf32>
    %207 = tpu.reciprocal %206 {approx = true} : vector<2x8x1xf32> -> vector<2x8x1xf32>
    %208 = vector.broadcast %207 : vector<2x8x1xf32> to vector<2x8x8xf32>
    %209 = arith.mulf %204, %208 : vector<2x8x8xf32>
    %210 = arith.truncf %209 : vector<2x8x8xf32> to vector<2x8x8xbf16>
    %211 = vector.extract_strided_slice %196 {offsets = [0, 0, 0], sizes = [2, 8, 8], strides = [1, 1, 1]} : vector<2x8x32xbf16> to vector<2x8x8xbf16>
    "tpu.trace_start"() <{level = 10 : i32, message = "bqk,bkd->bqd"}> : () -> ()
    %cst_97 = arith.constant dense<0.000000e+00> : vector<2x8x8xf32>
    %212 = tpu.matmul %210, %211, %cst_97 {dimension_numbers = #tpu.dot_dimension_numbers<[2], [1], [1], [2], [0, 0, 0, 1, 1, 2], [0], [0]>} : vector<2x8x8xbf16>, vector<2x8x8xbf16>, vector<2x8x8xf32> -> vector<2x8x8xf32>
    "tpu.trace_stop"() : () -> ()
    %213 = vector.extract_strided_slice %192 {offsets = [0, 0, 8], sizes = [2, 8, 8], strides = [1, 1, 1]} : vector<2x8x32xbf16> to vector<2x8x8xbf16>
    %214 = vector.extract_strided_slice %194 {offsets = [0, 0, 8], sizes = [2, 8, 8], strides = [1, 1, 1]} : vector<2x8x32xbf16> to vector<2x8x8xbf16>
    "tpu.trace_start"() <{level = 10 : i32, message = "bqd,bkd->bqk"}> : () -> ()
    %cst_98 = arith.constant dense<0.000000e+00> : vector<2x8x8xf32>
    %215 = tpu.matmul %213, %214, %cst_98 {dimension_numbers = #tpu.dot_dimension_numbers<[2], [2], [1], [1], [0, 0, 0, 1, 1, 1], [0], [0]>} : vector<2x8x8xbf16>, vector<2x8x8xbf16>, vector<2x8x8xf32> -> vector<2x8x8xf32>
    "tpu.trace_stop"() : () -> ()
    %cst_99 = arith.constant dense<0xFF800000> : vector<2x8xf32>
    %216 = vector.multi_reduction <maximumf>, %215, %cst_99 [2] : vector<2x8x8xf32> to vector<2x8xf32>
    %217 = vector.shape_cast %216 : vector<2x8xf32> to vector<2x8x1xf32>
    %218 = vector.broadcast %217 : vector<2x8x1xf32> to vector<2x8x8xf32>
    %219 = arith.subf %215, %218 : vector<2x8x8xf32>
    %220 = math.exp %219 : vector<2x8x8xf32>
    %cst_100 = arith.constant dense<0.000000e+00> : vector<2x8xf32>
    %221 = vector.multi_reduction <add>, %220, %cst_100 [2] : vector<2x8x8xf32> to vector<2x8xf32>
    %222 = vector.shape_cast %221 : vector<2x8xf32> to vector<2x8x1xf32>
    %223 = tpu.reciprocal %222 {approx = true} : vector<2x8x1xf32> -> vector<2x8x1xf32>
    %224 = vector.broadcast %223 : vector<2x8x1xf32> to vector<2x8x8xf32>
    %225 = arith.mulf %220, %224 : vector<2x8x8xf32>
    %226 = arith.truncf %225 : vector<2x8x8xf32> to vector<2x8x8xbf16>
    %227 = vector.extract_strided_slice %196 {offsets = [0, 0, 8], sizes = [2, 8, 8], strides = [1, 1, 1]} : vector<2x8x32xbf16> to vector<2x8x8xbf16>
    "tpu.trace_start"() <{level = 10 : i32, message = "bqk,bkd->bqd"}> : () -> ()
    %cst_101 = arith.constant dense<0.000000e+00> : vector<2x8x8xf32>
    %228 = tpu.matmul %226, %227, %cst_101 {dimension_numbers = #tpu.dot_dimension_numbers<[2], [1], [1], [2], [0, 0, 0, 1, 1, 2], [0], [0]>} : vector<2x8x8xbf16>, vector<2x8x8xbf16>, vector<2x8x8xf32> -> vector<2x8x8xf32>
    "tpu.trace_stop"() : () -> ()
    %229 = vector.extract_strided_slice %192 {offsets = [0, 0, 16], sizes = [2, 8, 8], strides = [1, 1, 1]} : vector<2x8x32xbf16> to vector<2x8x8xbf16>
    %230 = vector.extract_strided_slice %194 {offsets = [0, 0, 16], sizes = [2, 8, 8], strides = [1, 1, 1]} : vector<2x8x32xbf16> to vector<2x8x8xbf16>
    "tpu.trace_start"() <{level = 10 : i32, message = "bqd,bkd->bqk"}> : () -> ()
    %cst_102 = arith.constant dense<0.000000e+00> : vector<2x8x8xf32>
    %231 = tpu.matmul %229, %230, %cst_102 {dimension_numbers = #tpu.dot_dimension_numbers<[2], [2], [1], [1], [0, 0, 0, 1, 1, 1], [0], [0]>} : vector<2x8x8xbf16>, vector<2x8x8xbf16>, vector<2x8x8xf32> -> vector<2x8x8xf32>
    "tpu.trace_stop"() : () -> ()
    %cst_103 = arith.constant dense<0xFF800000> : vector<2x8xf32>
    %232 = vector.multi_reduction <maximumf>, %231, %cst_103 [2] : vector<2x8x8xf32> to vector<2x8xf32>
    %233 = vector.shape_cast %232 : vector<2x8xf32> to vector<2x8x1xf32>
    %234 = vector.broadcast %233 : vector<2x8x1xf32> to vector<2x8x8xf32>
    %235 = arith.subf %231, %234 : vector<2x8x8xf32>
    %236 = math.exp %235 : vector<2x8x8xf32>
    %cst_104 = arith.constant dense<0.000000e+00> : vector<2x8xf32>
    %237 = vector.multi_reduction <add>, %236, %cst_104 [2] : vector<2x8x8xf32> to vector<2x8xf32>
    %238 = vector.shape_cast %237 : vector<2x8xf32> to vector<2x8x1xf32>
    %239 = tpu.reciprocal %238 {approx = true} : vector<2x8x1xf32> -> vector<2x8x1xf32>
    %240 = vector.broadcast %239 : vector<2x8x1xf32> to vector<2x8x8xf32>
    %241 = arith.mulf %236, %240 : vector<2x8x8xf32>
    %242 = arith.truncf %241 : vector<2x8x8xf32> to vector<2x8x8xbf16>
    %243 = vector.extract_strided_slice %196 {offsets = [0, 0, 16], sizes = [2, 8, 8], strides = [1, 1, 1]} : vector<2x8x32xbf16> to vector<2x8x8xbf16>
    "tpu.trace_start"() <{level = 10 : i32, message = "bqk,bkd->bqd"}> : () -> ()
    %cst_105 = arith.constant dense<0.000000e+00> : vector<2x8x8xf32>
    %244 = tpu.matmul %242, %243, %cst_105 {dimension_numbers = #tpu.dot_dimension_numbers<[2], [1], [1], [2], [0, 0, 0, 1, 1, 2], [0], [0]>} : vector<2x8x8xbf16>, vector<2x8x8xbf16>, vector<2x8x8xf32> -> vector<2x8x8xf32>
    "tpu.trace_stop"() : () -> ()
    %245 = vector.extract_strided_slice %192 {offsets = [0, 0, 24], sizes = [2, 8, 8], strides = [1, 1, 1]} : vector<2x8x32xbf16> to vector<2x8x8xbf16>
    %246 = vector.extract_strided_slice %194 {offsets = [0, 0, 24], sizes = [2, 8, 8], strides = [1, 1, 1]} : vector<2x8x32xbf16> to vector<2x8x8xbf16>
    "tpu.trace_start"() <{level = 10 : i32, message = "bqd,bkd->bqk"}> : () -> ()
    %cst_106 = arith.constant dense<0.000000e+00> : vector<2x8x8xf32>
    %247 = tpu.matmul %245, %246, %cst_106 {dimension_numbers = #tpu.dot_dimension_numbers<[2], [2], [1], [1], [0, 0, 0, 1, 1, 1], [0], [0]>} : vector<2x8x8xbf16>, vector<2x8x8xbf16>, vector<2x8x8xf32> -> vector<2x8x8xf32>
    "tpu.trace_stop"() : () -> ()
    %cst_107 = arith.constant dense<0xFF800000> : vector<2x8xf32>
    %248 = vector.multi_reduction <maximumf>, %247, %cst_107 [2] : vector<2x8x8xf32> to vector<2x8xf32>
    %249 = vector.shape_cast %248 : vector<2x8xf32> to vector<2x8x1xf32>
    %250 = vector.broadcast %249 : vector<2x8x1xf32> to vector<2x8x8xf32>
    %251 = arith.subf %247, %250 : vector<2x8x8xf32>
    %252 = math.exp %251 : vector<2x8x8xf32>
    %cst_108 = arith.constant dense<0.000000e+00> : vector<2x8xf32>
    %253 = vector.multi_reduction <add>, %252, %cst_108 [2] : vector<2x8x8xf32> to vector<2x8xf32>
    %254 = vector.shape_cast %253 : vector<2x8xf32> to vector<2x8x1xf32>
    %255 = tpu.reciprocal %254 {approx = true} : vector<2x8x1xf32> -> vector<2x8x1xf32>
    %256 = vector.broadcast %255 : vector<2x8x1xf32> to vector<2x8x8xf32>
    %257 = arith.mulf %252, %256 : vector<2x8x8xf32>
    %258 = arith.truncf %257 : vector<2x8x8xf32> to vector<2x8x8xbf16>
    %259 = vector.extract_strided_slice %196 {offsets = [0, 0, 24], sizes = [2, 8, 8], strides = [1, 1, 1]} : vector<2x8x32xbf16> to vector<2x8x8xbf16>
    "tpu.trace_start"() <{level = 10 : i32, message = "bqk,bkd->bqd"}> : () -> ()
    %cst_109 = arith.constant dense<0.000000e+00> : vector<2x8x8xf32>
    %260 = tpu.matmul %258, %259, %cst_109 {dimension_numbers = #tpu.dot_dimension_numbers<[2], [1], [1], [2], [0, 0, 0, 1, 1, 2], [0], [0]>} : vector<2x8x8xbf16>, vector<2x8x8xbf16>, vector<2x8x8xf32> -> vector<2x8x8xf32>
    "tpu.trace_stop"() : () -> ()
    %261 = tpu.concatenate %212, %228, %244, %260 in 2 : vector<2x8x8xf32>, vector<2x8x8xf32>, vector<2x8x8xf32>, vector<2x8x8xf32> -> vector<2x8x32xf32>
    %262 = arith.truncf %261 : vector<2x8x32xf32> to vector<2x8x32xbf16>
    %263 = vector.shape_cast %262 : vector<2x8x32xbf16> to vector<16x32xbf16>
    %cst_110 = arith.constant dense<0.000000e+00> : vector<16x32xf32>
    %264 = tpu.matmul %263, %176, %cst_110 {dimension_numbers = #tpu.dot_dimension_numbers<[1], [0], [0], [1], [0, 0, 1, 1], [], []>} : vector<16x32xbf16>, vector<32x32xbf16>, vector<16x32xf32> -> vector<16x32xf32>
    %265 = vector.broadcast %178 : vector<1x32xf32> to vector<16x32xf32>
    %266 = arith.addf %264, %265 : vector<16x32xf32>
    %267 = arith.addf %160, %266 : vector<16x32xf32>
    %c0_111 = arith.constant 0 : index
    %c0_112 = arith.constant 0 : index
    %c0_113 = arith.constant 0 : index
    %268 = vector.load %arg22[%c0_111, %c0_112, %c0_113] : memref<1x1x32xf32, #tpu.memory_space<vmem>>, vector<1x1x32xf32>
    %269 = vector.shape_cast %268 : vector<1x1x32xf32> to vector<1x32xf32>
    %c0_114 = arith.constant 0 : index
    %c0_115 = arith.constant 0 : index
    %c0_116 = arith.constant 0 : index
    %270 = vector.load %arg23[%c0_114, %c0_115, %c0_116] : memref<1x1x32xf32, #tpu.memory_space<vmem>>, vector<1x1x32xf32>
    %271 = vector.shape_cast %270 : vector<1x1x32xf32> to vector<1x32xf32>
    %cst_117 = arith.constant dense<0.000000e+00> : vector<16xf32>
    %272 = vector.multi_reduction <add>, %267, %cst_117 [1] : vector<16x32xf32> to vector<16xf32>
    %273 = vector.shape_cast %272 : vector<16xf32> to vector<16x1xf32>
    %cst_118 = arith.constant 3.200000e+01 : f32
    %274 = vector.broadcast %cst_118 : f32 to vector<16x1xf32>
    %275 = arith.divf %273, %274 : vector<16x1xf32>
    %276 = vector.broadcast %275 : vector<16x1xf32> to vector<16x32xf32>
    %277 = arith.subf %267, %276 : vector<16x32xf32>
    %278 = arith.mulf %277, %277 : vector<16x32xf32>
    %cst_119 = arith.constant dense<0.000000e+00> : vector<16xf32>
    %279 = vector.multi_reduction <add>, %278, %cst_119 [1] : vector<16x32xf32> to vector<16xf32>
    %280 = vector.shape_cast %279 : vector<16xf32> to vector<16x1xf32>
    %cst_120 = arith.constant 3.200000e+01 : f32
    %281 = vector.broadcast %cst_120 : f32 to vector<16x1xf32>
    %282 = arith.divf %280, %281 : vector<16x1xf32>
    %cst_121 = arith.constant 9.99999974E-6 : f32
    %283 = vector.broadcast %cst_121 : f32 to vector<16x1xf32>
    %284 = arith.addf %282, %283 : vector<16x1xf32>
    %285 = math.rsqrt %284 : vector<16x1xf32>
    %286 = vector.broadcast %285 : vector<16x1xf32> to vector<16x32xf32>
    %287 = arith.mulf %277, %286 : vector<16x32xf32>
    %288 = vector.broadcast %269 : vector<1x32xf32> to vector<16x32xf32>
    %289 = arith.mulf %287, %288 : vector<16x32xf32>
    %290 = vector.broadcast %271 : vector<1x32xf32> to vector<16x32xf32>
    %291 = arith.addf %289, %290 : vector<16x32xf32>
    %c0_122 = arith.constant 0 : index
    %c0_123 = arith.constant 0 : index
    %c0_124 = arith.constant 0 : index
    %292 = vector.load %arg24[%c0_122, %c0_123, %c0_124] : memref<1x32x128xbf16, #tpu.memory_space<vmem>>, vector<1x32x128xbf16>
    %293 = vector.shape_cast %292 : vector<1x32x128xbf16> to vector<32x128xbf16>
    %c0_125 = arith.constant 0 : index
    %c0_126 = arith.constant 0 : index
    %c0_127 = arith.constant 0 : index
    %294 = vector.load %arg25[%c0_125, %c0_126, %c0_127] : memref<1x1x128xf32, #tpu.memory_space<vmem>>, vector<1x1x128xf32>
    %295 = vector.shape_cast %294 : vector<1x1x128xf32> to vector<1x128xf32>
    %c0_128 = arith.constant 0 : index
    %c0_129 = arith.constant 0 : index
    %c0_130 = arith.constant 0 : index
    %296 = vector.load %arg26[%c0_128, %c0_129, %c0_130] : memref<1x128x32xbf16, #tpu.memory_space<vmem>>, vector<1x128x32xbf16>
    %297 = vector.shape_cast %296 : vector<1x128x32xbf16> to vector<128x32xbf16>
    %c0_131 = arith.constant 0 : index
    %c0_132 = arith.constant 0 : index
    %c0_133 = arith.constant 0 : index
    %298 = vector.load %arg27[%c0_131, %c0_132, %c0_133] : memref<1x1x32xf32, #tpu.memory_space<vmem>>, vector<1x1x32xf32>
    %299 = vector.shape_cast %298 : vector<1x1x32xf32> to vector<1x32xf32>
    %c0_134 = arith.constant 0 : index
    %c0_135 = arith.constant 0 : index
    %c0_136 = arith.constant 0 : index
    %300 = vector.load %arg28[%c0_134, %c0_135, %c0_136] : memref<1x1x32xf32, #tpu.memory_space<vmem>>, vector<1x1x32xf32>
    %301 = vector.shape_cast %300 : vector<1x1x32xf32> to vector<1x32xf32>
    %c0_137 = arith.constant 0 : index
    %c0_138 = arith.constant 0 : index
    %c0_139 = arith.constant 0 : index
    %302 = vector.load %arg29[%c0_137, %c0_138, %c0_139] : memref<1x1x32xf32, #tpu.memory_space<vmem>>, vector<1x1x32xf32>
    %303 = vector.shape_cast %302 : vector<1x1x32xf32> to vector<1x32xf32>
    %304 = arith.truncf %291 : vector<16x32xf32> to vector<16x32xbf16>
    %cst_140 = arith.constant dense<0.000000e+00> : vector<16x128xf32>
    %305 = tpu.matmul %304, %293, %cst_140 {dimension_numbers = #tpu.dot_dimension_numbers<[1], [0], [0], [1], [0, 0, 1, 1], [], []>} : vector<16x32xbf16>, vector<32x128xbf16>, vector<16x128xf32> -> vector<16x128xf32>
    %306 = vector.broadcast %295 : vector<1x128xf32> to vector<16x128xf32>
    %307 = arith.addf %305, %306 : vector<16x128xf32>
    %cst_141 = arith.constant 0.000000e+00 : f32
    %308 = vector.broadcast %cst_141 : f32 to vector<16x128xf32>
    %309 = arith.maximumf %307, %308 : vector<16x128xf32>
    %310 = arith.truncf %309 : vector<16x128xf32> to vector<16x128xbf16>
    %cst_142 = arith.constant dense<0.000000e+00> : vector<16x32xf32>
    %311 = tpu.matmul %310, %297, %cst_142 {dimension_numbers = #tpu.dot_dimension_numbers<[1], [0], [0], [1], [0, 0, 1, 1], [], []>} : vector<16x128xbf16>, vector<128x32xbf16>, vector<16x32xf32> -> vector<16x32xf32>
    %312 = vector.broadcast %299 : vector<1x32xf32> to vector<16x32xf32>
    %313 = arith.addf %311, %312 : vector<16x32xf32>
    %314 = arith.addf %291, %313 : vector<16x32xf32>
    %cst_143 = arith.constant dense<0.000000e+00> : vector<16xf32>
    %315 = vector.multi_reduction <add>, %314, %cst_143 [1] : vector<16x32xf32> to vector<16xf32>
    %316 = vector.shape_cast %315 : vector<16xf32> to vector<16x1xf32>
    %cst_144 = arith.constant 3.200000e+01 : f32
    %317 = vector.broadcast %cst_144 : f32 to vector<16x1xf32>
    %318 = arith.divf %316, %317 : vector<16x1xf32>
    %319 = vector.broadcast %318 : vector<16x1xf32> to vector<16x32xf32>
    %320 = arith.subf %314, %319 : vector<16x32xf32>
    %321 = arith.mulf %320, %320 : vector<16x32xf32>
    %cst_145 = arith.constant dense<0.000000e+00> : vector<16xf32>
    %322 = vector.multi_reduction <add>, %321, %cst_145 [1] : vector<16x32xf32> to vector<16xf32>
    %323 = vector.shape_cast %322 : vector<16xf32> to vector<16x1xf32>
    %cst_146 = arith.constant 3.200000e+01 : f32
    %324 = vector.broadcast %cst_146 : f32 to vector<16x1xf32>
    %325 = arith.divf %323, %324 : vector<16x1xf32>
    %cst_147 = arith.constant 9.99999974E-6 : f32
    %326 = vector.broadcast %cst_147 : f32 to vector<16x1xf32>
    %327 = arith.addf %325, %326 : vector<16x1xf32>
    %328 = math.rsqrt %327 : vector<16x1xf32>
    %329 = vector.broadcast %328 : vector<16x1xf32> to vector<16x32xf32>
    %330 = arith.mulf %320, %329 : vector<16x32xf32>
    %331 = vector.broadcast %301 : vector<1x32xf32> to vector<16x32xf32>
    %332 = arith.mulf %330, %331 : vector<16x32xf32>
    %333 = vector.broadcast %303 : vector<1x32xf32> to vector<16x32xf32>
    %334 = arith.addf %332, %333 : vector<16x32xf32>
    %335 = arith.addf %291, %334 : vector<16x32xf32>
    %c0_148 = arith.constant 0 : index
    %c0_149 = arith.constant 0 : index
    %c0_150 = arith.constant 0 : index
    %336 = vector.load %arg30[%c0_148, %c0_149, %c0_150] : memref<1x1x32xf32, #tpu.memory_space<vmem>>, vector<1x1x32xf32>
    %337 = vector.shape_cast %336 : vector<1x1x32xf32> to vector<1x32xf32>
    %c0_151 = arith.constant 0 : index
    %c0_152 = arith.constant 0 : index
    %c0_153 = arith.constant 0 : index
    %338 = vector.load %arg31[%c0_151, %c0_152, %c0_153] : memref<1x1x32xf32, #tpu.memory_space<vmem>>, vector<1x1x32xf32>
    %339 = vector.shape_cast %338 : vector<1x1x32xf32> to vector<1x32xf32>
    %cst_154 = arith.constant dense<0.000000e+00> : vector<16xf32>
    %340 = vector.multi_reduction <add>, %335, %cst_154 [1] : vector<16x32xf32> to vector<16xf32>
    %341 = vector.shape_cast %340 : vector<16xf32> to vector<16x1xf32>
    %cst_155 = arith.constant 3.200000e+01 : f32
    %342 = vector.broadcast %cst_155 : f32 to vector<16x1xf32>
    %343 = arith.divf %341, %342 : vector<16x1xf32>
    %344 = vector.broadcast %343 : vector<16x1xf32> to vector<16x32xf32>
    %345 = arith.subf %335, %344 : vector<16x32xf32>
    %346 = arith.mulf %345, %345 : vector<16x32xf32>
    %cst_156 = arith.constant dense<0.000000e+00> : vector<16xf32>
    %347 = vector.multi_reduction <add>, %346, %cst_156 [1] : vector<16x32xf32> to vector<16xf32>
    %348 = vector.shape_cast %347 : vector<16xf32> to vector<16x1xf32>
    %cst_157 = arith.constant 3.200000e+01 : f32
    %349 = vector.broadcast %cst_157 : f32 to vector<16x1xf32>
    %350 = arith.divf %348, %349 : vector<16x1xf32>
    %cst_158 = arith.constant 9.99999974E-6 : f32
    %351 = vector.broadcast %cst_158 : f32 to vector<16x1xf32>
    %352 = arith.addf %350, %351 : vector<16x1xf32>
    %353 = math.rsqrt %352 : vector<16x1xf32>
    %354 = vector.broadcast %353 : vector<16x1xf32> to vector<16x32xf32>
    %355 = arith.mulf %345, %354 : vector<16x32xf32>
    %356 = vector.broadcast %337 : vector<1x32xf32> to vector<16x32xf32>
    %357 = arith.mulf %355, %356 : vector<16x32xf32>
    %358 = vector.broadcast %339 : vector<1x32xf32> to vector<16x32xf32>
    %359 = arith.addf %357, %358 : vector<16x32xf32>
    %c0_159 = arith.constant 0 : index
    %c0_160 = arith.constant 0 : index
    %360 = vector.load %arg33[%c0_159, %c0_160] : memref<16x32xf32, #tpu.memory_space<vmem>>, vector<16x32xf32>
    tpu.vector_store %arg33[%c0_159, %c0_160], %359 {strides = array<i32>} : memref<16x32xf32, #tpu.memory_space<vmem>>, vector<16x32xf32>,
    %c1_i32 = arith.constant 1 : i32
    %361 = arith.cmpi eq, %arg0, %c1_i32 : i32
    %362 = arith.extui %361 : i1 to i32
    %c0_i32_161 = arith.constant 0 : i32
    %363 = arith.cmpi ne, %362, %c0_i32_161 : i32
    scf.if %363 {
      %364 = arith.truncf %359 : vector<16x32xf32> to vector<16x32xbf16>
      %c0_162 = arith.constant 0 : index
      %c0_163 = arith.constant 0 : index
      %365 = vector.load %arg32[%c0_162, %c0_163] : memref<16x32xbf16, #tpu.memory_space<vmem>>, vector<16x32xbf16>
      tpu.vector_store %arg32[%c0_162, %c0_163], %364 {strides = array<i32>} : memref<16x32xbf16, #tpu.memory_space<vmem>>, vector<16x32xbf16>,
    } else {
    }
    return
  }
  func.func @transform_0(%arg0: i32) -> (i32, i32) {
    %c0_i32 = arith.constant 0 : i32
    %c0_i32_0 = arith.constant 0 : i32
    %c0_i32_1 = arith.constant 0 : i32
    return %c0_i32, %c0_i32_0 : i32, i32
  }
  func.func @transform_1(%arg0: i32) -> (i32, i32) {
    %c0_i32 = arith.constant 0 : i32
    %c0_i32_0 = arith.constant 0 : i32
    %c0_i32_1 = arith.constant 0 : i32
    return %c0_i32, %c0_i32_0 : i32, i32
  }
  func.func @transform_2(%arg0: i32) -> (i32, i32) {
    %c0_i32 = arith.constant 0 : i32
    %c0_i32_0 = arith.constant 0 : i32
    %c0_i32_1 = arith.constant 0 : i32
    return %c0_i32, %c0_i32_0 : i32, i32
  }
  func.func @transform_3(%arg0: i32) -> (i32, i32, i32) {
    %c0_i32 = arith.constant 0 : i32
    %c0_i32_0 = arith.constant 0 : i32
    %c0_i32_1 = arith.constant 0 : i32
    return %arg0, %c0_i32, %c0_i32_0 : i32, i32, i32
  }
  func.func @transform_4(%arg0: i32) -> (i32, i32, i32) {
    %c0_i32 = arith.constant 0 : i32
    %c0_i32_0 = arith.constant 0 : i32
    %c0_i32_1 = arith.constant 0 : i32
    return %arg0, %c0_i32, %c0_i32_0 : i32, i32, i32
  }
  func.func @transform_5(%arg0: i32) -> (i32, i32, i32) {
    %c0_i32 = arith.constant 0 : i32
    %c0_i32_0 = arith.constant 0 : i32
    %c0_i32_1 = arith.constant 0 : i32
    return %arg0, %c0_i32, %c0_i32_0 : i32, i32, i32
  }
  func.func @transform_6(%arg0: i32) -> (i32, i32, i32) {
    %c0_i32 = arith.constant 0 : i32
    %c0_i32_0 = arith.constant 0 : i32
    %c0_i32_1 = arith.constant 0 : i32
    return %arg0, %c0_i32, %c0_i32_0 : i32, i32, i32
  }
  func.func @transform_7(%arg0: i32) -> (i32, i32, i32) {
    %c0_i32 = arith.constant 0 : i32
    %c0_i32_0 = arith.constant 0 : i32
    %c0_i32_1 = arith.constant 0 : i32
    return %arg0, %c0_i32, %c0_i32_0 : i32, i32, i32
  }
  func.func @transform_8(%arg0: i32) -> (i32, i32, i32) {
    %c0_i32 = arith.constant 0 : i32
    %c0_i32_0 = arith.constant 0 : i32
    %c0_i32_1 = arith.constant 0 : i32
    return %arg0, %c0_i32, %c0_i32_0 : i32, i32, i32
  }
  func.func @transform_9(%arg0: i32) -> (i32, i32, i32) {
    %c0_i32 = arith.constant 0 : i32
    %c0_i32_0 = arith.constant 0 : i32
    %c0_i32_1 = arith.constant 0 : i32
    return %arg0, %c0_i32, %c0_i32_0 : i32, i32, i32
  }
  func.func @transform_10(%arg0: i32) -> (i32, i32, i32) {
    %c0_i32 = arith.constant 0 : i32
    %c0_i32_0 = arith.constant 0 : i32
    %c0_i32_1 = arith.constant 0 : i32
    return %arg0, %c0_i32, %c0_i32_0 : i32, i32, i32
  }
  func.func @transform_11(%arg0: i32) -> (i32, i32, i32) {
    %c0_i32 = arith.constant 0 : i32
    %c0_i32_0 = arith.constant 0 : i32
    %c0_i32_1 = arith.constant 0 : i32
    return %arg0, %c0_i32, %c0_i32_0 : i32, i32, i32
  }
  func.func @transform_12(%arg0: i32) -> (i32, i32, i32) {
    %c0_i32 = arith.constant 0 : i32
    %c0_i32_0 = arith.constant 0 : i32
    %c0_i32_1 = arith.constant 0 : i32
    return %arg0, %c0_i32, %c0_i32_0 : i32, i32, i32
  }
  func.func @transform_13(%arg0: i32) -> (i32, i32, i32) {
    %c0_i32 = arith.constant 0 : i32
    %c0_i32_0 = arith.constant 0 : i32
    %c0_i32_1 = arith.constant 0 : i32
    return %arg0, %c0_i32, %c0_i32_0 : i32, i32, i32
  }
  func.func @transform_14(%arg0: i32) -> (i32, i32, i32) {
    %c0_i32 = arith.constant 0 : i32
    %c0_i32_0 = arith.constant 0 : i32
    %c0_i32_1 = arith.constant 0 : i32
    return %arg0, %c0_i32, %c0_i32_0 : i32, i32, i32
  }
  func.func @transform_15(%arg0: i32) -> (i32, i32, i32) {
    %c0_i32 = arith.constant 0 : i32
    %c0_i32_0 = arith.constant 0 : i32
    %c0_i32_1 = arith.constant 0 : i32
    return %arg0, %c0_i32, %c0_i32_0 : i32, i32, i32
  }
  func.func @transform_16(%arg0: i32) -> (i32, i32, i32) {
    %c0_i32 = arith.constant 0 : i32
    %c0_i32_0 = arith.constant 0 : i32
    %c0_i32_1 = arith.constant 0 : i32
    return %arg0, %c0_i32, %c0_i32_0 : i32, i32, i32
  }
  func.func @transform_17(%arg0: i32) -> (i32, i32, i32) {
    %c0_i32 = arith.constant 0 : i32
    %c0_i32_0 = arith.constant 0 : i32
    %c0_i32_1 = arith.constant 0 : i32
    return %arg0, %c0_i32, %c0_i32_0 : i32, i32, i32
  }
  func.func @transform_18(%arg0: i32) -> (i32, i32, i32) {
    %c0_i32 = arith.constant 0 : i32
    %c0_i32_0 = arith.constant 0 : i32
    %c0_i32_1 = arith.constant 0 : i32
    return %arg0, %c0_i32, %c0_i32_0 : i32, i32, i32
  }
  func.func @transform_19(%arg0: i32) -> (i32, i32, i32) {
    %c0_i32 = arith.constant 0 : i32
    %c0_i32_0 = arith.constant 0 : i32
    %c0_i32_1 = arith.constant 0 : i32
    return %arg0, %c0_i32, %c0_i32_0 : i32, i32, i32
  }
  func.func @transform_20(%arg0: i32) -> (i32, i32, i32) {
    %c0_i32 = arith.constant 0 : i32
    %c0_i32_0 = arith.constant 0 : i32
    %c0_i32_1 = arith.constant 0 : i32
    return %arg0, %c0_i32, %c0_i32_0 : i32, i32, i32
  }
  func.func @transform_21(%arg0: i32) -> (i32, i32, i32) {
    %c0_i32 = arith.constant 0 : i32
    %c0_i32_0 = arith.constant 0 : i32
    %c0_i32_1 = arith.constant 0 : i32
    return %arg0, %c0_i32, %c0_i32_0 : i32, i32, i32
  }
  func.func @transform_22(%arg0: i32) -> (i32, i32, i32) {
    %c0_i32 = arith.constant 0 : i32
    %c0_i32_0 = arith.constant 0 : i32
    %c0_i32_1 = arith.constant 0 : i32
    return %arg0, %c0_i32, %c0_i32_0 : i32, i32, i32
  }
  func.func @transform_23(%arg0: i32) -> (i32, i32, i32) {
    %c0_i32 = arith.constant 0 : i32
    %c0_i32_0 = arith.constant 0 : i32
    %c0_i32_1 = arith.constant 0 : i32
    return %arg0, %c0_i32, %c0_i32_0 : i32, i32, i32
  }
  func.func @transform_24(%arg0: i32) -> (i32, i32, i32) {
    %c0_i32 = arith.constant 0 : i32
    %c0_i32_0 = arith.constant 0 : i32
    %c0_i32_1 = arith.constant 0 : i32
    return %arg0, %c0_i32, %c0_i32_0 : i32, i32, i32
  }
  func.func @transform_25(%arg0: i32) -> (i32, i32, i32) {
    %c0_i32 = arith.constant 0 : i32
    %c0_i32_0 = arith.constant 0 : i32
    %c0_i32_1 = arith.constant 0 : i32
    return %arg0, %c0_i32, %c0_i32_0 : i32, i32, i32
  }
  func.func @transform_26(%arg0: i32) -> (i32, i32, i32) {
    %c0_i32 = arith.constant 0 : i32
    %c0_i32_0 = arith.constant 0 : i32
    %c0_i32_1 = arith.constant 0 : i32
    return %arg0, %c0_i32, %c0_i32_0 : i32, i32, i32
  }
  func.func @transform_27(%arg0: i32) -> (i32, i32, i32) {
    %c0_i32 = arith.constant 0 : i32
    %c0_i32_0 = arith.constant 0 : i32
    %c0_i32_1 = arith.constant 0 : i32
    return %arg0, %c0_i32, %c0_i32_0 : i32, i32, i32
  }
  func.func @transform_28(%arg0: i32) -> (i32, i32, i32) {
    %c0_i32 = arith.constant 0 : i32
    %c0_i32_0 = arith.constant 0 : i32
    %c0_i32_1 = arith.constant 0 : i32
    return %arg0, %c0_i32, %c0_i32_0 : i32, i32, i32
  }
  func.func @transform_29(%arg0: i32) -> (i32, i32, i32) {
    %c0_i32 = arith.constant 0 : i32
    %c0_i32_0 = arith.constant 0 : i32
    %c0_i32_1 = arith.constant 0 : i32
    return %arg0, %c0_i32, %c0_i32_0 : i32, i32, i32
  }
  func.func @transform_30(%arg0: i32) -> (i32, i32, i32) {
    %c0_i32 = arith.constant 0 : i32
    %c0_i32_0 = arith.constant 0 : i32
    %c0_i32_1 = arith.constant 0 : i32
    return %arg0, %c0_i32, %c0_i32_0 : i32, i32, i32
  }
  func.func @transform_31(%arg0: i32) -> (i32, i32) {
    %c0_i32 = arith.constant 0 : i32
    %c0_i32_0 = arith.constant 0 : i32
    %c0_i32_1 = arith.constant 0 : i32
    return %c0_i32, %c0_i32_0 : i32, i32
  }
}

</mosaic_0001>

<bundles_post_ra>
// kernel: aiayn_forward.5
= control target key start
LH: loop header
LB: loop body
LE: loop exit
PB: predicated region body
PF: predicated region fallthrough
CT: control target
= control target key end

     0   :  { %11 = vsyncpa [#allocation3], 0  ;;  %v293_v1 = vmov 0.0   ;;  %vm294_vm0 = vmmov 0   ;;  %v295_v4 = vmov 0   ;;  %s387_s0 = inlined_call_operand.vmem [shape: bf16[14,32], index: 0, kind: input, shape index: {}]   ;;  %s388_s1 = inlined_call_operand.vmem [shape: bf16[32,128], index: 1, kind: input, shape index: {}]   ;;  %s389_s2 = inlined_call_operand.vmem [shape: f32[1,128], index: 2, kind: input, shape index: {}]   ;;  %s390_s3 = inlined_call_operand.vmem [shape: s32[14,1], index: 3, kind: input, shape index: {}]   ;;  %s391_s4 = inlined_call_operand.hbm [shape: f32[14,128], index: 4, kind: output, shape index: {0}]   ;;  %s392_s5 = inlined_call_operand.hbm [shape: f32[1,1], index: 5, kind: output, shape index: {1}]  }
   0x1   :  { %v232_v0 = vld [vmem:[%s388_s1] sm:$0xff]   ;;  %215 = vmatprep.subr.bf16.mxu0 %v293_v1  ;;  %v233_v2 = vld [vmem:[%s388_s1 + $0x8] sm:$0xff]   ;;  %219 = vmatprep.mubr.msk.bf16.mxu0 %vm294_vm0, %v293_v1 }
   0x2   :  { %216 = vmatpush3.bf16.msra.mxu0 %v232_v0  ;;  %v100_v3 = vld [vmem:[%s390_s3 + $0x8] sm:$0x3f]  ;;  %230 = vset.pattern.permute.xlu1 %v295_v4 }
   0x3   :  { %217 = vmatprep.subr.bf16.mxu0 %v293_v1  ;;  %231 = vset.pattern.permute.xlu0 %v295_v4 }
   0x4   :  { %12 = vsyncpa [#allocation5], 0  ;;  %v234_v5 = vld [vmem:[%s387_s0] sm:$0x7f]   ;;  %130 = vperm.xlu1 %230, %v100_v3   ;;  %vm52_vm1 = vcmask 261120   ;;  %vm105_vm2 = vcmask 1045504   ;;  %v101_v22 = vlaneseq }
   0x5   :  { %v99_v6 = vld [vmem:[%s390_s3] sm:$0xff]  ;;  %vm144_vm5 = vcmp.ne.s32.totalorder %v100_v3, 0  ;;  %vm153_vm6 = vcmask 5120   ;;  %vm151_vm8 = vcmask 7168   ;;  %s296_s0 = smov [#allocation2]  }
   0x6   :  { %218 = vmatpush3.bf16.msra.mxu0 %v233_v2  ;;  %v205_v7 = vld [vmem:[%s389_s2] ss:$0 sm:$0xff]  ;;  %v102_v24 = vand.u32 127, %v101_v22  ;;  %v211_v31 = vsel %vm144_vm5, 1.0, %v293_v1  ;;  %vm143_vm7 = vcmp.ne.s32.totalorder %v99_v6, 0  ;;  %s180_s2 = sshll.u32 %s296_s0, 4  ;;  %s181_s2 = int_to_ptr.vmem [resolvable:$true] %s180_s2 }
   0x7   :  { %v163_v32 = vsel %vm153_vm6, %v211_v31, 0.0  ;;  %v210_v33 = vsel %vm143_vm7, 1.0, %v293_v1  ;;  %s245_s3 = scalar_lea.vmem %s181_s2, 256  ;;  %p250_p1 = scmp.lt.s32.totalorder %s181_s2, %s181_s2 }
   0x8   :  { %127 = vperm.xlu1 %230, %v99_v6   ;;  %v162_v34 = vsel %vm151_vm8, %v210_v33, 0.0  ;;  %p246_p0 = scmp.ne.s32.totalorder %s181_s2, %s245_s3  ;;  %p251_p2 = scmp.lt.s32.totalorder %s245_s3, %s245_s3 }
   0x9   :  { %220 = vmatmul.mubr.msk.bf16.vlgmr.msra.gmra.mrb[0].mxu0 %vm52_vm1, %v234_v5  ;;  %v164_v35 = vadd.f32 %v163_v32, %v162_v34 }
   0xa   :  { %p252_p3 = por %p251_p2, %p250_p1 }
   0xc   :  { %p253_p4 = pnand %p252_p3, %p246_p0 }
  0x83   :  { %v131_v21 = vpop.permute.xlu1 %130 }
  0x84   :  { %vm133_vm4 = vcmp.eq.s32.totalorder %v102_v24, %v131_v21 }
  0x87   :  { %v128_v26 = vpop.permute.xlu1 %127 }
  0x88   :  { %vm132_vm3 = vcmp.eq.s32.totalorder %v102_v24, %v128_v26 }
  0xdc   :  { %v90_v8 = vpop.f32.mrb[0].mxu0 }
  0xdd   :  { %v91_v9 = vadd.f32 %v205_v7, %v90_v8  ;;  %v221_v10 = vpop.f32.mrb[1].mxu0 }
  0xde   :  { %v93_v11 = vpop.f32.mrb[2].mxu0 }
  0xdf   :  { %97 = vst [vmem:[#allocation2] sm:$0xff] %v91_v9  ;;  %v94_v12 = vadd.f32 %v205_v7, %v93_v11  ;;  %v222_v13 = vpop.f32.mrb[3].mxu0  ;;  %v134_v28 = vsel %vm132_vm3, %v91_v9, 0.0 }
  0xe1   :  { %98 = vst [vmem:[#allocation2 + $0x8] sm:$0x3f] %v94_v12  ;;  %v106_v14 = vsel %vm105_vm2, %v94_v12, -inf  ;;  %v135_v29 = vsel %vm133_vm4, %v94_v12, 0.0 }
  0xe2   :  { %107 = vmax.xlane.f32.xlu0 %v106_v14  ;;  %v138_v30 = vsel %vm105_vm2, %v135_v29, 0.0 }
  0xe6   :  { %103 = vmax.xlane.f32.xlu0 %v91_v9 }
 0x16f   :  { %v349_v15 = vpop.xlane.xlu0 %107 }
 0x170   :  { %v110_v16 = vsub.f32 %v94_v12, %v349_v15 }
 0x172   :  { %v113_v17 = vmul.f32 1.442695, %v110_v16 }
 0x173   :  { %v352_v18 = vpop.xlane.xlu0 %103 }
 0x174   :  { %235 = vpow2.f32 %v113_v17  ;;  %v109_v19 = vsub.f32 %v91_v9, %v352_v18 }
 0x176   :  { %v111_v20 = vmul.f32 1.442695, %v109_v19 }
 0x178   :  { %237 = vpow2.f32 %v111_v20 }
 0x17e   :  { %v236_v23 = vpop.eup %235 }
 0x17f   :  { %v117_v25 = vsel %vm105_vm2, %v236_v23, 0.0 }
 0x180   :  { %118 = vadd.xlane.f32.xlu1 %v117_v25 }
 0x182   :  { %v238_v27 = vpop.eup %237 }
 0x183   :  { %115 = vadd.xlane.f32.xlu0 %v238_v27 }
 0x187   :  { %136 = vadd.xlane.f32.xlu0 %v134_v28 }
 0x18b   :  { %139 = vadd.xlane.f32.xlu0 %v138_v30 }
 0x18c   :  { %256 = shalt.err (!%p253_p4)
}
 0x18d   :  { %s257_s6 = scalar_lea.hbm %s391_s4, 256 }
 0x18e   :  { %p258_p5 = scmp.ne.s32.totalorder %s391_s4, %s257_s6  ;;  %p261_p6 = scmp.lt.u32.totalorder %s257_s6, %s391_s4 }
 0x190   :  { %p263_p7 = pnand %p261_p6, %p258_p5 }
 0x192   :  { %266 = shalt.err (!%p263_p7)
}
 0x193   :  { %s297_s11 = smov 128   ;;  %s298_s12 = smov 8   ;;  %v165_v37 = vrot.slane %v164_v35, 4  ;;  %vm173_vm9 = vcmask 0  }
 0x194   :  { %186 = dma.vmem_to_hbm [thread:$0]  %s181_s2, 256, %s391_s4, [#allocation3], %s297_s11, %s297_s11, %s298_s12  }
 0x195   :  { %v166_v39 = vadd.f32 %v165_v37, %v164_v35  ;;  %s299_s4 = smov [#allocation4]  }
 0x196   :  { %s193_s15 = sshll.u32 %s299_s4, 4  ;;  %s194_s15 = int_to_ptr.vmem [resolvable:$true] %s193_s15 }
 0x197   :  { %v167_v40 = vrot.slane %v166_v39, 2  ;;  %s267_s16 = scalar_lea.vmem %s194_s15, 16  ;;  %s271_s17 = scalar_lea.vmem %s194_s15, 32 }
 0x198   :  { %p268_p8 = scmp.ne.s32.totalorder %s194_s15, %s267_s16  ;;  %p272_p9 = scmp.lt.s32.totalorder %s194_s15, %s194_s15 }
 0x199   :  { %v168_v44 = vadd.f32 %v167_v40, %v166_v39  ;;  %p273_p10 = scmp.lt.s32.totalorder %s271_s17, %s267_s16 }
 0x19b   :  { %v169_v51 = vrot.slane %v168_v44, 1  ;;  %p274_p11 = por %p273_p10, %p272_p9 }
 0x19d   :  { %v170_v54 = vadd.f32 %v169_v51, %v168_v44  ;;  %p275_p12 = pnand %p274_p11, %p268_p8 }
 0x20d   :  { %v119_v36 = vpop.xlane.xlu1 %118 }
 0x20e   :  { %239 = vlog2.f32 %v119_v36 }
 0x210   :  { %v116_v38 = vpop.xlane.xlu0 %115 }
 0x211   :  { %241 = vlog2.f32 %v116_v38 }
 0x212   :  { %243 = vrcp.f32 %v170_v54 }
 0x214   :  { %v137_v41 = vpop.xlane.xlu0 %136 }
 0x218   :  { %v240_v42 = vpop.eup %239  ;;  %v140_v48 = vpop.xlane.xlu0 %139 }
 0x219   :  { %v123_v43 = vmul.f32 0.6931472, %v240_v42 }
 0x21b   :  { %v242_v45 = vpop.eup %241  ;;  %v125_v46 = vadd.f32 %v123_v43, %v349_v15 }
 0x21c   :  { %v121_v47 = vmul.f32 0.6931472, %v242_v45  ;;  %v244_v0 = vpop.eup %243 }
 0x21d   :  { %v142_v49 = vsub.f32 %v125_v46, %v140_v48 }
 0x21e   :  { %v124_v50 = vadd.f32 %v121_v47, %v352_v18 }
 0x21f   :  { %v150_v53 = vmul.f32 %v211_v31, %v142_v49 }
 0x220   :  { %v141_v52 = vsub.f32 %v124_v50, %v137_v41 }
 0x221   :  { %v154_v57 = vsel %vm153_vm6, %v150_v53, 0.0 }
 0x222   :  { %v149_v55 = vmul.f32 %v210_v33, %v141_v52 }
 0x224   :  { %v152_v56 = vsel %vm151_vm8, %v149_v55, 0.0 }
 0x225   :  { %v155_v58 = vadd.f32 %v154_v57, %v152_v56 }
 0x227   :  { %v156_v59 = vrot.slane %v155_v58, 4 }
 0x229   :  { %v157_v60 = vadd.f32 %v156_v59, %v155_v58 }
 0x22b   :  { %v158_v61 = vrot.slane %v157_v60, 2 }
 0x22d   :  { %v159_v62 = vadd.f32 %v158_v61, %v157_v60 }
 0x22f   :  { %v160_v63 = vrot.slane %v159_v62, 1 }
 0x231   :  { %v161_v1 = vadd.f32 %v160_v63, %v159_v62 }
 0x233   :  { %v172_v2 = vmul.f32 %v244_v0, %v161_v1 }
 0x235   :  { %174 = vst.msk [vmem:[#allocation4] sm:$0x1] %vm173_vm9, %v172_v2 }
 0x236   :  { %278 = shalt.err (!%p275_p12)
}
 0x237   :  { %s279_s20 = scalar_lea.hbm %s392_s5, 16 }
 0x238   :  { %p280_p13 = scmp.ne.s32.totalorder %s392_s5, %s279_s20  ;;  %p283_p0 = scmp.lt.u32.totalorder %s279_s20, %s392_s5 }
 0x23a   :  { %p285_p1 = pnand %p283_p0, %p280_p13 }
 0x23c   :  { %288 = shalt.err (!%p285_p1)
}
 0x23d   :  { %196 = dma.vmem_to_hbm [thread:$0]  %s194_s15, 16, %s392_s5, [#allocation5]  }
 0x23e   :  { %289 = dma.done.wait [#allocation3], 256  }
 0x23f   :  { %290 = vsyncadd [#allocation3], 4294967040 }
 0x240   :  { %291 = dma.done.wait [#allocation5], 16  }
 0x241   :  { %292 = vsyncadd [#allocation5], 4294967280 }
 0x242   :  { %203 = vsyncpa [#allocation3], 1 }
 0x243   :  { %204 = vsyncpa [#allocation5], 1 }

// kernel: aiayn_forward.3
= control target key start
LH: loop header
LB: loop body
LE: loop exit
PB: predicated region body
PF: predicated region fallthrough
CT: control target
= control target key end

     0   :  { %s3847_s0 = inlined_call_operand.vmem [shape: f32[16,32], index: 0, kind: input, shape index: {}]   ;;  %s3848_s1 = inlined_call_operand.vmem [shape: bf16[2,32,32], index: 1, kind: input, shape index: {}]   ;;  %s3849_s2 = inlined_call_operand.vmem [shape: f32[2,1,32], index: 2, kind: input, shape index: {}]   ;;  %s3850_s3 = inlined_call_operand.vmem [shape: bf16[2,32,32], index: 3, kind: input, shape index: {}]   ;;  %s3851_s4 = inlined_call_operand.vmem [shape: f32[2,1,32], index: 4, kind: input, shape index: {}]   ;;  %s3852_s5 = inlined_call_operand.vmem [shape: bf16[2,32,32], index: 5, kind: input, shape index: {}]   ;;  %s3853_s6 = inlined_call_operand.vmem [shape: f32[2,1,32], index: 6, kind: input, shape index: {}]   ;;  %s3854_s7 = inlined_call_operand.vmem [shape: bf16[2,32,32], index: 7, kind: input, shape index: {}]   ;;  %s3855_s8 = inlined_call_operand.vmem [shape: f32[2,1,32], index: 8, kind: input, shape index: {}]   ;;  %s3856_s9 = inlined_call_operand.vmem [shape: f32[2,1,32], index: 9, kind: input, shape index: {}]   ;;  %s3857_s10 = inlined_call_operand.vmem [shape: f32[2,1,32], index: 10, kind: input, shape index: {}]   ;;  %s3858_s11 = inlined_call_operand.vmem [shape: bf16[2,32,128], index: 11, kind: input, shape index: {}]   ;;  %s3859_s12 = inlined_call_operand.vmem [shape: f32[2,1,128], index: 12, kind: input, shape index: {}]   ;;  %s3860_s13 = inlined_call_operand.vmem [shape: bf16[2,128,32], index: 13, kind: input, shape index: {}]   ;;  %s3861_s14 = inlined_call_operand.vmem [shape: f32[2,1,32], index: 14, kind: input, shape index: {}]   ;;  %s3862_s15 = inlined_call_operand.vmem [shape: f32[2,1,32], index: 15, kind: input, shape index: {}]   ;;  %s3863_s16 = inlined_call_operand.vmem [shape: f32[2,1,32], index: 16, kind: input, shape index: {}]   ;;  %s3864_s17 = inlined_call_operand.vmem [shape: f32[2,1,32], index: 17, kind: input, shape index: {}]   ;;  %s3865_s18 = inlined_call_operand.vmem [shape: f32[2,1,32], index: 18, kind: input, shape index: {}]   ;;  %s3866_s19 = inlined_call_operand.vmem [shape: bf16[16,32], index: 19, kind: output, shape index: {0}]   ;;  %s3867_s20 = inlined_call_operand.vmem [shape: bf16[16,32], index: 20, kind: output, shape index: {1}]  }
   0x1   :  { %3876 = sst [smem:[#allocation8_spill]] %s3847_s0 }
   0x2   :  { %3877 = sst [smem:[#allocation9_spill]] %s3848_s1  ;;  %s3400_s1 = smov 0  }
   0x3   :  { %3878 = sst [smem:[#allocation10_spill]] %s3849_s2 }
   0x4   :  { %3879 = sst [smem:[#allocation11_spill]] %s3850_s3 }
   0x5   :  { %3880 = sst [smem:[#allocation12_spill]] %s3851_s4 }
   0x6   :  { %3881 = sst [smem:[#allocation13_spill]] %s3852_s5 }
   0x7   :  { %3882 = sst [smem:[#allocation14_spill]] %s3853_s6 }
   0x8   :  { %3883 = sst [smem:[#allocation15_spill]] %s3854_s7 }
   0x9   :  { %3884 = sst [smem:[#allocation16_spill]] %s3858_s11 }
   0xa   :  { %3885 = sst [smem:[#allocation17_spill]] %s3860_s13 }
   0xb   :  { %3886 = sst [smem:[#allocation18_spill]] %s3865_s18 }
   0xc   :  { %3887 = sst [smem:[#allocation19_spill]] %s3866_s19 }
   0xd   :  { %3888 = sst [smem:[#allocation20_spill]] %s3867_s20 }
   0xe LB: > { %3889 = sst [smem:[#allocation3_spill]] %s3281_s1  ;;  %s3406_s22 = sadd.s32 4294967295, %s3281_s1   ;;  %s3281_s1 = sphi %s3400_s1, %s31_s1  }
   0xf   : > { %3890 = sst [smem:[#allocation4_spill]] %s3406_s22  ;;  %p2833_p0 = scmp.ge.s32.totalorder %s3281_s1, 1 }
  0x10   : > { %p701_p1 = scmp.lt.s32.totalorder %s3281_s1, 3 }
  0x12   : > { %p702_p2 = pnand %p2833_p0, %p701_p1 }
  0x14   : > { %705 = sbr.rel (%p702_p2) target bundleno = 4626 (0x1212), region = 96 }
  0x1b   : > { %p815_p3 = scmp.lt.s32.totalorder %s3406_s22, 1  ;;  %s3892_s4 = sld [smem:[#allocation9_spill]] }
  0x1c   : > { %s3893_s21 = sld [smem:[#allocation11_spill]]  ;;  %s3896_s5 = sld [smem:[#allocation13_spill]] }
  0x1d   : > { %s3412_s23 = scalar_select %p815_p3, %s3406_s22, 1 }
  0x1e   : > { %s3894_s22 = sld [smem:[#allocation12_spill]]  ;;  %s3898_s6 = sld [smem:[#allocation14_spill]] }
  0x1f   : > { %s2921_s24 = sshll.u32 %s3412_s23, 4  ;;  %s3899_s7 = sld [smem:[#allocation15_spill]] }
  0x20   : > { %s3901_s11 = sld [smem:[#allocation16_spill]]  ;;  %s3902_s13 = sld [smem:[#allocation17_spill]] }
  0x21   : > { %s3422_s29 = scalar_lea.vmem %s3892_s4, %s2921_s24  ;;  %s871_s27 = scalar_lea.vmem %s3862_s15, %s3412_s23 }
  0x22   : > { %s3427_s1 = scalar_lea.vmem %s3893_s21, %s2921_s24  ;;  %s3438_s3 = scalar_lea.vmem %s3896_s5, %s2921_s24 }
  0x23   : > { %3897 = sst [smem:[#allocation6_spill]] %s3438_s3  ;;  %s874_s2 = scalar_lea.vmem %s3863_s16, %s3412_s23 }
  0x24   : > { %s3433_s18 = scalar_lea.vmem %s3894_s22, %s3412_s23  ;;  %s3444_s4 = scalar_lea.vmem %s3898_s6, %s3412_s23 }
  0x25   : > { %3895 = sst [smem:[#allocation5_spill]] %s3433_s18  ;;  %s3449_s21 = scalar_lea.vmem %s3899_s7, %s2921_s24 }
  0x26   : > { %3900 = sst [smem:[#allocation7_spill]] %s3449_s21  ;;  %s3466_s6 = scalar_lea.vmem %s3901_s11, %s2921_s24 }
  0x27   : > { %s2926_s21 = sshll.u32 %s3412_s23, 6  ;;  %s877_s7 = scalar_lea.vmem %s3864_s17, %s3412_s23 }
  0x28   : > { %s3476_s20 = scalar_lea.vmem %s3902_s13, %s2926_s21  ;;  %s3903_s21 = sld [smem:[#allocation18_spill]] }
  0x29   : > { %s3904_s13 = sld [smem:[#allocation4_spill]] }
  0x2e   : > { %s880_s19 = scalar_lea.vmem %s3903_s21, %s3412_s23 }
  0x2f   : > { %p2846_p4 = scmp.ne.s32.totalorder %s3904_s13, 0 }
  0x30   : > { %s3905_s5 = sld [smem:[#allocation8_spill]] (!%p2846_p4)  ;;  %vm888_vm0 = vcmask (!%p2846_p4), 261120  }
  0x31   : > { %885 = sbr.rel (%p2846_p4) target bundleno = 56 (0x38), region = 100 }
  0x36   : > { %v886_v0 = vld [vmem:[%s3905_s5] sm:$0xff] (!%p2846_p4)  ;;  %v887_v1 = vld [vmem:[%s3905_s5 + $0x8] sm:$0xff] (!%p2846_p4) }
  0x37   : > { %889 = vst.msk [vmem:[#allocation2] sm:$0xff] (!%p2846_p4), %vm888_vm0, %v886_v0  ;;  %890 = vst.msk [vmem:[#allocation2 + $0x8] sm:$0xff] (!%p2846_p4), %vm888_vm0, %v887_v1 }
  0x38 PF: > { %s3906_s11 = sld [smem:[#allocation4_spill]] }
  0x3e   : > { %v3505_v2 = vld [vmem:[#allocation2] sm:$0xff]  ;;  %v3507_v3 = vld [vmem:[#allocation2 + $0x8] sm:$0xff]  ;;  %p2847_p5 = scmp.ge.s32.totalorder %s3906_s11, 1 }
  0x3f   : > { %v3209_v4 = vld [vmem:[%s3422_s29] sm:$0xff] (!%p2847_p5)   ;;  %v3283_v5 = vmov (!%p2847_p5), 0.0   ;;  %v3210_v6 = vld [vmem:[%s3422_s29 + $0x8] sm:$0xff] (!%p2847_p5)   ;;  %vm3284_vm1 = vmmov (!%p2847_p5), 0   ;;  %s3907_s13 = sld [smem:[#allocation6_spill]] (!%p2847_p5)  ;;  %vm936_vm2 = vcmask (!%p2847_p5), 261120   ;;  %v917_v8 = vpack.c.bf16 (!%p2847_p5), %v3507_v3, %v3505_v2  ;;  %s3912_s24 = scalar_lea.vmem (!%p2847_p5), %s3855_s8, %s3412_s23 }
  0x40   : > { %896 = sbr.rel (%p2847_p5) target bundleno = 4386 (0x1122), region = 104  ;;  %3000 = vmatprep.subr.bf16.mxu0 (!%p2847_p5), %v3283_v5  ;;  %3024 = vmatprep.subr.bf16.mxu1 (!%p2847_p5), %v3283_v5  ;;  %v3211_v7 = vld [vmem:[%s3427_s1] sm:$0xff] (!%p2847_p5)   ;;  %v3212_v9 = vld [vmem:[%s3427_s1 + $0x8] sm:$0xff] (!%p2847_p5)   ;;  %s3908_s29 = sld [smem:[#allocation5_spill]] (!%p2847_p5)  ;;  %vm1119_vm3 = vcmp.ne.f32.partialorder (!%p2847_p5), %v3505_v2, 0.0  ;;  %vm1120_vm4 = vcmp.ne.f32.partialorder (!%p2847_p5), %v3507_v3, 0.0  ;;  %v1141_v48 = vlaneseq (!%p2847_p5) }
  0x41   : > { %3001 = vmatpush3.bf16.msra.mxu0 (!%p2847_p5), %v3209_v4  ;;  %3004 = vmatprep.mubr.msk.bf16.mxu0 (!%p2847_p5), %vm3284_vm1, %v3283_v5  ;;  %v3285_v12 = vmov (!%p2847_p5), 0   ;;  %s3909_s30 = sld [smem:[#allocation10_spill]] (!%p2847_p5)  ;;  %vm1175_vm5 = vcmask (!%p2847_p5), 64512   ;;  %v2856_v38 = vld [vmem:[%s3444_s4] ss:$0 sm:$0xff] (!%p2847_p5)  ;;  %vm1295_vm6 = vcmask (!%p2847_p5), 1043456  }
  0x42   : > { %3002 = vmatprep.subr.bf16.mxu0 (!%p2847_p5), %v3283_v5  ;;  %3026 = vmatprep.mubr.msk.bf16.mxu1 (!%p2847_p5), %vm3284_vm1, %v3283_v5  ;;  %v1121_v13 = vsel (!%p2847_p5), %vm1119_vm3, 1, %v3285_v12  ;;  %v1122_v14 = vsel (!%p2847_p5), %vm1120_vm4, 1, %v3285_v12  ;;  %v1142_v49 = vand.u32 (!%p2847_p5), 127, %v1141_v48  ;;  %v1144_v50 = vshrl.u32 (!%p2847_p5), %v1141_v48, 7  ;;  %s3287_s26 = smov (!%p2847_p5), 120   ;;  %s3288_s21 = smov (!%p2847_p5), 112  }
  0x43   : > { %3192 = vset.pattern.permute.xlu0 (!%p2847_p5), %v3285_v12  ;;  %3193 = vset.pattern.permute.xlu1 (!%p2847_p5), %v3285_v12  ;;  %v3286_v58 = vmov (!%p2847_p5), -1e+30   ;;  %s3289_s18 = smov (!%p2847_p5), 104   ;;  %s3290_s22 = smov (!%p2847_p5), 8   ;;  %vm2071_vm13 = vcmask (!%p2847_p5), 130048   ;;  %vm2074_vm14 = vcmask (!%p2847_p5), 195584  }
  0x44   : > { %1136 = vperm.xlu0 (!%p2847_p5), %3192, %v1121_v13   ;;  %1124 = vperm.xlu1 (!%p2847_p5), %3193, %v1121_v13   ;;  %v1145_v52 = vsub.s32 (!%p2847_p5), %v1142_v49, %v1144_v50  ;;  %s3291_s3 = smov (!%p2847_p5), 16   ;;  %s3911_s25 = sld [smem:[#allocation7_spill]] (!%p2847_p5) }
  0x45   : > { %3003 = vmatpush3.bf16.msra.mxu0 (!%p2847_p5), %v3210_v6  ;;  %v3213_v10 = vld [vmem:[%s3907_s13] sm:$0xff] (!%p2847_p5)   ;;  %v3214_v11 = vld [vmem:[%s3907_s13 + $0x8] sm:$0xff] (!%p2847_p5)   ;;  %s3292_s11 = smov (!%p2847_p5), 24  }
  0x46   : > { %3008 = vmatprep.subr.bf16.mxu0 (!%p2847_p5), %v3283_v5  ;;  %v2852_v19 = vld [vmem:[%s3908_s29] ss:$0 sm:$0xff] (!%p2847_p5) }
  0x47   : > { %s3910_s0 = scalar_lea.vmem %s3909_s30, %s3412_s23  ;;  %s3913_s30 = scalar_lea.vmem %s3856_s9, %s3412_s23 }
  0x48   : > { %3005 = vmatmul.mubr.msk.bf16.vlgmr.msra.gmra.mrb[0].mxu0 %vm936_vm2, %v917_v8  ;;  %1139 = vperm.xlu0 %3192, %v1122_v14   ;;  %v2848_v20 = vld [vmem:[%s3910_s0] ss:$0 sm:$0xff] }
  0x49   : > { %3009 = vmatpush3.bf16.msra.mxu0 %v3211_v7  ;;  %3012 = vmatprep.mubr.msk.bf16.mxu0 %vm3284_vm1, %v3283_v5 }
  0x4a   : > { %3010 = vmatprep.subr.bf16.mxu0 %v3283_v5  ;;  %1127 = vperm.xlu1 %3193, %v1122_v14  }
  0x4d   : > { %3011 = vmatpush3.bf16.msra.mxu0 %v3212_v9 }
  0x4e   : > { %3016 = vmatprep.subr.bf16.mxu0 %v3283_v5 }
  0x50   : > { %3013 = vmatmul.mubr.msk.bf16.vlgmr.msra.gmra.mrb[4].mxu0 %vm936_vm2, %v917_v8 }
  0x51   : > { %3020 = vmatprep.mubr.msk.bf16.mxu0 %vm3284_vm1, %v3283_v5  ;;  %3017 = vmatpush3.bf16.msra.mxu0 %v3213_v10 }
  0x52   : > { %3018 = vmatprep.subr.bf16.mxu0 %v3283_v5 }
  0x55   : > { %3019 = vmatpush3.bf16.msra.mxu0 %v3214_v11 }
  0x56   : > { %3030 = vmatprep.subr.bf16.mxu0 %v3283_v5 }
  0x58   : > { %3021 = vmatmul.mubr.msk.bf16.vlgmr.msra.gmra.mrb[8].mxu0 %vm936_vm2, %v917_v8 }
  0x59   : > { %3032 = vmatprep.mubr.msk.bf16.mxu0 %vm3284_vm1, %v3283_v5 }
  0xc3   : > { %v1137_v51 = vpop.permute.xlu0 %1136  ;;  %v1125_v53 = vpop.permute.xlu1 %1124 }
  0xc4   : > { %v1146_v54 = vrot.slane %v1137_v51, %v1145_v52  ;;  %vm1129_vm8 = vcmp.eq.s32.totalorder %v1125_v53, 1 }
  0xc6   : > { %vm1169_vm7 = vcmp.ne.s32.totalorder %v1146_v54, 0 }
  0xc7   : > { %v1140_v55 = vpop.permute.xlu0 %1139  ;;  %vm1171_vm9 = vmand %vm1129_vm8, %vm1169_vm7 }
  0xc8   : > { %v1150_v56 = vrot.slane %v1140_v55, %v1145_v52  ;;  %v3580_v59 = vsel %vm1171_vm9, 0.0, %v3286_v58 }
  0xc9   : > { %v1128_v57 = vpop.permute.xlu1 %1127 }
  0xca   : > { %vm1170_vm10 = vcmp.ne.s32.totalorder %v1150_v56, 0  ;;  %vm1130_vm11 = vcmp.eq.s32.totalorder %v1128_v57, 1 }
  0xcb   : > { %vm1172_vm12 = vmand %vm1130_vm11, %vm1170_vm10 }
  0xcc   : > { %v3583_v63 = vsel %vm1172_vm12, 0.0, %v3286_v58 }
 0x11b   : > { %v974_v15 = vpop.f32.mrb[0].mxu0 }
 0x11c   : > { %v3006_v16 = vpop.f32.mrb[1].mxu0  ;;  %v975_v25 = vadd.f32 %v2848_v20, %v974_v15 }
 0x11d   : > { %v977_v17 = vpop.f32.mrb[2].mxu0 }
 0x11e   : > { %v3007_v18 = vpop.f32.mrb[3].mxu0  ;;  %v978_v29 = vadd.f32 %v2848_v20, %v977_v17  ;;  %v981_v32 = vmul.f32 0.35355338, %v975_v25 }
 0x120   : > { %v982_v34 = vmul.f32 0.35355338, %v978_v29  ;;  %v3557_v35 = vpack.c.bf16 %v981_v32, %v981_v32 }
 0x122   : > { %v3559_v36 = vpack.c.bf16 %v982_v34, %v982_v34 }
 0x123   : > { %v1035_v21 = vpop.f32.mrb[4].mxu0 }
 0x124   : > { %v1036_v22 = vadd.f32 %v2852_v19, %v1035_v21  ;;  %v3014_v23 = vpop.f32.mrb[5].mxu0 }
 0x125   : > { %v1038_v24 = vpop.f32.mrb[6].mxu0 }
 0x126   : > { %v3547_v26 = vpack.c.bf16 %v1036_v22, %v1036_v22  ;;  %v1039_v27 = vadd.f32 %v2852_v19, %v1038_v24  ;;  %v3015_v28 = vpop.f32.mrb[7].mxu0 }
 0x128   : > { %v3549_v30 = vpack.c.bf16 %v1039_v27, %v1039_v27  ;;  %v1180_v31 = vsel %vm1175_vm5, %v3547_v26, 0 }
 0x129   : > { %3025 = vmatpush3.bf16.xpose.msra.mxu1 %v1180_v31 }
 0x12a   : > { %v1226_v33 = vsel %vm1175_vm5, %v3549_v30, 0  ;;  %3036 = vmatprep.subr.bf16.mxu1 %v3283_v5 }
 0x12b   : > { %3031 = vmatpush3.bf16.xpose.msra.mxu0 %v1226_v33  ;;  %v1094_v37 = vpop.f32.mrb[8].mxu0 }
 0x12c   : > { %3042 = vmatprep.subr.bf16.mxu0 %v3283_v5  ;;  %v3022_v39 = vpop.f32.mrb[9].mxu0  ;;  %v1095_v42 = vadd.f32 %v2856_v38, %v1094_v37 }
 0x12d   : > { %v1097_v40 = vpop.f32.mrb[10].mxu0 }
 0x12e   : > { %v3023_v41 = vpop.f32.mrb[11].mxu0  ;;  %v1098_v43 = vadd.f32 %v2856_v38, %v1097_v40  ;;  %v3570_v44 = vpack.c.bf16 %v1095_v42, %v1095_v42 }
 0x130   : > { %3027 = vmatmul.mubr.msk.bf16.vlgmr.msra.gmra.mrb[0].mxu1 %vm1175_vm5, %v3557_v35  ;;  %v3572_v45 = vpack.c.bf16 %v1098_v43, %v1098_v43  ;;  %v1297_v46 = vsel %vm1295_vm6, %v3570_v44, 0 }
 0x131   : > { %3038 = vmatprep.mubr.msk.bf16.mxu1 %vm3284_vm1, %v3283_v5  ;;  %3037 = vmatpush3.bf16.msra.mxu1 %v1297_v46 }
 0x132   : > { %3033 = vmatmul.mubr.msk.bf16.vlgmr.msra.gmra.mrb[12].mxu0 %vm1175_vm5, %v3559_v36  ;;  %v1343_v47 = vsel %vm1295_vm6, %v3572_v45, 0  ;;  %3048 = vmatprep.subr.bf16.mxu1 %v3283_v5 }
 0x133   : > { %3044 = vmatprep.mubr.msk.bf16.mxu0 %vm3284_vm1, %v3283_v5  ;;  %3043 = vmatpush3.bf16.msra.mxu0 %v1343_v47 }
 0x134   : > { %3054 = vmatprep.subr.bf16.mxu0 %v3283_v5 }
 0x203   : > { %v1216_v60 = vpop.f32.mrb[0].mxu1 }
 0x204   : > { %v1217_v61 = vadd.f32 %v1216_v60, %v3580_v59  ;;  %v3028_v62 = vpop.f32.mrb[1].mxu1 }
 0x205   : > { %v1219_v0 = vpop.f32.mrb[2].mxu1  ;;  %v1262_v1 = vpop.f32.mrb[12].mxu0 }
 0x206   : > { %v1263_v4 = vadd.f32 %v1262_v1, %v3583_v63  ;;  %v3029_v6 = vpop.f32.mrb[3].mxu1  ;;  %v3034_v7 = vpop.f32.mrb[13].mxu0  ;;  %v1268_v8 = vsel %vm1175_vm5, %v1217_v61, -inf }
 0x207   : > { %1269 = vmax.xlane.f32.xlu0 %v1268_v8  ;;  %v1265_v9 = vpop.f32.mrb[14].mxu0 }
 0x208   : > { %v3035_v10 = vpop.f32.mrb[15].mxu0  ;;  %v1271_v11 = vsel %vm1175_vm5, %v1263_v4, -inf }
 0x209   : > { %1272 = vmax.xlane.f32.xlu1 %v1271_v11 }
 0x21a   : > { %1387 = vrot.lane.b32.xlu1 %v3547_v26, %s3287_s26 }
 0x21e   : > { %1385 = vrot.lane.b32.xlu1 %v3557_v35, %s3287_s26 }
 0x222   : > { %1435 = vrot.lane.b32.xlu1 %v3559_v36, %s3287_s26 }
 0x294   : > { %v1270_v12 = vpop.xlane.xlu0 %1269 }
 0x295   : > { %v1274_v13 = vsub.f32 %v1217_v61, %v1270_v12 }
 0x296   : > { %v1273_v14 = vpop.xlane.xlu1 %1272 }
 0x297   : > { %v1276_v15 = vmul.f32 1.442695, %v1274_v13  ;;  %v1275_v16 = vsub.f32 %v1263_v4, %v1273_v14 }
 0x299   : > { %3227 = vpow2.f32 %v1276_v15  ;;  %v1278_v17 = vmul.f32 1.442695, %v1275_v16 }
 0x29a   : > { %v1388_v27 = vpop.permute.xlu1 %1387 }
 0x29b   : > { %3229 = vpow2.f32 %v1278_v17  ;;  %v1393_v31 = vsel %vm1175_vm5, %v1388_v27, 0 }
 0x29e   : > { %v1386_v38 = vpop.permute.xlu1 %1385 }
 0x2a2   : > { %v1436_v39 = vpop.permute.xlu1 %1435 }
 0x2a3   : > { %v3228_v18 = vpop.eup %3227 }
 0x2a4   : > { %v1280_v19 = vsel %vm1175_vm5, %v3228_v18, 0.0 }
 0x2a5   : > { %v3230_v20 = vpop.eup %3229  ;;  %1281 = vadd.xlane.f32.xlu0 %v1280_v19 }
 0x2a6   : > { %v1283_v21 = vsel %vm1175_vm5, %v3230_v20, 0.0 }
 0x2a9   : > { %1284 = vadd.xlane.f32.xlu0 %v1283_v21 }
 0x2bf   : > { %1437 = vrot.lane.b32.xlu0 %v3549_v30, %s3287_s26 }
 0x332   : > { %v1282_v22 = vpop.xlane.xlu0 %1281 }
 0x333   : > { %3231 = vrcp.f32 %v1282_v22 }
 0x336   : > { %v1285_v23 = vpop.xlane.xlu0 %1284 }
 0x337   : > { %3233 = vrcp.f32 %v1285_v23 }
 0x33a   : > { %v1438_v33 = vpop.permute.xlu0 %1437 }
 0x33b   : > { %v1443_v37 = vsel %vm1175_vm5, %v1438_v33, 0 }
 0x33d   : > { %v3232_v24 = vpop.eup %3231 }
 0x33e   : > { %v1288_v25 = vmul.f32 %v3232_v24, %v3228_v18 }
 0x340   : > { %v1290_v28 = vpack.c.bf16 %v1288_v25, %v1288_v25 }
 0x341   : > { %v3234_v29 = vpop.eup %3233 }
 0x342   : > { %v1289_v32 = vmul.f32 %v3234_v29, %v3230_v20  ;;  %3039 = vmatmul.mubr.msk.bf16.vlgmr.msra.gmra.mrb[4].mxu1 %vm1175_vm5, %v1290_v28 }
 0x343   : > { %3049 = vmatpush3.bf16.xpose.msra.mxu1 %v1393_v31  ;;  %3050 = vmatprep.mubr.msk.bf16.mxu1 %vm3284_vm1, %v3283_v5 }
 0x344   : > { %v1291_v34 = vpack.c.bf16 %v1289_v32, %v1289_v32  ;;  %3060 = vmatprep.subr.bf16.mxu1 %v3283_v5 }
 0x346   : > { %3045 = vmatmul.mubr.msk.bf16.vlgmr.msra.gmra.mrb[16].mxu0 %vm1175_vm5, %v1291_v34 }
 0x347   : > { %3055 = vmatpush3.bf16.xpose.msra.mxu0 %v1443_v37  ;;  %3056 = vmatprep.mubr.msk.bf16.mxu0 %vm3284_vm1, %v3283_v5 }
 0x348   : > { %3066 = vmatprep.subr.bf16.mxu0 %v3283_v5 }
 0x34a   : > { %3051 = vmatmul.mubr.msk.bf16.vlgmr.msra.gmra.mrb[8].mxu1 %vm1175_vm5, %v1386_v38 }
 0x34b   : > { %3062 = vmatprep.mubr.msk.bf16.mxu1 %vm3284_vm1, %v3283_v5 }
 0x34e   : > { %3057 = vmatmul.mubr.msk.bf16.vlgmr.msra.gmra.mrb[20].mxu0 %vm1175_vm5, %v1436_v39 }
 0x34f   : > { %3068 = vmatprep.mubr.msk.bf16.mxu0 %vm3284_vm1, %v3283_v5 }
 0x415   : > { %v3614_v40 = vpop.f32.mrb[4].mxu1 }
 0x416   : > { %v3040_v41 = vpop.f32.mrb[5].mxu1 }
 0x417   : > { %v1336_v42 = vpop.f32.mrb[6].mxu1 }
 0x418   : > { %v3041_v43 = vpop.f32.mrb[7].mxu1 }
 0x419   : > { %v3616_v46 = vpop.f32.mrb[16].mxu0 }
 0x41a   : > { %v3046_v47 = vpop.f32.mrb[17].mxu0 }
 0x41b   : > { %v1382_v48 = vpop.f32.mrb[18].mxu0 }
 0x41c   : > { %v3047_v49 = vpop.f32.mrb[19].mxu0 }
 0x41d   : > { %v1429_v50 = vpop.f32.mrb[8].mxu1 }
 0x41e   : > { %v1430_v51 = vadd.f32 %v1429_v50, %v3580_v59  ;;  %v3052_v52 = vpop.f32.mrb[9].mxu1 }
 0x41f   : > { %v1432_v53 = vpop.f32.mrb[10].mxu1 }
 0x420   : > { %v3053_v54 = vpop.f32.mrb[11].mxu1  ;;  %v1485_v55 = vsel %vm1175_vm5, %v1430_v51, -inf }
 0x421   : > { %1486 = vmax.xlane.f32.xlu0 %v1485_v55  ;;  %v1479_v56 = vpop.f32.mrb[20].mxu0 }
 0x422   : > { %v1480_v57 = vadd.f32 %v1479_v56, %v3583_v63  ;;  %v3058_v58 = vpop.f32.mrb[21].mxu0 }
 0x423   : > { %v1482_v60 = vpop.f32.mrb[22].mxu0 }
 0x424   : > { %v3059_v61 = vpop.f32.mrb[23].mxu0  ;;  %v1488_v62 = vsel %vm1175_vm5, %v1480_v57, -inf }
 0x425   : > { %1489 = vmax.xlane.f32.xlu1 %v1488_v62 }
 0x436   : > { %1509 = vrot.lane.b32.xlu1 %v3570_v44, %s3287_s26 }
 0x43a   : > { %1607 = vrot.lane.b32.xlu1 %v3547_v26, %s3288_s21 }
 0x43e   : > { %1657 = vrot.lane.b32.xlu1 %v3549_v30, %s3288_s21 }
 0x442   : > { %1655 = vrot.lane.b32.xlu1 %v3559_v36, %s3288_s21 }
 0x4ae   : > { %v1487_v0 = vpop.xlane.xlu0 %1486 }
 0x4af   : > { %v1491_v1 = vsub.f32 %v1430_v51, %v1487_v0 }
 0x4b1   : > { %v1493_v4 = vmul.f32 1.442695, %v1491_v1 }
 0x4b2   : > { %v1490_v6 = vpop.xlane.xlu1 %1489 }
 0x4b3   : > { %3235 = vpow2.f32 %v1493_v4  ;;  %v1492_v7 = vsub.f32 %v1480_v57, %v1490_v6 }
 0x4b5   : > { %v1495_v8 = vmul.f32 1.442695, %v1492_v7 }
 0x4b6   : > { %v1510_v9 = vpop.permute.xlu1 %1509 }
 0x4b7   : > { %3237 = vpow2.f32 %v1495_v8  ;;  %v1515_v10 = vsel %vm1295_vm6, %v1510_v9, 0 }
 0x4b8   : > { %3061 = vmatpush3.bf16.msra.mxu1 %v1515_v10 }
 0x4b9   : > { %3072 = vmatprep.subr.bf16.mxu1 %v3283_v5 }
 0x4ba   : > { %v1608_v20 = vpop.permute.xlu1 %1607 }
 0x4bb   : > { %v1613_v24 = vsel %vm1175_vm5, %v1608_v20, 0 }
 0x4bd   : > { %v3236_v11 = vpop.eup %3235 }
 0x4be   : > { %v1497_v12 = vsel %vm1175_vm5, %v3236_v11, 0.0  ;;  %v1658_v27 = vpop.permute.xlu1 %1657 }
 0x4bf   : > { %1498 = vadd.xlane.f32.xlu0 %v1497_v12  ;;  %v1663_v29 = vsel %vm1175_vm5, %v1658_v27, 0 }
 0x4c1   : > { %v3238_v13 = vpop.eup %3237 }
 0x4c2   : > { %v1500_v14 = vsel %vm1175_vm5, %v3238_v13, 0.0  ;;  %v1656_v32 = vpop.permute.xlu1 %1655 }
 0x4c3   : > { %1501 = vadd.xlane.f32.xlu0 %v1500_v14 }
 0x4d9   : > { %1557 = vrot.lane.b32.xlu0 %v3572_v45, %s3287_s26 }
 0x4dd   : > { %1605 = vrot.lane.b32.xlu0 %v3557_v35, %s3288_s21 }
 0x54c   : > { %v1499_v15 = vpop.xlane.xlu0 %1498 }
 0x54d   : > { %3239 = vrcp.f32 %v1499_v15 }
 0x550   : > { %v1502_v16 = vpop.xlane.xlu0 %1501 }
 0x551   : > { %3241 = vrcp.f32 %v1502_v16 }
 0x554   : > { %v1558_v17 = vpop.permute.xlu0 %1557 }
 0x555   : > { %v1563_v18 = vsel %vm1295_vm6, %v1558_v17, 0 }
 0x556   : > { %3067 = vmatpush3.bf16.msra.mxu0 %v1563_v18 }
 0x557   : > { %v3240_v19 = vpop.eup %3239  ;;  %3078 = vmatprep.subr.bf16.mxu0 %v3283_v5 }
 0x558   : > { %v1505_v21 = vmul.f32 %v3240_v19, %v3236_v11  ;;  %v1606_v31 = vpop.permute.xlu0 %1605 }
 0x55a   : > { %v1507_v22 = vpack.c.bf16 %v1505_v21, %v1505_v21 }
 0x55b   : > { %v3242_v23 = vpop.eup %3241 }
 0x55c   : > { %v1506_v25 = vmul.f32 %v3242_v23, %v3238_v13  ;;  %3063 = vmatmul.mubr.msk.bf16.vlgmr.msra.gmra.mrb[12].mxu1 %vm1175_vm5, %v1507_v22 }
 0x55d   : > { %3073 = vmatpush3.bf16.xpose.msra.mxu1 %v1613_v24  ;;  %3074 = vmatprep.mubr.msk.bf16.mxu1 %vm3284_vm1, %v3283_v5 }
 0x55e   : > { %v1508_v28 = vpack.c.bf16 %v1506_v25, %v1506_v25  ;;  %3084 = vmatprep.subr.bf16.mxu1 %v3283_v5 }
 0x560   : > { %3069 = vmatmul.mubr.msk.bf16.vlgmr.msra.gmra.mrb[24].mxu0 %vm1175_vm5, %v1508_v28 }
 0x561   : > { %3079 = vmatpush3.bf16.xpose.msra.mxu0 %v1663_v29  ;;  %3080 = vmatprep.mubr.msk.bf16.mxu0 %vm3284_vm1, %v3283_v5 }
 0x562   : > { %3090 = vmatprep.subr.bf16.mxu0 %v3283_v5 }
 0x564   : > { %3075 = vmatmul.mubr.msk.bf16.vlgmr.msra.gmra.mrb[16].mxu1 %vm1175_vm5, %v1606_v31 }
 0x565   : > { %3086 = vmatprep.mubr.msk.bf16.mxu1 %vm3284_vm1, %v3283_v5 }
 0x568   : > { %3081 = vmatmul.mubr.msk.bf16.vlgmr.msra.gmra.mrb[28].mxu0 %vm1175_vm5, %v1656_v32 }
 0x569   : > { %3092 = vmatprep.mubr.msk.bf16.mxu0 %vm3284_vm1, %v3283_v5 }
 0x62f   : > { %v3656_v33 = vpop.f32.mrb[12].mxu1 }
 0x630   : > { %v3064_v34 = vpop.f32.mrb[13].mxu1 }
 0x631   : > { %v1554_v37 = vpop.f32.mrb[14].mxu1 }
 0x632   : > { %v3065_v38 = vpop.f32.mrb[15].mxu1 }
 0x633   : > { %v3658_v39 = vpop.f32.mrb[24].mxu0 }
 0x634   : > { %v3194_v41 = vpack.i.bf16 %v3658_v39, %v3656_v33  ;;  %v3070_v42 = vpop.f32.mrb[25].mxu0 }
 0x635   : > { %v1602_v43 = vpop.f32.mrb[26].mxu0 }
 0x636   : > { %v3071_v47 = vpop.f32.mrb[27].mxu0 }
 0x637   : > { %v1649_v48 = vpop.f32.mrb[16].mxu1 }
 0x638   : > { %v1650_v49 = vadd.f32 %v1649_v48, %v3580_v59  ;;  %v3076_v50 = vpop.f32.mrb[17].mxu1 }
 0x639   : > { %v1652_v51 = vpop.f32.mrb[18].mxu1 }
 0x63a   : > { %v3077_v52 = vpop.f32.mrb[19].mxu1  ;;  %v1705_v53 = vsel %vm1175_vm5, %v1650_v49, -inf }
 0x63b   : > { %1706 = vmax.xlane.f32.xlu0 %v1705_v53  ;;  %v1699_v54 = vpop.f32.mrb[28].mxu0 }
 0x63c   : > { %v1700_v55 = vadd.f32 %v1699_v54, %v3583_v63  ;;  %v3082_v56 = vpop.f32.mrb[29].mxu0 }
 0x63d   : > { %v1702_v57 = vpop.f32.mrb[30].mxu0 }
 0x63e   : > { %v3083_v58 = vpop.f32.mrb[31].mxu0  ;;  %v1708_v60 = vsel %vm1175_vm5, %v1700_v55, -inf }
 0x63f   : > { %1709 = vmax.xlane.f32.xlu1 %v1708_v60 }
 0x650   : > { %1729 = vrot.lane.b32.xlu1 %v3570_v44, %s3288_s21 }
 0x654   : > { %1827 = vrot.lane.b32.xlu1 %v3547_v26, %s3289_s18 }
 0x658   : > { %1877 = vrot.lane.b32.xlu1 %v3549_v30, %s3289_s18 }
 0x65c   : > { %1875 = vrot.lane.b32.xlu1 %v3559_v36, %s3289_s18 }
 0x6c8   : > { %v1707_v61 = vpop.xlane.xlu0 %1706 }
 0x6c9   : > { %v1711_v62 = vsub.f32 %v1650_v49, %v1707_v61 }
 0x6cb   : > { %v1713_v0 = vmul.f32 1.442695, %v1711_v62 }
 0x6cc   : > { %v1710_v1 = vpop.xlane.xlu1 %1709 }
 0x6cd   : > { %3243 = vpow2.f32 %v1713_v0  ;;  %v1712_v4 = vsub.f32 %v1700_v55, %v1710_v1 }
 0x6cf   : > { %v1715_v6 = vmul.f32 1.442695, %v1712_v4 }
 0x6d0   : > { %v1730_v7 = vpop.permute.xlu1 %1729 }
 0x6d1   : > { %3245 = vpow2.f32 %v1715_v6  ;;  %v1735_v8 = vsel %vm1295_vm6, %v1730_v7, 0 }
 0x6d2   : > { %3085 = vmatpush3.bf16.msra.mxu1 %v1735_v8 }
 0x6d3   : > { %3096 = vmatprep.subr.bf16.mxu1 %v3283_v5 }
 0x6d4   : > { %v1828_v15 = vpop.permute.xlu1 %1827 }
 0x6d5   : > { %v1833_v19 = vsel %vm1175_vm5, %v1828_v15, 0 }
 0x6d7   : > { %v3244_v26 = vpop.eup %3243 }
 0x6d8   : > { %v1717_v30 = vsel %vm1175_vm5, %v3244_v26, 0.0 }
 0x6d9   : > { %1718 = vadd.xlane.f32.xlu0 %v1717_v30 }
 0x6db   : > { %v3246_v9 = vpop.eup %3245 }
 0x6dc   : > { %v1720_v36 = vsel %vm1175_vm5, %v3246_v9, 0.0 }
 0x6dd   : > { %1721 = vadd.xlane.f32.xlu0 %v1720_v36 }
 0x6f3   : > { %1777 = vrot.lane.b32.xlu0 %v3572_v45, %s3288_s21  ;;  %s3914_s21 = scalar_lea.vmem %s3857_s10, %s3412_s23 }
 0x6f7   : > { %1825 = vrot.lane.b32.xlu0 %v3557_v35, %s3289_s18  ;;  %v1878_v35 = vpop.permute.xlu1 %1877 }
 0x6f8   : > { %v1883_v22 = vsel %vm1175_vm5, %v1878_v35, 0 }
 0x6fb   : > { %v1876_v24 = vpop.permute.xlu1 %1875 }
 0x766   : > { %v1719_v10 = vpop.xlane.xlu0 %1718 }
 0x767   : > { %3247 = vrcp.f32 %v1719_v10  ;;  %v3215_v10 = vld [vmem:[%s3911_s25] sm:$0xff]  }
 0x76a   : > { %v1722_v11 = vpop.xlane.xlu0 %1721 }
 0x76b   : > { %3249 = vrcp.f32 %v1722_v11  ;;  %v3216_v11 = vld [vmem:[%s3911_s25 + $0x8] sm:$0xff]  }
 0x76e   : > { %v1778_v12 = vpop.permute.xlu0 %1777 }
 0x76f   : > { %v1783_v13 = vsel %vm1295_vm6, %v1778_v12, 0 }
 0x770   : > { %3091 = vmatpush3.bf16.msra.mxu0 %v1783_v13 }
 0x771   : > { %v3248_v14 = vpop.eup %3247  ;;  %3102 = vmatprep.subr.bf16.mxu0 %v3283_v5 }
 0x772   : > { %v1725_v16 = vmul.f32 %v3248_v14, %v3244_v26  ;;  %v1826_v23 = vpop.permute.xlu0 %1825 }
 0x774   : > { %v1727_v17 = vpack.c.bf16 %v1725_v16, %v1725_v16 }
 0x775   : > { %v3250_v18 = vpop.eup %3249 }
 0x776   : > { %v1726_v20 = vmul.f32 %v3250_v18, %v3246_v9  ;;  %3087 = vmatmul.mubr.msk.bf16.vlgmr.msra.gmra.mrb[20].mxu1 %vm1175_vm5, %v1727_v17 }
 0x777   : > { %3097 = vmatpush3.bf16.xpose.msra.mxu1 %v1833_v19  ;;  %3098 = vmatprep.mubr.msk.bf16.mxu1 %vm3284_vm1, %v3283_v5 }
 0x778   : > { %v1728_v21 = vpack.c.bf16 %v1726_v20, %v1726_v20  ;;  %3108 = vmatprep.subr.bf16.mxu1 %v3283_v5 }
 0x77a   : > { %3093 = vmatmul.mubr.msk.bf16.vlgmr.msra.gmra.mrb[32].mxu0 %vm1175_vm5, %v1728_v21 }
 0x77b   : > { %3103 = vmatpush3.bf16.xpose.msra.mxu0 %v1883_v22  ;;  %3104 = vmatprep.mubr.msk.bf16.mxu0 %vm3284_vm1, %v3283_v5 }
 0x77c   : > { %3114 = vmatprep.subr.bf16.mxu0 %v3283_v5 }
 0x77e   : > { %3099 = vmatmul.mubr.msk.bf16.vlgmr.msra.gmra.mrb[24].mxu1 %vm1175_vm5, %v1826_v23 }
 0x77f   : > { %3110 = vmatprep.mubr.msk.bf16.mxu1 %vm3284_vm1, %v3283_v5 }
 0x782   : > { %3105 = vmatmul.mubr.msk.bf16.vlgmr.msra.gmra.mrb[36].mxu0 %vm1175_vm5, %v1876_v24 }
 0x783   : > { %3116 = vmatprep.mubr.msk.bf16.mxu0 %vm3284_vm1, %v3283_v5 }
 0x849   : > { %v1771_v25 = vpop.f32.mrb[20].mxu1 }
 0x84a   : > { %v3088_v27 = vpop.f32.mrb[21].mxu1 }
 0x84b   : > { %v1774_v28 = vpop.f32.mrb[22].mxu1 }
 0x84c   : > { %v3089_v29 = vpop.f32.mrb[23].mxu1 }
 0x84d   : > { %v1819_v31 = vpop.f32.mrb[32].mxu0 }
 0x84e   : > { %v3199_v32 = vpack.i.bf16 %v1819_v31, %v1771_v25  ;;  %v3094_v34 = vpop.f32.mrb[33].mxu0 }
 0x84f   : > { %v1822_v37 = vpop.f32.mrb[34].mxu0 }
 0x850   : > { %v3095_v38 = vpop.f32.mrb[35].mxu0 }
 0x851   : > { %v1869_v42 = vpop.f32.mrb[24].mxu1 }
 0x852   : > { %v1870_v43 = vadd.f32 %v1869_v42, %v3580_v59  ;;  %v3100_v47 = vpop.f32.mrb[25].mxu1 }
 0x853   : > { %v1872_v48 = vpop.f32.mrb[26].mxu1 }
 0x854   : > { %v3101_v49 = vpop.f32.mrb[27].mxu1  ;;  %v1925_v50 = vsel %vm1175_vm5, %v1870_v43, -inf }
 0x855   : > { %1926 = vmax.xlane.f32.xlu0 %v1925_v50  ;;  %v1919_v51 = vpop.f32.mrb[36].mxu0 }
 0x856   : > { %v1920_v52 = vadd.f32 %v1919_v51, %v3583_v63  ;;  %v3106_v53 = vpop.f32.mrb[37].mxu0 }
 0x857   : > { %v1922_v54 = vpop.f32.mrb[38].mxu0 }
 0x858   : > { %v3107_v55 = vpop.f32.mrb[39].mxu0  ;;  %v1928_v56 = vsel %vm1175_vm5, %v1920_v52, -inf }
 0x859   : > { %1929 = vmax.xlane.f32.xlu1 %v1928_v56 }
 0x86a   : > { %1949 = vrot.lane.b32.xlu1 %v3570_v44, %s3289_s18 }
 0x86e   : > { %3195 = vrot.lane.b32.xlu1 %v3194_v41, %s3290_s22 }
 0x872   : > { %3200 = vrot.lane.b32.xlu1 %v3199_v32, %s3291_s3  ;;  %s3915_s3 = scalar_lea.vmem %s3859_s12, %s3412_s23 }
 0x8e2   : > { %v1927_v59 = vpop.xlane.xlu0 %1926 }
 0x8e3   : > { %v1931_v57 = vsub.f32 %v1870_v43, %v1927_v59 }
 0x8e5   : > { %v1933_v58 = vmul.f32 1.442695, %v1931_v57 }
 0x8e6   : > { %v1930_v63 = vpop.xlane.xlu1 %1929 }
 0x8e7   : > { %3251 = vpow2.f32 %v1933_v58  ;;  %v1932_v60 = vsub.f32 %v1920_v52, %v1930_v63 }
 0x8e9   : > { %v1935_v61 = vmul.f32 1.442695, %v1932_v60 }
 0x8ea   : > { %v1950_v62 = vpop.permute.xlu1 %1949 }
 0x8eb   : > { %3253 = vpow2.f32 %v1935_v61  ;;  %v1955_v0 = vsel %vm1295_vm6, %v1950_v62, 0 }
 0x8ec   : > { %3109 = vmatpush3.bf16.msra.mxu1 %v1955_v0 }
 0x8ed   : > { %3120 = vmatprep.subr.bf16.mxu1 %v3283_v5 }
 0x8ee   : > { %v3196_v35 = vpop.permute.xlu1 %3195 }
 0x8ef   : > { %v3198_v22 = vunpack.i.h.bf16 %v3196_v35  ;;  %v3197_v23 = vunpack.i.l.bf16 %v3196_v35 }
 0x8f1   : > { %v3252_v44 = vpop.eup %3251  ;;  %v2070_v28 = vsel %vm1175_vm5, %v3616_v46, %v3198_v22  ;;  %v2069_v29 = vsel %vm1175_vm5, %v3614_v40, %v3197_v23  ;;  %v2882_v46 = vld [vmem:[%s3912_s24] ss:$0 sm:$0xff]  ;;  %v3226_v22 = vld [vmem:[%s3476_s20 + $0x38] sm:$0xff]  }
 0x8f2   : > { %v1937_v33 = vsel %vm1175_vm5, %v3252_v44, 0.0  ;;  %v3201_v21 = vpop.permute.xlu1 %3200  ;;  %v2889_v23 = vld [vmem:[%s3915_s3] ss:$0 sm:$0xff] }
 0x8f3   : > { %1938 = vadd.xlane.f32.xlu0 %v1937_v33  ;;  %v3203_v24 = vunpack.i.h.bf16 %v3201_v21  ;;  %v3202_v25 = vunpack.i.l.bf16 %v3201_v21  ;;  %v3217_v33 = vld [vmem:[%s3466_s6] sm:$0xff]   ;;  %v3225_v21 = vld [vmem:[%s3476_s20 + $0x30] sm:$0xff]  }
 0x8f5   : > { %v3254_v39 = vpop.eup %3253  ;;  %v2072_v34 = vsel %vm2071_vm13, %v2069_v29, %v3202_v25  ;;  %v2073_v37 = vsel %vm2071_vm13, %v2070_v28, %v3203_v24 }
 0x8f6   : > { %v1940_v41 = vsel %vm1175_vm5, %v3254_v39, 0.0 }
 0x8f7   : > { %1941 = vadd.xlane.f32.xlu0 %v1940_v41  ;;  %v3219_v41 = vld [vmem:[%s3476_s20] sm:$0xff]  }
 0x90d   : > { %1997 = vrot.lane.b32.xlu0 %v3572_v45, %s3289_s18 }
 0x980   : > { %v1939_v1 = vpop.xlane.xlu0 %1938 }
 0x981   : > { %3255 = vrcp.f32 %v1939_v1  ;;  %v3220_v1 = vld [vmem:[%s3476_s20 + $0x8] sm:$0xff]  }
 0x984   : > { %v1942_v4 = vpop.xlane.xlu0 %1941 }
 0x985   : > { %3257 = vrcp.f32 %v1942_v4  ;;  %v3221_v4 = vld [vmem:[%s3476_s20 + $0x10] sm:$0xff]  }
 0x988   : > { %v1998_v6 = vpop.permute.xlu0 %1997 }
 0x989   : > { %v2003_v7 = vsel %vm1295_vm6, %v1998_v6, 0  ;;  %v3222_v6 = vld [vmem:[%s3476_s20 + $0x18] sm:$0xff]  }
 0x98a   : > { %3115 = vmatpush3.bf16.msra.mxu0 %v2003_v7  ;;  %v3223_v7 = vld [vmem:[%s3476_s20 + $0x20] sm:$0xff]  }
 0x98b   : > { %v3256_v8 = vpop.eup %3255  ;;  %3128 = vmatprep.subr.bf16.mxu0 %v3283_v5 }
 0x98c   : > { %v1945_v26 = vmul.f32 %v3256_v8, %v3252_v44  ;;  %v3224_v8 = vld [vmem:[%s3476_s20 + $0x28] sm:$0xff]   ;;  %s3916_s20 = scalar_lea.vmem %s3861_s14, %s3412_s23 }
 0x98e   : > { %v1947_v30 = vpack.c.bf16 %v1945_v26, %v1945_v26 }
 0x98f   : > { %v3258_v9 = vpop.eup %3257 }
 0x990   : > { %v1946_v36 = vmul.f32 %v3258_v9, %v3254_v39  ;;  %3111 = vmatmul.mubr.msk.bf16.vlgmr.msra.gmra.mrb[28].mxu1 %vm1175_vm5, %v1947_v30  ;;  %v3218_v39 = vld [vmem:[%s3466_s6 + $0x8] sm:$0xff]  }
 0x991   : > { %3124 = vmatprep.mubr.msk.bf16.mxu1 %vm3284_vm1, %v3283_v5  ;;  %3121 = vmatpush3.bf16.msra.mxu1 %v3215_v10 }
 0x992   : > { %v1948_v45 = vpack.c.bf16 %v1946_v36, %v1946_v36  ;;  %3122 = vmatprep.subr.bf16.mxu1 %v3283_v5 }
 0x994   : > { %3117 = vmatmul.mubr.msk.bf16.vlgmr.msra.gmra.mrb[40].mxu0 %vm1175_vm5, %v1948_v45 }
 0x995   : > { %3132 = vmatprep.mubr.msk.bf16.mxu0 %vm3284_vm1, %v3283_v5  ;;  %3123 = vmatpush3.bf16.msra.mxu1 %v3216_v11 }
 0x996   : > { %3136 = vmatprep.subr.bf16.mxu1 %v3283_v5  ;;  %3129 = vmatpush3.bf16.msra.mxu0 %v3217_v33 }
 0x997   : > { %3130 = vmatprep.subr.bf16.mxu0 %v3283_v5 }
 0x99a   : > { %3131 = vmatpush3.bf16.msra.mxu0 %v3218_v39 }
 0xa63   : > { %v1991_v12 = vpop.f32.mrb[28].mxu1 }
 0xa64   : > { %v3112_v13 = vpop.f32.mrb[29].mxu1 }
 0xa65   : > { %v1994_v14 = vpop.f32.mrb[30].mxu1 }
 0xa66   : > { %v3113_v15 = vpop.f32.mrb[31].mxu1 }
 0xa67   : > { %v2039_v16 = vpop.f32.mrb[40].mxu0 }
 0xa68   : > { %v3204_v17 = vpack.i.bf16 %v2039_v16, %v1991_v12  ;;  %v3118_v18 = vpop.f32.mrb[41].mxu0  ;;  %v2887_v12 = vld [vmem:[%s3913_s30] ss:$0 sm:$0xff] }
 0xa69   : > { %v2042_v19 = vpop.f32.mrb[42].mxu0 }
 0xa6a   : > { %3205 = vrot.lane.b32.xlu0 %v3204_v17, %s3292_s11  ;;  %v3119_v20 = vpop.f32.mrb[43].mxu0  ;;  %v2888_v17 = vld [vmem:[%s3914_s21] ss:$0 sm:$0xff] }
 0xadc   : > { %v3206_v27 = vpop.permute.xlu0 %3205 }
 0xadd   : > { %v3208_v31 = vunpack.i.h.bf16 %v3206_v27  ;;  %v3207_v32 = vunpack.i.l.bf16 %v3206_v27 }
 0xadf   : > { %v2076_v38 = vsel %vm2074_vm14, %v2073_v37, %v3208_v31  ;;  %v2075_v42 = vsel %vm2074_vm14, %v2072_v34, %v3207_v32 }
 0xae0   : > { %v2933_v43 = vpack.c.bf16 %v2076_v38, %v2075_v42 }
 0xae2   : > { %3125 = vmatmul.mubr.msk.bf16.vlgmr.msra.gmra.mrb[32].mxu1 %vm936_vm2, %v2933_v43 }
 0xae3   : > { %3152 = vmatprep.mubr.msk.bf16.mxu1 %vm3284_vm1, %v3283_v5  ;;  %3137 = vmatpush3.bf16.msra.mxu1 %v3219_v41 }
 0xae4   : > { %3138 = vmatprep.subr.bf16.mxu1 %v3283_v5 }
 0xae7   : > { %3139 = vmatpush3.bf16.msra.mxu1 %v3220_v1  ;;  %v2902_v1 = vld [vmem:[%s871_s27] ss:$0 sm:$0xff] }
 0xae8   : > { %3140 = vmatprep.subr.bf16.mxu1 %v3283_v5 }
 0xaeb   : > { %3141 = vmatpush3.bf16.msra.mxu1 %v3221_v4 }
 0xaec   : > { %3142 = vmatprep.subr.bf16.mxu1 %v3283_v5 }
 0xaef   : > { %3143 = vmatpush3.bf16.msra.mxu1 %v3222_v6 }
 0xaf0   : > { %3144 = vmatprep.subr.bf16.mxu1 %v3283_v5 }
 0xaf3   : > { %3145 = vmatpush3.bf16.msra.mxu1 %v3223_v7  ;;  %v2903_v7 = vld [vmem:[%s874_s2] ss:$0 sm:$0xff] }
 0xaf4   : > { %3146 = vmatprep.subr.bf16.mxu1 %v3283_v5 }
 0xaf7   : > { %3147 = vmatpush3.bf16.msra.mxu1 %v3224_v8 }
 0xaf8   : > { %3148 = vmatprep.subr.bf16.mxu1 %v3283_v5 }
 0xafb   : > { %3149 = vmatpush3.bf16.msra.mxu1 %v3225_v21 }
 0xafc   : > { %3150 = vmatprep.subr.bf16.mxu1 %v3283_v5  ;;  %v2893_v5 = vld [vmem:[%s3916_s20] ss:$0 sm:$0xff] }
 0xaff   : > { %3151 = vmatpush3.bf16.msra.mxu1 %v3226_v22 }
 0xbb5   : > { %v2139_v47 = vpop.f32.mrb[32].mxu1 }
 0xbb6   : > { %v2140_v48 = vadd.f32 %v2882_v46, %v2139_v47  ;;  %v3126_v40 = vpop.f32.mrb[33].mxu1 }
 0xbb7   : > { %v2142_v49 = vpop.f32.mrb[34].mxu1 }
 0xbb8   : > { %v2146_v50 = vadd.f32 %v2140_v48, %v3505_v2  ;;  %v2143_v51 = vadd.f32 %v2882_v46, %v2142_v49  ;;  %v3127_v52 = vpop.f32.mrb[35].mxu1 }
 0xbba   : > { %v2147_v53 = vadd.f32 %v2143_v51, %v3507_v3  ;;  %v2150_v54 = vsel %vm936_vm2, %v2146_v50, 0.0 }
 0xbbb   : > { %2151 = vadd.xlane.f32.xlu1 %v2150_v54 }
 0xbbc   : > { %v2153_v55 = vsel %vm936_vm2, %v2147_v53, 0.0 }
 0xbbd   : > { %2154 = vadd.xlane.f32.xlu0 %v2153_v55 }
 0xc48   : > { %v2152_v56 = vpop.xlane.xlu1 %2151 }
 0xc49   : > { %v2157_v59 = vmul.f32 0.03125, %v2152_v56 }
 0xc4a   : > { %v2155_v57 = vpop.xlane.xlu0 %2154 }
 0xc4b   : > { %v2159_v58 = vsub.f32 %v2146_v50, %v2157_v59  ;;  %v2158_v63 = vmul.f32 0.03125, %v2155_v57 }
 0xc4d   : > { %v2160_v60 = vsub.f32 %v2147_v53, %v2158_v63  ;;  %v2161_v61 = vmul.f32 %v2159_v58, %v2159_v58 }
 0xc4f   : > { %v2163_v62 = vsel %vm936_vm2, %v2161_v61, 0.0  ;;  %v2162_v0 = vmul.f32 %v2160_v60, %v2160_v60 }
 0xc50   : > { %2164 = vadd.xlane.f32.xlu0 %v2163_v62 }
 0xc51   : > { %v2166_v44 = vsel %vm936_vm2, %v2162_v0, 0.0 }
 0xc52   : > { %2167 = vadd.xlane.f32.xlu1 %v2166_v44 }
 0xcdd   : > { %v2165_v26 = vpop.xlane.xlu0 %2164 }
 0xcde   : > { %v2169_v30 = vmul.f32 0.03125, %v2165_v26 }
 0xcdf   : > { %v2168_v9 = vpop.xlane.xlu1 %2167 }
 0xce0   : > { %v2171_v36 = vadd.f32 1e-05, %v2169_v30  ;;  %v2170_v45 = vmul.f32 0.03125, %v2168_v9 }
 0xce2   : > { %3259 = vrsqrt.f32 %v2171_v36  ;;  %v2172_v10 = vadd.f32 1e-05, %v2170_v45 }
 0xce4   : > { %3261 = vrsqrt.f32 %v2172_v10 }
 0xcec   : > { %v3260_v11 = vpop.eup %3259 }
 0xced   : > { %v2175_v13 = vmul.f32 %v3260_v11, %v2159_v58 }
 0xcee   : > { %v3262_v14 = vpop.eup %3261 }
 0xcef   : > { %v2183_v15 = vmul.f32 %v2887_v12, %v2175_v13  ;;  %v2176_v16 = vmul.f32 %v3262_v14, %v2160_v60 }
 0xcf1   : > { %v2184_v18 = vmul.f32 %v2887_v12, %v2176_v16  ;;  %v2191_v19 = vadd.f32 %v2888_v17, %v2183_v15 }
 0xcf3   : > { %v3770_v20 = vadd.f32 %v2888_v17, %v2184_v18 }
 0xcf5   : > { %v2217_v35 = vpack.c.bf16 %v3770_v20, %v2191_v19 }
 0xcf7   : > { %3133 = vmatmul.mubr.msk.bf16.vlgmr.msra.gmra.mrb[44].mxu0 %vm936_vm2, %v2217_v35 }
 0xdca   : > { %v2273_v24 = vpop.f32.mrb[44].mxu0 }
 0xdcb   : > { %v2274_v25 = vadd.f32 %v2889_v23, %v2273_v24  ;;  %v3134_v27 = vpop.f32.mrb[45].mxu0 }
 0xdcc   : > { %v2276_v28 = vpop.f32.mrb[46].mxu0 }
 0xdcd   : > { %v2277_v29 = vadd.f32 %v2889_v23, %v2276_v28  ;;  %v3135_v31 = vpop.f32.mrb[47].mxu0  ;;  %v2280_v32 = vmax.f32 %v2274_v25, 0.0 }
 0xdce   : > { %v2904_v31 = vld [vmem:[%s877_s7] ss:$0 sm:$0xff] }
 0xdcf   : > { %v2281_v34 = vmax.f32 %v2277_v29, 0.0 }
 0xdd1   : > { %v2282_v37 = vpack.c.bf16 %v2281_v34, %v2280_v32 }
 0xdd3   : > { %3153 = vmatmul.mubr.bf16.vlgmr.msra.gmra.mrb[36].mxu1 %v2282_v37  ;;  %v2905_v37 = vld [vmem:[%s880_s19] ss:$0 sm:$0xff] }
 0xea6   : > { %v2371_v38 = vpop.f32.mrb[36].mxu1 }
 0xea7   : > { %v2372_v42 = vadd.f32 %v2893_v5, %v2371_v38  ;;  %v3154_v43 = vpop.f32.mrb[37].mxu1 }
 0xea8   : > { %v2374_v46 = vpop.f32.mrb[38].mxu1 }
 0xea9   : > { %v2375_v47 = vadd.f32 %v2893_v5, %v2374_v46  ;;  %v3155_v48 = vpop.f32.mrb[39].mxu1  ;;  %v2378_v40 = vadd.f32 %v2372_v42, %v2191_v19 }
 0xeab   : > { %v2380_v49 = vsel %vm936_vm2, %v2378_v40, 0.0  ;;  %v2379_v50 = vadd.f32 %v2375_v47, %v3770_v20 }
 0xeac   : > { %2381 = vadd.xlane.f32.xlu0 %v2380_v49 }
 0xead   : > { %v2383_v51 = vsel %vm936_vm2, %v2379_v50, 0.0 }
 0xeae   : > { %2384 = vadd.xlane.f32.xlu1 %v2383_v51 }
 0xf39   : > { %v2382_v52 = vpop.xlane.xlu0 %2381 }
 0xf3a   : > { %v2386_v53 = vmul.f32 0.03125, %v2382_v52 }
 0xf3b   : > { %v2385_v54 = vpop.xlane.xlu1 %2384 }
 0xf3c   : > { %v2388_v55 = vsub.f32 %v2378_v40, %v2386_v53  ;;  %v2387_v56 = vmul.f32 0.03125, %v2385_v54 }
 0xf3e   : > { %v2389_v59 = vsub.f32 %v2379_v50, %v2387_v56  ;;  %v2390_v57 = vmul.f32 %v2388_v55, %v2388_v55 }
 0xf40   : > { %v2392_v58 = vsel %vm936_vm2, %v2390_v57, 0.0  ;;  %v2391_v63 = vmul.f32 %v2389_v59, %v2389_v59 }
 0xf41   : > { %2393 = vadd.xlane.f32.xlu0 %v2392_v58 }
 0xf42   : > { %v2395_v60 = vsel %vm936_vm2, %v2391_v63, 0.0 }
 0xf43   : > { %2396 = vadd.xlane.f32.xlu1 %v2395_v60 }
 0xfce   : > { %v2394_v61 = vpop.xlane.xlu0 %2393 }
 0xfcf   : > { %v2398_v62 = vmul.f32 0.03125, %v2394_v61 }
 0xfd0   : > { %v2397_v0 = vpop.xlane.xlu1 %2396 }
 0xfd1   : > { %v2400_v44 = vadd.f32 1e-05, %v2398_v62  ;;  %v2399_v33 = vmul.f32 0.03125, %v2397_v0 }
 0xfd3   : > { %3263 = vrsqrt.f32 %v2400_v44  ;;  %v2401_v39 = vadd.f32 1e-05, %v2399_v33 }
 0xfd5   : > { %3265 = vrsqrt.f32 %v2401_v39 }
 0xfdd   : > { %v3264_v41 = vpop.eup %3263 }
 0xfde   : > { %v2404_v4 = vmul.f32 %v3264_v41, %v2388_v55 }
 0xfdf   : > { %v3266_v6 = vpop.eup %3265 }
 0xfe0   : > { %v2412_v8 = vmul.f32 %v2902_v1, %v2404_v4  ;;  %v2405_v26 = vmul.f32 %v3266_v6, %v2389_v59 }
 0xfe2   : > { %v2420_v30 = vadd.f32 %v2903_v7, %v2412_v8  ;;  %v2413_v9 = vmul.f32 %v2902_v1, %v2405_v26 }
 0xfe4   : > { %v2422_v36 = vadd.f32 %v2420_v30, %v2191_v19  ;;  %v2421_v45 = vadd.f32 %v2903_v7, %v2413_v9 }
 0xfe6   : > { %v2426_v10 = vsel %vm936_vm2, %v2422_v36, 0.0  ;;  %v2423_v11 = vadd.f32 %v2421_v45, %v3770_v20 }
 0xfe7   : > { %2427 = vadd.xlane.f32.xlu0 %v2426_v10 }
 0xfe8   : > { %v2429_v12 = vsel %vm936_vm2, %v2423_v11, 0.0 }
 0xfe9   : > { %2430 = vadd.xlane.f32.xlu1 %v2429_v12 }
0x1074   : > { %v2428_v13 = vpop.xlane.xlu0 %2427 }
0x1075   : > { %v2432_v14 = vmul.f32 0.03125, %v2428_v13 }
0x1076   : > { %v2431_v15 = vpop.xlane.xlu1 %2430 }
0x1077   : > { %v2434_v16 = vsub.f32 %v2422_v36, %v2432_v14  ;;  %v2433_v17 = vmul.f32 0.03125, %v2431_v15 }
0x1079   : > { %v2435_v18 = vsub.f32 %v2423_v11, %v2433_v17  ;;  %v2436_v35 = vmul.f32 %v2434_v16, %v2434_v16 }
0x107b   : > { %v2438_v21 = vsel %vm936_vm2, %v2436_v35, 0.0  ;;  %v2437_v19 = vmul.f32 %v2435_v18, %v2435_v18 }
0x107c   : > { %2439 = vadd.xlane.f32.xlu0 %v2438_v21 }
0x107d   : > { %v2441_v22 = vsel %vm936_vm2, %v2437_v19, 0.0 }
0x107e   : > { %2442 = vadd.xlane.f32.xlu1 %v2441_v22 }
0x1109   : > { %v2440_v20 = vpop.xlane.xlu0 %2439 }
0x110a   : > { %v2444_v23 = vmul.f32 0.03125, %v2440_v20 }
0x110b   : > { %v2443_v24 = vpop.xlane.xlu1 %2442 }
0x110c   : > { %v2446_v25 = vadd.f32 1e-05, %v2444_v23  ;;  %v2445_v27 = vmul.f32 0.03125, %v2443_v24 }
0x110e   : > { %3267 = vrsqrt.f32 %v2446_v25  ;;  %v2447_v28 = vadd.f32 1e-05, %v2445_v27 }
0x1110   : > { %3269 = vrsqrt.f32 %v2447_v28 }
0x1118   : > { %v3268_v29 = vpop.eup %3267 }
0x1119   : > { %v2450_v32 = vmul.f32 %v3268_v29, %v2434_v16 }
0x111a   : > { %v3270_v34 = vpop.eup %3269 }
0x111b   : > { %v2458_v5 = vmul.f32 %v2904_v31, %v2450_v32  ;;  %v2451_v38 = vmul.f32 %v3270_v34, %v2435_v18 }
0x111d   : > { %v2466_v42 = vadd.f32 %v2905_v37, %v2458_v5  ;;  %v2459_v43 = vmul.f32 %v2904_v31, %v2451_v38 }
0x111f   : > { %2468 = vst.msk [vmem:[#allocation2] sm:$0xff] %vm936_vm2, %v2466_v42  ;;  %v2467_v46 = vadd.f32 %v2905_v37, %v2459_v43 }
0x1121   : > { %2469 = vst.msk [vmem:[#allocation2 + $0x8] sm:$0xff] %vm936_vm2, %v2467_v46 }
0x1122 PF: > { %s3918_s26 = sld [smem:[#allocation4_spill]] }
0x1128   : > { %p2906_p6 = scmp.ne.s32.totalorder %s3918_s26, 1 }
0x1129   : > { %s3919_s7 = sld [smem:[#allocation6_spill]] (!%p2906_p6)  ;;  %v3271_v47 = vld [vmem:[%s3427_s1] sm:$0xff] (!%p2906_p6)   ;;  %v3293_v48 = vmov (!%p2906_p6), 0.0   ;;  %s3920_s23 = sld [smem:[#allocation5_spill]] (!%p2906_p6)  ;;  %v3273_v49 = vld [vmem:[%s3427_s1 + $0x8] sm:$0xff] (!%p2906_p6)   ;;  %vm3294_vm15 = vmmov (!%p2906_p6), 0   ;;  %v2474_v51 = vpack.c.bf16 (!%p2906_p6), %v3507_v3, %v3505_v2 }
0x112a   : > { %2473 = sbr.rel (%p2906_p6) target bundleno = 4626 (0x1212), region = 108  ;;  %3156 = vmatprep.subr.bf16.mxu0 (!%p2906_p6), %v3293_v48  ;;  %3164 = vmatprep.subr.bf16.mxu1 (!%p2906_p6), %v3293_v48  ;;  %vm2498_vm0 = vcmask (!%p2906_p6), 261120   ;;  %v2911_v53 = vld [vmem:[%s3444_s4] ss:$0 sm:$0xff] (!%p2906_p6)  ;;  %vm2615_vm1 = vcmask (!%p2906_p6), 257024   ;;  %s3921_s21 = sld [smem:[#allocation19_spill]] (!%p2906_p6) }
0x112b   : > { %3157 = vmatpush3.bf16.msra.mxu0 (!%p2906_p6), %v3271_v47  ;;  %3160 = vmatprep.mubr.msk.bf16.mxu0 (!%p2906_p6), %vm3294_vm15, %v3293_v48  ;;  %s3922_s22 = sld [smem:[#allocation20_spill]] (!%p2906_p6) }
0x112c   : > { %3158 = vmatprep.subr.bf16.mxu0 (!%p2906_p6), %v3293_v48  ;;  %3168 = vmatprep.mubr.msk.bf16.mxu1 (!%p2906_p6), %vm3294_vm15, %v3293_v48 }
0x112f   : > { %v3272_v40 = vld [vmem:[%s3919_s7] sm:$0xff] (!%p2906_p6)   ;;  %v3274_v50 = vld [vmem:[%s3919_s7 + $0x8] sm:$0xff] (!%p2906_p6)   ;;  %3159 = vmatpush3.bf16.msra.mxu0 (!%p2906_p6), %v3273_v49 }
0x1130   : > { %3165 = vmatpush3.bf16.msra.mxu1 (!%p2906_p6), %v3272_v40  ;;  %v2907_v52 = vld [vmem:[%s3920_s23] ss:$0 sm:$0xff] (!%p2906_p6) }
0x1131   : > { %3166 = vmatprep.subr.bf16.mxu1 %v3293_v48 }
0x1132   : > { %3161 = vmatmul.mubr.msk.bf16.vlgmr.msra.gmra.mrb[0].mxu0 %vm2498_vm0, %v2474_v51 }
0x1134   : > { %3167 = vmatpush3.bf16.msra.mxu1 %v3274_v50 }
0x1137   : > { %3169 = vmatmul.mubr.msk.bf16.vlgmr.msra.gmra.mrb[0].mxu1 %vm2498_vm0, %v2474_v51 }
0x1205   : > { %v2536_v54 = vpop.f32.mrb[0].mxu0 }
0x1206   : > { %v2537_v55 = vadd.f32 %v2907_v52, %v2536_v54  ;;  %v3162_v59 = vpop.f32.mrb[1].mxu0 }
0x1207   : > { %v2539_v63 = vpop.f32.mrb[2].mxu0 }
0x1208   : > { %v2934_v60 = vpack.c.bf16 %v2537_v55, %v2537_v55  ;;  %v2540_v61 = vadd.f32 %v2907_v52, %v2539_v63  ;;  %v3163_v0 = vpop.f32.mrb[3].mxu0 }
0x120a   : > { %v2600_v56 = vpop.f32.mrb[0].mxu1  ;;  %2616 = vst.msk [vmem:[%s3921_s21] sm:$0xf] %vm2615_vm1, %v2934_v60  ;;  %v2935_v33 = vpack.c.bf16 %v2540_v61, %v2540_v61 }
0x120b   : > { %v2601_v57 = vadd.f32 %v2911_v53, %v2600_v56  ;;  %v3170_v58 = vpop.f32.mrb[1].mxu1 }
0x120c   : > { %v2603_v62 = vpop.f32.mrb[2].mxu1  ;;  %2617 = vst.msk [vmem:[%s3921_s21 + $0x4] sm:$0xf] %vm2615_vm1, %v2935_v33 }
0x120d   : > { %v2936_v2 = vpack.c.bf16 %v2601_v57, %v2601_v57  ;;  %v2604_v3 = vadd.f32 %v2911_v53, %v2603_v62  ;;  %v3171_v44 = vpop.f32.mrb[3].mxu1 }
0x120f   : > { %2626 = vst.msk [vmem:[%s3922_s22] sm:$0xf] %vm2615_vm1, %v2936_v2  ;;  %v2937_v39 = vpack.c.bf16 %v2604_v3, %v2604_v3 }
0x1211   : > { %2627 = vst.msk [vmem:[%s3922_s22 + $0x4] sm:$0xf] %vm2615_vm1, %v2937_v39 }
0x1212 PF: > { %s3923_s13 = sld [smem:[#allocation3_spill]] }
0x1218   : > { %s31_s1 = sadd.s32 1, %s3923_s13  }
0x1219   : > { %p28_p7 = scmp.ge.s32.totalorder %s31_s1, 4  }
0x121b   :  { %30 = sbr.rel (!%p28_p7) target bundleno = 14 (0xe), region = 193 }

// kernel: aiayn_forward.4
= control target key start
LH: loop header
LB: loop body
LE: loop exit
PB: predicated region body
PF: predicated region fallthrough
CT: control target
= control target key end

     0   :  { %s5759_s6 = smov 1   ;;  %s5760_s10 = smov 2   ;;  %s6811_s0 = inlined_call_operand.smem [shape: u32[32], index: -1, kind: input, shape index: {}] }
   0x1   :  { %s5814_s5 = sld [smem:[%s6811_s0]]   ;;  %s5761_s14 = smov 3  }
   0x2   :  { %s5819_s9 = sld [smem:[%s6811_s0 + %s5759_s6]]   ;;  %s5762_s18 = smov 4  }
   0x3   :  { %s5824_s13 = sld [smem:[%s6811_s0 + %s5760_s10]]   ;;  %s5763_s22 = smov 5  }
   0x4   :  { %s5829_s17 = sld [smem:[%s6811_s0 + %s5761_s14]]   ;;  %s5764_s26 = smov 6  }
   0x5   :  { %s5834_s21 = sld [smem:[%s6811_s0 + %s5762_s18]]   ;;  %s5765_s30 = smov 7  }
   0x6   :  { %s5839_s25 = sld [smem:[%s6811_s0 + %s5763_s22]]   ;;  %s5766_s4 = smov 8  }
   0x7   :  { %6836 = sst [smem:[#allocation17_spill]] %s5814_s5  ;;  %s5767_s10 = smov 9  }
   0x8   :  { %6837 = sst [smem:[#allocation18_spill]] %s5819_s9  ;;  %s5768_s15 = smov 10  }
   0x9   :  { %6838 = sst [smem:[#allocation19_spill]] %s5824_s13  ;;  %s5769_s20 = smov 11  }
   0xa   :  { %6839 = sst [smem:[#allocation20_spill]] %s5829_s17  ;;  %s5771_s1 = smov 13  }
   0xb   :  { %6840 = sst [smem:[#allocation21_spill]] %s5834_s21  ;;  %s5772_s7 = smov 14  }
   0xc   :  { %6841 = sst [smem:[#allocation22_spill]] %s5839_s25  ;;  %s5774_s22 = smov 16  }
   0xd   :  { %s5844_s29 = sld [smem:[%s6811_s0 + %s5764_s26]]   ;;  %s5770_s26 = smov 12  }
   0xe   :  { %s5849_s3 = sld [smem:[%s6811_s0 + %s5765_s30]]   ;;  %s5775_s28 = smov 17  }
   0xf   :  { %s5854_s8 = sld [smem:[%s6811_s0 + %s5766_s4]]  }
  0x10   :  { %s5859_s14 = sld [smem:[%s6811_s0 + %s5767_s10]]  }
  0x11   :  { %s5864_s19 = sld [smem:[%s6811_s0 + %s5768_s15]]   ;;  %s5773_s15 = smov 15  }
  0x12   :  { %s5869_s24 = sld [smem:[%s6811_s0 + %s5769_s20]]  }
  0x13   :  { %6842 = sst [smem:[#allocation23_spill]] %s5844_s29 }
  0x14   :  { %6843 = sst [smem:[#allocation24_spill]] %s5849_s3 }
  0x15   :  { %6844 = sst [smem:[#allocation25_spill]] %s5854_s8 }
  0x16   :  { %6845 = sst [smem:[#allocation26_spill]] %s5859_s14 }
  0x17   :  { %6846 = sst [smem:[#allocation27_spill]] %s5864_s19 }
  0x18   :  { %6847 = sst [smem:[#allocation28_spill]] %s5869_s24 }
  0x19   :  { %s5874_s30 = sld [smem:[%s6811_s0 + %s5770_s26]]  }
  0x1a   :  { %s5879_s6 = sld [smem:[%s6811_s0 + %s5771_s1]]  }
  0x1b   :  { %s5884_s12 = sld [smem:[%s6811_s0 + %s5772_s7]]   ;;  %s5776_s7 = smov 18  }
  0x1c   :  { %s5889_s20 = sld [smem:[%s6811_s0 + %s5773_s15]]   ;;  %s5777_s15 = smov 19  }
  0x1d   :  { %s5894_s27 = sld [smem:[%s6811_s0 + %s5774_s22]]   ;;  %s5778_s22 = smov 20  }
  0x1e   :  { %s5899_s4 = sld [smem:[%s6811_s0 + %s5775_s28]]   ;;  %s5779_s28 = smov 21  }
  0x1f   :  { %6848 = sst [smem:[#allocation29_spill]] %s5874_s30 }
  0x20   :  { %6849 = sst [smem:[#allocation30_spill]] %s5879_s6 }
  0x21   :  { %6850 = sst [smem:[#allocation31_spill]] %s5884_s12 }
  0x22   :  { %6851 = sst [smem:[#allocation32_spill]] %s5889_s20 }
  0x23   :  { %6852 = sst [smem:[#allocation33_spill]] %s5894_s27 }
  0x24   :  { %6853 = sst [smem:[#allocation34_spill]] %s5899_s4 }
  0x25   :  { %s5904_s13 = sld [smem:[%s6811_s0 + %s5776_s7]]   ;;  %s5780_s7 = smov 22  }
  0x26   :  { %s5909_s9 = sld [smem:[%s6811_s0 + %s5777_s15]]   ;;  %s5781_s15 = smov 23  }
  0x27   :  { %s5914_s5 = sld [smem:[%s6811_s0 + %s5778_s22]]   ;;  %s5782_s22 = smov 24  }
  0x28   :  { %s5919_s4 = sld [smem:[%s6811_s0 + %s5779_s28]]   ;;  %s5783_s28 = smov 25  }
  0x2b   :  { %6854 = sst [smem:[#allocation35_spill]] %s5904_s13 }
  0x2c   :  { %6855 = sst [smem:[#allocation36_spill]] %s5909_s9 }
  0x2d   :  { %6856 = sst [smem:[#allocation37_spill]] %s5914_s5 }
  0x2e   :  { %6857 = sst [smem:[#allocation38_spill]] %s5919_s4 }
  0x2f   :  { %s5924_s13 = sld [smem:[%s6811_s0 + %s5780_s7]]   ;;  %s5784_s7 = smov 26  }
  0x30   :  { %s5929_s9 = sld [smem:[%s6811_s0 + %s5781_s15]]   ;;  %s5785_s15 = smov 27  }
  0x31   :  { %s5934_s5 = sld [smem:[%s6811_s0 + %s5782_s22]]   ;;  %s5786_s22 = smov 28  }
  0x32   :  { %s5939_s4 = sld [smem:[%s6811_s0 + %s5783_s28]]   ;;  %s5787_s28 = smov 29  }
  0x33   :  { %s5954_s27 = sld [smem:[%s6811_s0 + %s5786_s22]]  }
  0x35   :  { %6858 = sst [smem:[#allocation39_spill]] %s5924_s13 }
  0x36   :  { %6859 = sst [smem:[#allocation40_spill]] %s5929_s9 }
  0x37   :  { %6860 = sst [smem:[#allocation41_spill]] %s5934_s5 }
  0x38   :  { %6861 = sst [smem:[#allocation42_spill]] %s5939_s4 }
  0x39   :  { %s5944_s13 = sld [smem:[%s6811_s0 + %s5784_s7]]   ;;  %s5788_s7 = smov 30  }
  0x3a   :  { %s5949_s9 = sld [smem:[%s6811_s0 + %s5785_s15]]   ;;  %s5789_s15 = smov 31  }
  0x3b   :  { %6864 = sst [smem:[#allocation45_spill]] %s5954_s27 }
  0x3c   :  { %s5959_s4 = sld [smem:[%s6811_s0 + %s5787_s28]]  }
  0x3d   :  { %s5964_s20 = sld [smem:[%s6811_s0 + %s5788_s7]]  }
  0x3e   :  { %s5969_s12 = sld [smem:[%s6811_s0 + %s5789_s15]]  }
  0x3f   :  { %6862 = sst [smem:[#allocation43_spill]] %s5944_s13 }
  0x40   :  { %6863 = sst [smem:[#allocation44_spill]] %s5949_s9 }
  0x42   :  { %6865 = sst [smem:[#allocation46_spill]] %s5959_s4 }
  0x43   :  { %6866 = sst [smem:[#allocation47_spill]] %s5964_s20 }
  0x44   :  { %6867 = sst [smem:[#allocation48_spill]] %s5969_s12 }
  0x45   :  { %68 = vsyncpa [#allocation4], 0 }
  0x46   :  { %70 = vsyncpa [#allocation4 + $0x1], 0 }
  0x47   :  { %71 = vsyncpa [#allocation6], 0 }
  0x48   :  { %73 = vsyncpa [#allocation6 + $0x1], 0 }
  0x49   :  { %74 = vsyncpa [#allocation9], 0 }
  0x4a   :  { %76 = vsyncpa [#allocation9 + $0x1], 0 }
  0x4b   :  { %77 = vsyncpa [#allocation12], 0 }
  0x4c   :  { %79 = vsyncpa [#allocation12 + $0x1], 0  ;;  %s5971_s22 = smov 0   ;;  %s5973_s23 = smov 0  }
  0x4d   :  { %s5975_s26 = smov 0   ;;  %s5977_s28 = smov 0  }
  0x4e LB: > { %s6868_s20 = sld [smem:[#allocation47_spill]]  ;;  %s6869_s9 = sld [smem:[#allocation44_spill]]  ;;  %s5749_s23 = sphi %s5973_s23, %s6953_s23   ;;  %s5745_s22 = sphi %s5971_s22, %s6952_s22   ;;  %s5757_s28 = sphi %s5977_s28, %s6951_s28   ;;  %s5753_s26 = sphi %s5975_s26, %s6954_s26  }
  0x4f   : > { %s6870_s5 = sld [smem:[#allocation41_spill]]  ;;  %s6871_s4 = sld [smem:[#allocation46_spill]] }
  0x50   : > { %s6872_s27 = sld [smem:[#allocation45_spill]]  ;;  %s6873_s13 = sld [smem:[#allocation43_spill]] }
  0x51   : > { %6874 = sst [smem:[#allocation49_spill]] %s5749_s23  ;;  %s5990_s0 = sadd.s32 4294967295, %s5757_s28  }
  0x52   : > { %6875 = sst [smem:[#allocation50_spill]] %s5753_s26  ;;  %s5993_s1 = sadd.s32 1, %s5757_s28  }
  0x53   : > { %6876 = sst [smem:[#allocation51_spill]] %s5990_s0  ;;  %s698_s2 = ssub.s32 %s5757_s28, %s5993_s1 }
  0x54   : > { %6877 = sst [smem:[#allocation52_spill]] %s5993_s1  ;;  %s701_s7 = sadd.s32 1, %s5753_s26 }
  0x55   : > { %p699_p0 = scmp.eq.s32.totalorder %s698_s2, 0  ;;  %p708_p1 = scmp.ne.s32.totalorder %s5753_s26, %s5749_s23 }
  0x56   : > { %p709_p2 = scmp.eq.s32.totalorder %s5757_s28, 0  ;;  %p714_p3 = scmp.ne.s32.totalorder %s5749_s23, %s5745_s22 }
  0x57   : > { %s6003_s10 = scalar_select %p699_p0, %s5753_s26, %s701_s7  }
  0x58   : > { %p710_p4 = por %p709_p2, %p708_p1  ;;  %p715_p5 = scmp.eq.s32.totalorder %s5990_s0, 0 }
  0x59   : > { %6878 = sst [smem:[#allocation53_spill]] %s6003_s10  ;;  %p5317_p6 = scmp.lt.s32.totalorder %s5757_s28, 2 }
  0x5a   : > { %p6007_p7 = por %p715_p5, %p714_p3  ;;  %s6012_s15 = sand.u32 1, %s5753_s26  }
  0x5b   : > { %s6015_s16 = sshll.u32 %s5757_s28, 4  ;;  %p6017_p8 = pnand %p5317_p6, %p710_p4 }
  0x5c   : > { %s6879_s11 = scalar_select %p6007_p7, 1, 0 }
  0x5d   : > { %s6880_s18 = scalar_select %p6017_p8, 1, 0 }
  0x5e   : > { %s6818_s22 = sand.u32 1, %s5757_s28   ;;  %s6024_s2 = scalar_lea.hbm %s6873_s13, %s6015_s16 }
  0x5f   : > { %s1096_s7 = scalar_lea.vmem [#allocation5], %s6012_s15  ;;  %s6032_s26 = scalar_lea.sflag [#allocation6], %s6818_s22 }
  0x60   : > { %s1103_s10 = sshll.u32 %s1096_s7, 4  ;;  %s5531_s1 = scalar_lea.hbm %s6024_s2, 16  ;;  %s6027_s10 = int_to_ptr.vmem [resolvable:$true] %s1103_s10 }
  0x61   : > { %p5532_p10 = scmp.ne.s32.totalorder %s6024_s2, %s5531_s1  ;;  %p6038_p11 = pneg %p6017_p8 }
  0x62   : > { %s5536_s6 = scalar_lea.hbm %s6873_s13, 32  ;;  %p5537_p0 = scmp.lt.u32.totalorder %s6024_s2, %s6873_s13 }
  0x63   : > { %p5534_p12 = pnand %p6038_p11, %p5532_p10  ;;  %p5538_p1 = scmp.lt.u32.totalorder %s5536_s6, %s5531_s1 }
  0x64   : > { %p5540_p3 = scmp.lt.u32.totalorder %s5531_s1, %s6024_s2 }
  0x65   : > { %p5535_p13 = pneg %p5534_p12  ;;  %p5539_p2 = por %p5538_p1, %p5537_p0 }
  0x67   : > { %p5541_p4 = por %p5540_p3, %p5539_p2 }
  0x69   : > { %p5542_p5 = pnand %p5541_p4, %p5535_p13 }
  0x6b   : > { %5545 = shalt.err (!%p5542_p5)
}
  0x6c   : > { %s5546_s7 = scalar_lea.vmem %s6027_s10, 16  ;;  %s5790_s22 = smov [#allocation5]  }
  0x6d   : > { %p5547_p6 = scmp.ne.s32.totalorder %s6027_s10, %s5546_s7  ;;  %s5551_s30 = sshll.u32 %s5790_s22, 4  ;;  %s5552_s30 = int_to_ptr.vmem [resolvable:$false] %s5551_s30 }
  0x6e   : > { %s5553_s24 = scalar_lea.vmem %s5552_s30, 32  ;;  %p5554_p10 = scmp.lt.s32.totalorder %s6027_s10, %s5552_s30 }
  0x6f   : > { %p5549_p9 = pnand %p5547_p6, %p6038_p11  ;;  %p5555_p12 = scmp.lt.s32.totalorder %s5553_s24, %s5546_s7 }
  0x71   : > { %p5550_p7 = pneg %p5549_p9  ;;  %p5556_p0 = por %p5555_p12, %p5554_p10 }
  0x73   : > { %p5557_p1 = pnand %p5556_p0, %p5550_p7 }
  0x75   : > { %5560 = shalt.err (!%p5557_p1)
}
  0x76   : > { %5304 = dma.hbm_to_vmem [thread:$0]  (!%p6017_p8), %s6024_s2, 16, %s6027_s10, %s6032_s26  }
  0x77   : > { %p1176_p9 = scmp.lt.s32.totalorder %s5757_s28, 3  ;;  %s6061_s24 = scalar_lea.hbm %s6872_s27, %s6015_s16 }
  0x78   : > { %p6882_p7 = scmp.ge.s32.totalorder %s5757_s28, 1  ;;  %s1130_s6 = scalar_lea.vmem [#allocation8], %s6012_s15 }
  0x79   : > { %s1137_s1 = sshll.u32 %s1130_s6, 4  ;;  %s6884_s22 = sand.u32 1, %s5757_s28   ;;  %s1138_s1 = int_to_ptr.vmem [resolvable:$true] %s1137_s1 }
  0x7a   : > { %p6065_p13 = pnand %p6882_p7, %p1176_p9  ;;  %s6072_s7 = scalar_lea.sflag [#allocation9], %s6884_s22 }
  0x7b   : > { %s5561_s13 = scalar_lea.hbm %s6061_s24, 16  ;;  %s5566_s10 = scalar_lea.hbm %s6872_s27, 32 }
  0x7c   : > { %s6883_s30 = scalar_select %p6065_p13, 1, 0 }
  0x7d   : > { %p5562_p2 = scmp.ne.s32.totalorder %s6061_s24, %s5561_s13  ;;  %p5567_p5 = scmp.lt.u32.totalorder %s6061_s24, %s6872_s27 }
  0x7e   : > { %p5568_p6 = scmp.lt.u32.totalorder %s5566_s10, %s5561_s13  ;;  %p5570_p12 = scmp.lt.u32.totalorder %s5561_s13, %s6061_s24 }
  0x7f   : > { %p5564_p3 = pnand %p5562_p2, %p6038_p11 }
  0x80   : > { %p5569_p10 = por %p5568_p6, %p5567_p5 }
  0x81   : > { %p5565_p4 = pneg %p5564_p3 }
  0x82   : > { %p5571_p0 = por %p5570_p12, %p5569_p10 }
  0x84   : > { %p5572_p1 = pnand %p5571_p0, %p5565_p4 }
  0x86   : > { %5575 = shalt.err (!%p5572_p1)
}
  0x87   : > { %s5576_s2 = scalar_lea.vmem %s1138_s1, 16  ;;  %s5791_s28 = smov [#allocation8]  }
  0x88   : > { %p5577_p9 = scmp.ne.s32.totalorder %s1138_s1, %s5576_s2  ;;  %s5581_s6 = sshll.u32 %s5791_s28, 4  ;;  %s5582_s6 = int_to_ptr.vmem [resolvable:$false] %s5581_s6 }
  0x89   : > { %s5583_s22 = scalar_lea.vmem %s5582_s6, 32  ;;  %p5584_p2 = scmp.lt.s32.totalorder %s1138_s1, %s5582_s6 }
  0x8a   : > { %p5579_p7 = pnand %p5577_p9, %p6038_p11  ;;  %p5585_p3 = scmp.lt.s32.totalorder %s5583_s22, %s5576_s2 }
  0x8c   : > { %p5580_p13 = pneg %p5579_p7  ;;  %p5586_p8 = por %p5585_p3, %p5584_p2 }
  0x8e   : > { %p5587_p5 = pnand %p5586_p8, %p5580_p13 }
  0x90   : > { %5590 = shalt.err (!%p5587_p5)
}
  0x91   : > { %p6885_p6 = scmp.ne.s32.totalorder %s6880_s18, 0  ;;  %s6090_s13 = scalar_lea.hbm %s6870_s5, %s6015_s16 }
  0x92   : > { %s1071_s10 = scalar_lea.vmem [#allocation3], %s6012_s15  ;;  %s6097_s28 = scalar_lea.hbm %s6869_s9, %s6015_s16 }
  0x93   : > { %5310 = dma.hbm_to_vmem [thread:$0]  (!%p6885_p6), %s6061_s24, 16, %s1138_s1, %s6072_s7  }
  0x94   : > { %s1078_s2 = sshll.u32 %s1071_s10, 4  ;;  %s1069_s6 = scalar_lea.sflag [#allocation4], %s6012_s15  ;;  %s6093_s2 = int_to_ptr.vmem [resolvable:$true] %s1078_s2 }
  0x95   : > { %s5591_s22 = scalar_lea.hbm %s6090_s13, 16  ;;  %s5596_s27 = scalar_lea.hbm %s6870_s5, 32 }
  0x96   : > { %p5592_p8 = scmp.ne.s32.totalorder %s6090_s13, %s5591_s22  ;;  %p5597_p10 = scmp.lt.u32.totalorder %s6090_s13, %s6870_s5 }
  0x97   : > { %p5598_p12 = scmp.lt.u32.totalorder %s5596_s27, %s5591_s22  ;;  %p5600_p1 = scmp.lt.u32.totalorder %s5591_s22, %s6090_s13 }
  0x98   : > { %p5594_p13 = pnand %p5592_p8, %p6038_p11 }
  0x99   : > { %p5599_p0 = por %p5598_p12, %p5597_p10 }
  0x9a   : > { %p5595_p4 = pneg %p5594_p13 }
  0x9b   : > { %p5601_p9 = por %p5600_p1, %p5599_p0 }
  0x9d   : > { %p5602_p7 = pnand %p5601_p9, %p5595_p4 }
  0x9f   : > { %5605 = shalt.err (!%p5602_p7)
}
  0xa0   : > { %s5606_s24 = scalar_lea.vmem %s6093_s2, 16  ;;  %s5792_s1 = smov [#allocation3]  }
  0xa1   : > { %p5607_p2 = scmp.ne.s32.totalorder %s6093_s2, %s5606_s24  ;;  %s5611_s10 = sshll.u32 %s5792_s1, 4  ;;  %s5612_s10 = int_to_ptr.vmem [resolvable:$false] %s5611_s10 }
  0xa2   : > { %s5613_s19 = scalar_lea.vmem %s5612_s10, 32  ;;  %p5614_p8 = scmp.lt.s32.totalorder %s6093_s2, %s5612_s10 }
  0xa3   : > { %p5609_p3 = pnand %p5607_p2, %p6038_p11  ;;  %p5615_p13 = scmp.lt.s32.totalorder %s5613_s19, %s5606_s24 }
  0xa5   : > { %p5610_p5 = pneg %p5609_p3  ;;  %p5616_p10 = por %p5615_p13, %p5614_p8 }
  0xa7   : > { %p5617_p12 = pnand %p5616_p10, %p5610_p5 }
  0xa9   : > { %5620 = shalt.err (!%p5617_p12)
}
  0xaa   : > { %5301 = dma.hbm_to_vmem [thread:$0]  (!%p6885_p6), %s6090_s13, 16, %s6093_s2, %s1069_s6  }
  0xab   : > { %s1113_s27 = scalar_lea.vmem [#allocation7], %s6012_s15  ;;  %s6120_s22 = scalar_lea.hbm %s6871_s4, %s6015_s16 }
  0xac   : > { %s1120_s19 = sshll.u32 %s1113_s27, 4  ;;  %s5621_s24 = scalar_lea.hbm %s6097_s28, 16  ;;  %s1121_s19 = int_to_ptr.vmem [resolvable:$true] %s1120_s19 }
  0xad   : > { %p5622_p4 = scmp.ne.s32.totalorder %s6097_s28, %s5621_s24  ;;  %s5626_s1 = scalar_lea.hbm %s6869_s9, 32 }
  0xae   : > { %p5627_p9 = scmp.lt.u32.totalorder %s6097_s28, %s6869_s9  ;;  %p5628_p7 = scmp.lt.u32.totalorder %s5626_s1, %s5621_s24 }
  0xaf   : > { %p5624_p0 = pnand %p5622_p4, %p6038_p11  ;;  %p5630_p3 = scmp.lt.u32.totalorder %s5621_s24, %s6097_s28 }
  0xb0   : > { %p5629_p2 = por %p5628_p7, %p5627_p9 }
  0xb1   : > { %p5625_p1 = pneg %p5624_p0 }
  0xb2   : > { %p5631_p5 = por %p5630_p3, %p5629_p2 }
  0xb4   : > { %p5632_p8 = pnand %p5631_p5, %p5625_p1 }
  0xb6   : > { %5635 = shalt.err (!%p5632_p8)
}
  0xb7   : > { %s5636_s10 = scalar_lea.vmem %s1121_s19, 16  ;;  %s5793_s13 = smov [#allocation7]  }
  0xb8   : > { %p5637_p13 = scmp.ne.s32.totalorder %s1121_s19, %s5636_s10  ;;  %s5641_s2 = sshll.u32 %s5793_s13, 4  ;;  %s5642_s2 = int_to_ptr.vmem [resolvable:$false] %s5641_s2 }
  0xb9   : > { %s5643_s6 = scalar_lea.vmem %s5642_s2, 32  ;;  %p5644_p4 = scmp.lt.s32.totalorder %s1121_s19, %s5642_s2 }
  0xba   : > { %p5639_p10 = pnand %p5637_p13, %p6038_p11  ;;  %p5645_p0 = scmp.lt.s32.totalorder %s5643_s6, %s5636_s10 }
  0xbc   : > { %p5640_p12 = pneg %p5639_p10  ;;  %p5646_p6 = por %p5645_p0, %p5644_p4 }
  0xbe   : > { %p5647_p7 = pnand %p5646_p6, %p5640_p12 }
  0xc0   : > { %5650 = shalt.err (!%p5647_p7)
}
  0xc1   : > { %p6886_p9 = scmp.ne.s32.totalorder %s6880_s18, 0  ;;  %s1147_s27 = scalar_lea.vmem [#allocation10], %s6012_s15 }
  0xc2   : > { %s1154_s24 = sshll.u32 %s1147_s27, 4  ;;  %s5651_s1 = scalar_lea.hbm %s6120_s22, 16  ;;  %s1155_s24 = int_to_ptr.vmem [resolvable:$true] %s1154_s24 }
  0xc3   : > { %5307 = dma.hbm_to_vmem [thread:$0]  (!%p6886_p9), %s6097_s28, 16, %s1121_s19, %s6032_s26  }
  0xc4   : > { %p5652_p1 = scmp.ne.s32.totalorder %s6120_s22, %s5651_s1  ;;  %s5656_s10 = scalar_lea.hbm %s6871_s4, 32 }
  0xc5   : > { %p5657_p3 = scmp.lt.u32.totalorder %s6120_s22, %s6871_s4  ;;  %p5658_p5 = scmp.lt.u32.totalorder %s5656_s10, %s5651_s1 }
  0xc6   : > { %p5654_p6 = pnand %p5652_p1, %p6038_p11  ;;  %p5660_p13 = scmp.lt.u32.totalorder %s5651_s1, %s6120_s22 }
  0xc7   : > { %p5659_p8 = por %p5658_p5, %p5657_p3 }
  0xc8   : > { %p5655_p2 = pneg %p5654_p6 }
  0xc9   : > { %p5661_p10 = por %p5660_p13, %p5659_p8 }
  0xcb   : > { %p5662_p12 = pnand %p5661_p10, %p5655_p2 }
  0xcd   : > { %5665 = shalt.err (!%p5662_p12)
}
  0xce   : > { %s5666_s13 = scalar_lea.vmem %s1155_s24, 16  ;;  %s5794_s26 = smov [#allocation10]  }
  0xcf   : > { %p5667_p4 = scmp.ne.s32.totalorder %s1155_s24, %s5666_s13  ;;  %s5671_s28 = sshll.u32 %s5794_s26, 4  ;;  %s5672_s28 = int_to_ptr.vmem [resolvable:$false] %s5671_s28 }
  0xd0   : > { %s5673_s19 = scalar_lea.vmem %s5672_s28, 32  ;;  %p5674_p1 = scmp.lt.s32.totalorder %s1155_s24, %s5672_s28 }
  0xd1   : > { %p5669_p0 = pnand %p5667_p4, %p6038_p11  ;;  %p5675_p6 = scmp.lt.s32.totalorder %s5673_s19, %s5666_s13 }
  0xd3   : > { %p5670_p7 = pneg %p5669_p0  ;;  %p5676_p9 = por %p5675_p6, %p5674_p1 }
  0xd5   : > { %p5677_p3 = pnand %p5676_p9, %p5670_p7 }
  0xd7   : > { %5680 = shalt.err (!%p5677_p3)
}
  0xd8   : > { %p6887_p5 = scmp.ne.s32.totalorder %s6880_s18, 0  ;;  %s6153_s2 = scalar_lea.hbm %s6868_s20, %s6015_s16 }
  0xd9   : > { %s1164_s6 = scalar_lea.vmem [#allocation11], %s6012_s15  ;;  %s1162_s1 = scalar_lea.sflag [#allocation12], %s6012_s15 }
  0xda   : > { %5313 = dma.hbm_to_vmem [thread:$0]  (!%p6887_p5), %s6120_s22, 16, %s1155_s24, %s6072_s7  }
  0xdb   : > { %s1171_s27 = sshll.u32 %s1164_s6, 4  ;;  %s5681_s10 = scalar_lea.hbm %s6153_s2, 16  ;;  %s1172_s27 = int_to_ptr.vmem [resolvable:$true] %s1171_s27 }
  0xdc   : > { %p5682_p9 = scmp.ne.s32.totalorder %s6153_s2, %s5681_s10  ;;  %s5686_s13 = scalar_lea.hbm %s6868_s20, 32 }
  0xdd   : > { %p5687_p13 = scmp.lt.u32.totalorder %s6153_s2, %s6868_s20  ;;  %p5688_p10 = scmp.lt.u32.totalorder %s5686_s13, %s5681_s10 }
  0xde   : > { %p5684_p2 = pnand %p5682_p9, %p6038_p11  ;;  %p5690_p4 = scmp.lt.u32.totalorder %s5681_s10, %s6153_s2 }
  0xdf   : > { %p5689_p12 = por %p5688_p10, %p5687_p13 }
  0xe0   : > { %p5685_p8 = pneg %p5684_p2 }
  0xe1   : > { %p5691_p0 = por %p5690_p4, %p5689_p12 }
  0xe3   : > { %p5692_p7 = pnand %p5691_p0, %p5685_p8 }
  0xe5   : > { %5695 = shalt.err (!%p5692_p7)
}
  0xe6   : > { %s5696_s16 = scalar_lea.vmem %s1172_s27, 16  ;;  %s5795_s15 = smov [#allocation11]  }
  0xe7   : > { %p5697_p1 = scmp.ne.s32.totalorder %s1172_s27, %s5696_s16  ;;  %s5701_s7 = sshll.u32 %s5795_s15, 4  ;;  %s5702_s7 = int_to_ptr.vmem [resolvable:$false] %s5701_s7 }
  0xe8   : > { %s5703_s22 = scalar_lea.vmem %s5702_s7, 32  ;;  %p5704_p9 = scmp.lt.s32.totalorder %s1172_s27, %s5702_s7 }
  0xe9   : > { %p5699_p6 = pnand %p5697_p1, %p6038_p11  ;;  %p5705_p2 = scmp.lt.s32.totalorder %s5703_s22, %s5696_s16 }
  0xeb   : > { %p5700_p3 = pneg %p5699_p6  ;;  %p5706_p5 = por %p5705_p2, %p5704_p9 }
  0xed   : > { %p5707_p10 = pnand %p5706_p5, %p5700_p3 }
  0xef   : > { %5710 = shalt.err (!%p5707_p10)
}
  0xf0   : > { %p6888_p13 = scmp.ne.s32.totalorder %s6880_s18, 0  ;;  %p6889_p8 = scmp.ne.s32.totalorder %s6883_s30, 0 }
  0xf2   : > { %5316 = dma.hbm_to_vmem [thread:$0]  (!%p6888_p13), %s6153_s2, 16, %s1172_s27, %s1162_s1  }
  0xf3   : > { %1180 = sbr.rel (%p6889_p8) target bundleno = 7852 (0x1eac), region = 144 }
  0xfa   : > { %s6173_s12 = sand.u32 1, %s5749_s23   ;;  %p6891_p11 = scmp.ne.s32.totalorder %s6879_s11, 0 }
  0xfb   : > { %6890 = sst [smem:[#allocation54_spill]] %s6173_s12  ;;  %s1183_s24 = scalar_lea.sflag [#allocation4], %s6173_s12 }
  0xfc   : > { %5728 = dma.done.wait (%p6891_p11), %s1183_s24, 16  }
  0xfd   : > { %5730 = vsyncadd (%p6891_p11), %s1183_s24, 4294967280  ;;  %s1190_s18 = sand.u32 1, %s5990_s0  }
  0xfe   : > { %s1191_s28 = scalar_lea.sflag [#allocation6], %s1190_s18 }
  0xff   : > { %5732 = dma.done.wait (%p6891_p11), %s1191_s28, 32  }
 0x100   : > { %5734 = vsyncadd (%p6891_p11), %s1191_s28, 4294967264  ;;  %s1207_s2 = scalar_lea.sflag [#allocation9], %s1190_s18 }
 0x101   : > { %5736 = dma.done.wait (%p6891_p11), %s1207_s2, 32  }
 0x102   : > { %5738 = vsyncadd (%p6891_p11), %s1207_s2, 4294967264  ;;  %s1223_s1 = scalar_lea.sflag [#allocation12], %s6173_s12 }
 0x103   : > { %5740 = dma.done.wait (%p6891_p11), %s1223_s1, 16  }
 0x104   : > { %5742 = vsyncadd (%p6891_p11), %s1223_s1, 4294967280  ;;  %s6893_s17 = sld [smem:[#allocation20_spill]]  ;;  %s6894_s25 = sld [smem:[#allocation22_spill]] }
 0x105   : > { %s6896_s3 = sld [smem:[#allocation24_spill]]  ;;  %s6898_s14 = sld [smem:[#allocation26_spill]] }
 0x106   : > { %s6900_s16 = sld [smem:[#allocation28_spill]]  ;;  %s6901_s15 = sld [smem:[#allocation29_spill]] }
 0x107   : > { %s6902_s7 = sld [smem:[#allocation30_spill]]  ;;  %s6903_s22 = sld [smem:[#allocation31_spill]] }
 0x108   : > { %s6904_s24 = sld [smem:[#allocation32_spill]]  ;;  %p1404_p5 = scmp.lt.s32.totalorder %s5990_s0, 1 }
 0x109   : > { %s6905_s18 = sld [smem:[#allocation33_spill]]  ;;  %s6906_s11 = sld [smem:[#allocation34_spill]] }
 0x10a   : > { %s6202_s28 = scalar_select %p1404_p5, %s5990_s0, 1 }
 0x10b   : > { %s6907_s1 = sld [smem:[#allocation35_spill]]  ;;  %s6908_s27 = sld [smem:[#allocation36_spill]] }
 0x10c   : > { %s4876_s2 = sshll.u32 %s6202_s28, 4  ;;  %s6910_s19 = sld [smem:[#allocation37_spill]] }
 0x10d   : > { %s6208_s6 = scalar_lea.vmem %s6893_s17, %s4876_s2  ;;  %s6211_s30 = scalar_lea.vmem %s6894_s25, %s4876_s2 }
 0x10e   : > { %6909 = sst [smem:[#allocation55_spill]] %s6208_s6  ;;  %s6912_s26 = sld [smem:[#allocation38_spill]] }
 0x10f   : > { %6911 = sst [smem:[#allocation56_spill]] %s6211_s30  ;;  %s6913_s5 = sld [smem:[#allocation39_spill]] }
 0x110   : > { %s6216_s9 = scalar_lea.vmem %s6896_s3, %s4876_s2  ;;  %s6915_s20 = sld [smem:[#allocation40_spill]] }
 0x111   : > { %6914 = sst [smem:[#allocation57_spill]] %s6216_s9  ;;  %s6221_s12 = scalar_lea.vmem %s6898_s14, %s4876_s2 }
 0x112   : > { %6916 = sst [smem:[#allocation58_spill]] %s6221_s12  ;;  %s1438_s17 = scalar_lea.vmem %s6900_s16, %s6202_s28 }
 0x113   : > { %s6917_s10 = sld [smem:[#allocation42_spill]]  ;;  %s1441_s6 = scalar_lea.vmem %s6901_s15, %s6202_s28 }
 0x114   : > { %s6230_s0 = scalar_lea.vmem %s6902_s7, %s4876_s2  ;;  %s1449_s25 = scalar_lea.vmem %s6903_s22, %s6202_s28 }
 0x115   : > { %s6235_s30 = scalar_lea.vmem %s6904_s24, %s4876_s2  ;;  %s1457_s4 = scalar_lea.vmem %s6905_s18, %s6202_s28 }
 0x116   : > { %s6240_s29 = scalar_lea.vmem %s6906_s11, %s4876_s2  ;;  %s1465_s3 = scalar_lea.vmem %s6907_s1, %s6202_s28 }
 0x117   : > { %s6245_s9 = scalar_lea.vmem %s6908_s27, %s4876_s2  ;;  %s1473_s8 = scalar_lea.vmem %s6910_s19, %s6202_s28 }
 0x118   : > { %s1476_s23 = scalar_lea.vmem %s6912_s26, %s6202_s28  ;;  %s1479_s14 = scalar_lea.vmem %s6913_s5, %s6202_s28 }
 0x119   : > { %s6254_s12 = scalar_lea.vmem %s6915_s20, %s4876_s2  ;;  %s4885_s13 = sshll.u32 %s6202_s28, 6 }
 0x11a   : > { %s6258_s21 = scalar_lea.vmem %s6917_s10, %s4885_s13  ;;  %s6918_s16 = sld [smem:[#allocation51_spill]] }
 0x120   : > { %p4769_p12 = scmp.ne.s32.totalorder %s6918_s16, 0 }
 0x121   : > { %s6919_s15 = sld [smem:[#allocation17_spill]] (!%p4769_p12)  ;;  %vm1497_vm0 = vcmask (!%p4769_p12), 261120  }
 0x122   : > { %1494 = sbr.rel (%p4769_p12) target bundleno = 297 (0x129), region = 172 }
 0x127   : > { %v1495_v0 = vld [vmem:[%s6919_s15] sm:$0xff] (!%p4769_p12)  ;;  %v1496_v1 = vld [vmem:[%s6919_s15 + $0x8] sm:$0xff] (!%p4769_p12) }
 0x128   : > { %1498 = vst.msk [vmem:[#allocation2] sm:$0xff] (!%p4769_p12), %vm1497_vm0, %v1495_v0  ;;  %1499 = vst.msk [vmem:[#allocation2 + $0x8] sm:$0xff] (!%p4769_p12), %vm1497_vm0, %v1496_v1 }
 0x129 PF: > { %s6920_s27 = sld [smem:[#allocation55_spill]]  ;;  %s6921_s26 = sld [smem:[#allocation56_spill]]  ;;  %v5796_v3 = vmov 0.0   ;;  %vm5797_vm1 = vmmov 0   ;;  %vm1541_vm2 = vcmask 261120   ;;  %v5798_v12 = vmov 0  }
 0x12a   : > { %5002 = vmatprep.subr.bf16.mxu0 %v5796_v3  ;;  %5026 = vmatprep.subr.bf16.mxu1 %v5796_v3  ;;  %s6922_s5 = sld [smem:[#allocation57_spill]]  ;;  %s6923_s20 = sld [smem:[#allocation23_spill]]  ;;  %vm1786_vm5 = vcmask 64512   ;;  %vm1906_vm6 = vcmask 1043456   ;;  %v1746_v48 = vlaneseq  ;;  %v5799_v58 = vmov -1e+30  }
 0x12b   : > { %5006 = vmatprep.mubr.msk.bf16.mxu0 %vm5797_vm1, %v5796_v3  ;;  %5028 = vmatprep.mubr.msk.bf16.mxu1 %vm5797_vm1, %v5796_v3  ;;  %s6924_s19 = sld [smem:[#allocation21_spill]]  ;;  %s6927_s22 = sld [smem:[#allocation25_spill]]  ;;  %vm2682_vm14 = vcmask 130048   ;;  %vm2685_vm15 = vcmask 195584  }
 0x12c   : > { %5391 = vset.pattern.permute.xlu0 %v5798_v12  ;;  %5392 = vset.pattern.permute.xlu1 %v5798_v12  ;;  %v1747_v49 = vand.u32 127, %v1746_v48  ;;  %v1749_v50 = vshrl.u32 %v1746_v48, 7  ;;  %s5800_s18 = smov 120   ;;  %s5801_s11 = smov 112  }
 0x12d   : > { %s5802_s2 = smov 104   ;;  %s5803_s1 = smov 8  }
 0x12e   : > { %v1750_v52 = vsub.s32 %v1747_v49, %v1749_v50  ;;  %vm1782_vm9 = vcmp.le.s32.totalorder %v1747_v49, %v1749_v50  ;;  %s5804_s13 = smov 16   ;;  %s6929_s16 = sld [smem:[#allocation58_spill]] }
 0x12f   : > { %v5423_v2 = vld [vmem:[%s6920_s27] sm:$0xff]   ;;  %v5424_v4 = vld [vmem:[%s6920_s27 + $0x8] sm:$0xff]   ;;  %v1783_v59 = vsel %vm1782_vm9, 0.0, %v5799_v58  ;;  %s5805_s27 = smov 24  }
 0x130   : > { %5003 = vmatpush3.bf16.msra.mxu0 %v5423_v2  ;;  %v6269_v5 = vld [vmem:[#allocation2] sm:$0xff]  ;;  %v6271_v6 = vld [vmem:[#allocation2 + $0x8] sm:$0xff]  ;;  %s6925_s10 = scalar_lea.vmem %s6923_s20, %s6202_s28  ;;  %s6932_s20 = sld [smem:[#allocation18_spill]] }
 0x131   : > { %5004 = vmatprep.subr.bf16.mxu0 %v5796_v3  ;;  %v5425_v7 = vld [vmem:[%s6921_s26] sm:$0xff]   ;;  %v1522_v8 = vpack.c.bf16 %v6271_v6, %v6269_v5  ;;  %v5426_v9 = vld [vmem:[%s6921_s26 + $0x8] sm:$0xff]   ;;  %vm1724_vm3 = vcmp.ne.f32.partialorder %v6269_v5, 0.0  ;;  %vm1725_vm4 = vcmp.ne.f32.partialorder %v6271_v6, 0.0  ;;  %s6926_s7 = scalar_lea.vmem %s6924_s19, %s6202_s28  ;;  %s6928_s24 = scalar_lea.vmem %s6927_s22, %s6202_s28 }
 0x132   : > { %v5427_v10 = vld [vmem:[%s6922_s5] sm:$0xff]   ;;  %v5428_v11 = vld [vmem:[%s6922_s5 + $0x8] sm:$0xff]   ;;  %v1726_v13 = vsel %vm1724_vm3, 1, %v5798_v12  ;;  %v1727_v14 = vsel %vm1725_vm4, 1, %v5798_v12  ;;  %s6930_s26 = sld [smem:[#allocation27_spill]] }
 0x133   : > { %1741 = vperm.xlu0 %5391, %v1726_v13   ;;  %1729 = vperm.xlu1 %5392, %v1726_v13   ;;  %v4774_v19 = vld [vmem:[%s6925_s10] ss:$0 sm:$0xff] }
 0x134   : > { %5005 = vmatpush3.bf16.msra.mxu0 %v5424_v4  ;;  %v4770_v20 = vld [vmem:[%s6926_s7] ss:$0 sm:$0xff] }
 0x135   : > { %5010 = vmatprep.subr.bf16.mxu0 %v5796_v3  ;;  %v4778_v38 = vld [vmem:[%s6928_s24] ss:$0 sm:$0xff] }
 0x137   : > { %5007 = vmatmul.mubr.msk.bf16.vlgmr.msra.gmra.mrb[0].mxu0 %vm1541_vm2, %v1522_v8  ;;  %1744 = vperm.xlu0 %5391, %v1727_v14  }
 0x138   : > { %5011 = vmatpush3.bf16.msra.mxu0 %v5425_v7  ;;  %5014 = vmatprep.mubr.msk.bf16.mxu0 %vm5797_vm1, %v5796_v3  ;;  %s6931_s5 = scalar_lea.vmem %s6930_s26, %s6202_s28  ;;  %s6949_s28 = sld [smem:[#allocation51_spill]] }
 0x139   : > { %5012 = vmatprep.subr.bf16.mxu0 %v5796_v3  ;;  %1732 = vperm.xlu1 %5392, %v1727_v14  }
 0x13c   : > { %5013 = vmatpush3.bf16.msra.mxu0 %v5426_v9 }
 0x13d   : > { %5018 = vmatprep.subr.bf16.mxu0 %v5796_v3 }
 0x13e   : > { %p4871_p4 = scmp.ne.s32.totalorder %s6949_s28, 1 }
 0x13f   : > { %5015 = vmatmul.mubr.msk.bf16.vlgmr.msra.gmra.mrb[4].mxu0 %vm1541_vm2, %v1522_v8  ;;  %s6950_s7 = sld [smem:[#allocation48_spill]] (!%p4871_p4)  ;;  %vm4347_vm0 = vcmask (!%p4871_p4), 257024  }
 0x140   : > { %5022 = vmatprep.mubr.msk.bf16.mxu0 %vm5797_vm1, %v5796_v3  ;;  %5019 = vmatpush3.bf16.msra.mxu0 %v5427_v10 }
 0x141   : > { %5020 = vmatprep.subr.bf16.mxu0 %v5796_v3 }
 0x144   : > { %5021 = vmatpush3.bf16.msra.mxu0 %v5428_v11 }
 0x145   : > { %5032 = vmatprep.subr.bf16.mxu0 %v5796_v3 }
 0x147   : > { %5023 = vmatmul.mubr.msk.bf16.vlgmr.msra.gmra.mrb[8].mxu0 %vm1541_vm2, %v1522_v8 }
 0x148   : > { %5034 = vmatprep.mubr.msk.bf16.mxu0 %vm5797_vm1, %v5796_v3 }
 0x1b2   : > { %v1742_v51 = vpop.permute.xlu0 %1741  ;;  %v1730_v53 = vpop.permute.xlu1 %1729 }
 0x1b3   : > { %v1751_v54 = vrot.slane %v1742_v51, %v1750_v52  ;;  %vm1734_vm8 = vcmp.eq.s32.totalorder %v1730_v53, 1 }
 0x1b5   : > { %vm1774_vm7 = vcmp.ne.s32.totalorder %v1751_v54, 0 }
 0x1b6   : > { %v1745_v55 = vpop.permute.xlu0 %1744  ;;  %vm1776_vm10 = vmand %vm1734_vm8, %vm1774_vm7 }
 0x1b7   : > { %v1755_v56 = vrot.slane %v1745_v55, %v1750_v52  ;;  %v1778_v60 = vsel %vm1776_vm10, 0.0, %v5799_v58 }
 0x1b8   : > { %v1733_v57 = vpop.permute.xlu1 %1732  ;;  %v6339_v61 = vadd.f32 %v1783_v59, %v1778_v60 }
 0x1b9   : > { %vm1775_vm11 = vcmp.ne.s32.totalorder %v1755_v56, 0  ;;  %vm1735_vm12 = vcmp.eq.s32.totalorder %v1733_v57, 1 }
 0x1ba   : > { %vm1777_vm13 = vmand %vm1735_vm12, %vm1775_vm11 }
 0x1bb   : > { %v1779_v62 = vsel %vm1777_vm13, 0.0, %v5799_v58 }
 0x1bc   : > { %v6341_v0 = vadd.f32 %v1783_v59, %v1779_v62 }
 0x20a   : > { %v1579_v15 = vpop.f32.mrb[0].mxu0 }
 0x20b   : > { %v5008_v16 = vpop.f32.mrb[1].mxu0  ;;  %v1580_v25 = vadd.f32 %v4770_v20, %v1579_v15 }
 0x20c   : > { %v1582_v17 = vpop.f32.mrb[2].mxu0 }
 0x20d   : > { %v5009_v18 = vpop.f32.mrb[3].mxu0  ;;  %v1583_v29 = vadd.f32 %v4770_v20, %v1582_v17  ;;  %v1586_v32 = vmul.f32 0.35355338, %v1580_v25 }
 0x20f   : > { %v1587_v34 = vmul.f32 0.35355338, %v1583_v29  ;;  %v6314_v35 = vpack.c.bf16 %v1586_v32, %v1586_v32 }
 0x211   : > { %v6316_v36 = vpack.c.bf16 %v1587_v34, %v1587_v34 }
 0x212   : > { %v1640_v21 = vpop.f32.mrb[4].mxu0 }
 0x213   : > { %v1641_v22 = vadd.f32 %v4774_v19, %v1640_v21  ;;  %v5016_v23 = vpop.f32.mrb[5].mxu0 }
 0x214   : > { %v1643_v24 = vpop.f32.mrb[6].mxu0 }
 0x215   : > { %v6304_v26 = vpack.c.bf16 %v1641_v22, %v1641_v22  ;;  %v1644_v27 = vadd.f32 %v4774_v19, %v1643_v24  ;;  %v5017_v28 = vpop.f32.mrb[7].mxu0 }
 0x217   : > { %v6306_v30 = vpack.c.bf16 %v1644_v27, %v1644_v27  ;;  %v1791_v31 = vsel %vm1786_vm5, %v6304_v26, 0 }
 0x218   : > { %5027 = vmatpush3.bf16.xpose.msra.mxu1 %v1791_v31 }
 0x219   : > { %v1837_v33 = vsel %vm1786_vm5, %v6306_v30, 0  ;;  %5038 = vmatprep.subr.bf16.mxu1 %v5796_v3 }
 0x21a   : > { %5033 = vmatpush3.bf16.xpose.msra.mxu0 %v1837_v33  ;;  %v1699_v37 = vpop.f32.mrb[8].mxu0 }
 0x21b   : > { %5044 = vmatprep.subr.bf16.mxu0 %v5796_v3  ;;  %v5024_v39 = vpop.f32.mrb[9].mxu0  ;;  %v1700_v42 = vadd.f32 %v4778_v38, %v1699_v37 }
 0x21c   : > { %v1702_v40 = vpop.f32.mrb[10].mxu0 }
 0x21d   : > { %v5025_v41 = vpop.f32.mrb[11].mxu0  ;;  %v1703_v43 = vadd.f32 %v4778_v38, %v1702_v40  ;;  %v6329_v44 = vpack.c.bf16 %v1700_v42, %v1700_v42 }
 0x21f   : > { %5029 = vmatmul.mubr.msk.bf16.vlgmr.msra.gmra.mrb[0].mxu1 %vm1786_vm5, %v6314_v35  ;;  %v6331_v45 = vpack.c.bf16 %v1703_v43, %v1703_v43  ;;  %v1908_v46 = vsel %vm1906_vm6, %v6329_v44, 0 }
 0x220   : > { %5040 = vmatprep.mubr.msk.bf16.mxu1 %vm5797_vm1, %v5796_v3  ;;  %5039 = vmatpush3.bf16.msra.mxu1 %v1908_v46 }
 0x221   : > { %5035 = vmatmul.mubr.msk.bf16.vlgmr.msra.gmra.mrb[12].mxu0 %vm1786_vm5, %v6316_v36  ;;  %v1954_v47 = vsel %vm1906_vm6, %v6331_v45, 0  ;;  %5050 = vmatprep.subr.bf16.mxu1 %v5796_v3 }
 0x222   : > { %5046 = vmatprep.mubr.msk.bf16.mxu0 %vm5797_vm1, %v5796_v3  ;;  %5045 = vmatpush3.bf16.msra.mxu0 %v1954_v47 }
 0x223   : > { %5056 = vmatprep.subr.bf16.mxu0 %v5796_v3 }
 0x2f2   : > { %v1827_v63 = vpop.f32.mrb[0].mxu1 }
 0x2f3   : > { %v1828_v1 = vadd.f32 %v1827_v63, %v6339_v61  ;;  %v5030_v2 = vpop.f32.mrb[1].mxu1 }
 0x2f4   : > { %v1830_v4 = vpop.f32.mrb[2].mxu1  ;;  %v1873_v7 = vpop.f32.mrb[12].mxu0 }
 0x2f5   : > { %v1874_v8 = vadd.f32 %v1873_v7, %v6341_v0  ;;  %v5031_v9 = vpop.f32.mrb[3].mxu1  ;;  %v5036_v10 = vpop.f32.mrb[13].mxu0  ;;  %v1879_v11 = vsel %vm1786_vm5, %v1828_v1, -inf }
 0x2f6   : > { %1880 = vmax.xlane.f32.xlu0 %v1879_v11  ;;  %v1876_v12 = vpop.f32.mrb[14].mxu0 }
 0x2f7   : > { %v5037_v13 = vpop.f32.mrb[15].mxu0  ;;  %v1882_v14 = vsel %vm1786_vm5, %v1874_v8, -inf }
 0x2f8   : > { %1883 = vmax.xlane.f32.xlu1 %v1882_v14 }
 0x309   : > { %1998 = vrot.lane.b32.xlu1 %v6304_v26, %s5800_s18 }
 0x30d   : > { %1996 = vrot.lane.b32.xlu1 %v6314_v35, %s5800_s18 }
 0x311   : > { %2046 = vrot.lane.b32.xlu1 %v6316_v36, %s5800_s18 }
 0x383   : > { %v1881_v15 = vpop.xlane.xlu0 %1880 }
 0x384   : > { %v1885_v16 = vsub.f32 %v1828_v1, %v1881_v15 }
 0x385   : > { %v1884_v17 = vpop.xlane.xlu1 %1883 }
 0x386   : > { %v1887_v18 = vmul.f32 1.442695, %v1885_v16  ;;  %v1886_v19 = vsub.f32 %v1874_v8, %v1884_v17 }
 0x388   : > { %5451 = vpow2.f32 %v1887_v18  ;;  %v1889_v20 = vmul.f32 1.442695, %v1886_v19 }
 0x389   : > { %v1999_v31 = vpop.permute.xlu1 %1998 }
 0x38a   : > { %5453 = vpow2.f32 %v1889_v20  ;;  %v2004_v34 = vsel %vm1786_vm5, %v1999_v31, 0 }
 0x38d   : > { %v1997_v41 = vpop.permute.xlu1 %1996 }
 0x391   : > { %v2047_v42 = vpop.permute.xlu1 %2046 }
 0x392   : > { %v5452_v21 = vpop.eup %5451 }
 0x393   : > { %v1891_v22 = vsel %vm1786_vm5, %v5452_v21, 0.0 }
 0x394   : > { %v5454_v23 = vpop.eup %5453  ;;  %1892 = vadd.xlane.f32.xlu0 %v1891_v22 }
 0x395   : > { %v1894_v24 = vsel %vm1786_vm5, %v5454_v23, 0.0 }
 0x398   : > { %1895 = vadd.xlane.f32.xlu0 %v1894_v24 }
 0x3ae   : > { %2048 = vrot.lane.b32.xlu0 %v6306_v30, %s5800_s18 }
 0x421   : > { %v1893_v25 = vpop.xlane.xlu0 %1892 }
 0x422   : > { %5455 = vrcp.f32 %v1893_v25 }
 0x425   : > { %v1896_v27 = vpop.xlane.xlu0 %1895 }
 0x426   : > { %5457 = vrcp.f32 %v1896_v27 }
 0x429   : > { %v2049_v38 = vpop.permute.xlu0 %2048 }
 0x42a   : > { %v2054_v40 = vsel %vm1786_vm5, %v2049_v38, 0 }
 0x42c   : > { %v5456_v28 = vpop.eup %5455 }
 0x42d   : > { %v1899_v29 = vmul.f32 %v5456_v28, %v5452_v21 }
 0x42f   : > { %v1901_v32 = vpack.c.bf16 %v1899_v29, %v1899_v29 }
 0x430   : > { %v5458_v33 = vpop.eup %5457 }
 0x431   : > { %v1900_v37 = vmul.f32 %v5458_v33, %v5454_v23  ;;  %5041 = vmatmul.mubr.msk.bf16.vlgmr.msra.gmra.mrb[4].mxu1 %vm1786_vm5, %v1901_v32 }
 0x432   : > { %5051 = vmatpush3.bf16.xpose.msra.mxu1 %v2004_v34  ;;  %5052 = vmatprep.mubr.msk.bf16.mxu1 %vm5797_vm1, %v5796_v3 }
 0x433   : > { %v1902_v39 = vpack.c.bf16 %v1900_v37, %v1900_v37  ;;  %5062 = vmatprep.subr.bf16.mxu1 %v5796_v3 }
 0x435   : > { %5047 = vmatmul.mubr.msk.bf16.vlgmr.msra.gmra.mrb[16].mxu0 %vm1786_vm5, %v1902_v39 }
 0x436   : > { %5057 = vmatpush3.bf16.xpose.msra.mxu0 %v2054_v40  ;;  %5058 = vmatprep.mubr.msk.bf16.mxu0 %vm5797_vm1, %v5796_v3 }
 0x437   : > { %5068 = vmatprep.subr.bf16.mxu0 %v5796_v3 }
 0x439   : > { %5053 = vmatmul.mubr.msk.bf16.vlgmr.msra.gmra.mrb[8].mxu1 %vm1786_vm5, %v1997_v41 }
 0x43a   : > { %5064 = vmatprep.mubr.msk.bf16.mxu1 %vm5797_vm1, %v5796_v3 }
 0x43d   : > { %5059 = vmatmul.mubr.msk.bf16.vlgmr.msra.gmra.mrb[20].mxu0 %vm1786_vm5, %v2047_v42 }
 0x43e   : > { %5070 = vmatprep.mubr.msk.bf16.mxu0 %vm5797_vm1, %v5796_v3 }
 0x504   : > { %v6373_v43 = vpop.f32.mrb[4].mxu1 }
 0x505   : > { %v5042_v46 = vpop.f32.mrb[5].mxu1 }
 0x506   : > { %v1947_v47 = vpop.f32.mrb[6].mxu1 }
 0x507   : > { %v5043_v48 = vpop.f32.mrb[7].mxu1 }
 0x508   : > { %v6375_v49 = vpop.f32.mrb[16].mxu0 }
 0x509   : > { %v5048_v50 = vpop.f32.mrb[17].mxu0 }
 0x50a   : > { %v1993_v51 = vpop.f32.mrb[18].mxu0 }
 0x50b   : > { %v5049_v52 = vpop.f32.mrb[19].mxu0 }
 0x50c   : > { %v2040_v53 = vpop.f32.mrb[8].mxu1 }
 0x50d   : > { %v2041_v54 = vadd.f32 %v2040_v53, %v6339_v61  ;;  %v5054_v55 = vpop.f32.mrb[9].mxu1 }
 0x50e   : > { %v2043_v56 = vpop.f32.mrb[10].mxu1 }
 0x50f   : > { %v5055_v57 = vpop.f32.mrb[11].mxu1  ;;  %v2096_v58 = vsel %vm1786_vm5, %v2041_v54, -inf }
 0x510   : > { %2097 = vmax.xlane.f32.xlu0 %v2096_v58  ;;  %v2090_v59 = vpop.f32.mrb[20].mxu0 }
 0x511   : > { %v2091_v60 = vadd.f32 %v2090_v59, %v6341_v0  ;;  %v5060_v62 = vpop.f32.mrb[21].mxu0 }
 0x512   : > { %v2093_v63 = vpop.f32.mrb[22].mxu0 }
 0x513   : > { %v5061_v1 = vpop.f32.mrb[23].mxu0  ;;  %v2099_v2 = vsel %vm1786_vm5, %v2091_v60, -inf }
 0x514   : > { %2100 = vmax.xlane.f32.xlu1 %v2099_v2 }
 0x525   : > { %2120 = vrot.lane.b32.xlu1 %v6329_v44, %s5800_s18 }
 0x529   : > { %2218 = vrot.lane.b32.xlu1 %v6304_v26, %s5801_s11 }
 0x52d   : > { %2268 = vrot.lane.b32.xlu1 %v6306_v30, %s5801_s11 }
 0x531   : > { %2266 = vrot.lane.b32.xlu1 %v6316_v36, %s5801_s11 }
 0x59d   : > { %v2098_v4 = vpop.xlane.xlu0 %2097 }
 0x59e   : > { %v2102_v7 = vsub.f32 %v2041_v54, %v2098_v4 }
 0x5a0   : > { %v2104_v8 = vmul.f32 1.442695, %v2102_v7 }
 0x5a1   : > { %v2101_v9 = vpop.xlane.xlu1 %2100 }
 0x5a2   : > { %5459 = vpow2.f32 %v2104_v8  ;;  %v2103_v10 = vsub.f32 %v2091_v60, %v2101_v9 }
 0x5a4   : > { %v2106_v11 = vmul.f32 1.442695, %v2103_v10 }
 0x5a5   : > { %v2121_v12 = vpop.permute.xlu1 %2120 }
 0x5a6   : > { %5461 = vpow2.f32 %v2106_v11  ;;  %v2126_v13 = vsel %vm1906_vm6, %v2121_v12, 0 }
 0x5a7   : > { %5063 = vmatpush3.bf16.msra.mxu1 %v2126_v13 }
 0x5a8   : > { %5074 = vmatprep.subr.bf16.mxu1 %v5796_v3 }
 0x5a9   : > { %v2219_v23 = vpop.permute.xlu1 %2218 }
 0x5aa   : > { %v2224_v28 = vsel %vm1786_vm5, %v2219_v23, 0 }
 0x5ac   : > { %v5460_v14 = vpop.eup %5459 }
 0x5ad   : > { %v2108_v15 = vsel %vm1786_vm5, %v5460_v14, 0.0  ;;  %v2269_v31 = vpop.permute.xlu1 %2268 }
 0x5ae   : > { %2109 = vadd.xlane.f32.xlu0 %v2108_v15  ;;  %v2274_v33 = vsel %vm1786_vm5, %v2269_v31, 0 }
 0x5b0   : > { %v5462_v16 = vpop.eup %5461 }
 0x5b1   : > { %v2111_v17 = vsel %vm1786_vm5, %v5462_v16, 0.0  ;;  %v2267_v37 = vpop.permute.xlu1 %2266 }
 0x5b2   : > { %2112 = vadd.xlane.f32.xlu0 %v2111_v17 }
 0x5c8   : > { %2168 = vrot.lane.b32.xlu0 %v6331_v45, %s5800_s18 }
 0x5cc   : > { %2216 = vrot.lane.b32.xlu0 %v6314_v35, %s5801_s11 }
 0x63b   : > { %v2110_v18 = vpop.xlane.xlu0 %2109 }
 0x63c   : > { %5463 = vrcp.f32 %v2110_v18 }
 0x63f   : > { %v2113_v19 = vpop.xlane.xlu0 %2112 }
 0x640   : > { %5465 = vrcp.f32 %v2113_v19 }
 0x643   : > { %v2169_v20 = vpop.permute.xlu0 %2168 }
 0x644   : > { %v2174_v21 = vsel %vm1906_vm6, %v2169_v20, 0 }
 0x645   : > { %5069 = vmatpush3.bf16.msra.mxu0 %v2174_v21 }
 0x646   : > { %v5464_v22 = vpop.eup %5463  ;;  %5080 = vmatprep.subr.bf16.mxu0 %v5796_v3 }
 0x647   : > { %v2116_v24 = vmul.f32 %v5464_v22, %v5460_v14  ;;  %v2217_v34 = vpop.permute.xlu0 %2216 }
 0x649   : > { %v2118_v25 = vpack.c.bf16 %v2116_v24, %v2116_v24 }
 0x64a   : > { %v5466_v27 = vpop.eup %5465 }
 0x64b   : > { %v2117_v29 = vmul.f32 %v5466_v27, %v5462_v16  ;;  %5065 = vmatmul.mubr.msk.bf16.vlgmr.msra.gmra.mrb[12].mxu1 %vm1786_vm5, %v2118_v25 }
 0x64c   : > { %5075 = vmatpush3.bf16.xpose.msra.mxu1 %v2224_v28  ;;  %5076 = vmatprep.mubr.msk.bf16.mxu1 %vm5797_vm1, %v5796_v3 }
 0x64d   : > { %v2119_v32 = vpack.c.bf16 %v2117_v29, %v2117_v29  ;;  %5086 = vmatprep.subr.bf16.mxu1 %v5796_v3 }
 0x64f   : > { %5071 = vmatmul.mubr.msk.bf16.vlgmr.msra.gmra.mrb[24].mxu0 %vm1786_vm5, %v2119_v32 }
 0x650   : > { %5081 = vmatpush3.bf16.xpose.msra.mxu0 %v2274_v33  ;;  %5082 = vmatprep.mubr.msk.bf16.mxu0 %vm5797_vm1, %v5796_v3 }
 0x651   : > { %5092 = vmatprep.subr.bf16.mxu0 %v5796_v3 }
 0x653   : > { %5077 = vmatmul.mubr.msk.bf16.vlgmr.msra.gmra.mrb[16].mxu1 %vm1786_vm5, %v2217_v34 }
 0x654   : > { %5088 = vmatprep.mubr.msk.bf16.mxu1 %vm5797_vm1, %v5796_v3 }
 0x657   : > { %5083 = vmatmul.mubr.msk.bf16.vlgmr.msra.gmra.mrb[28].mxu0 %vm1786_vm5, %v2267_v37 }
 0x658   : > { %5094 = vmatprep.mubr.msk.bf16.mxu0 %vm5797_vm1, %v5796_v3 }
 0x71e   : > { %v6415_v38 = vpop.f32.mrb[12].mxu1 }
 0x71f   : > { %v5066_v39 = vpop.f32.mrb[13].mxu1 }
 0x720   : > { %v2165_v40 = vpop.f32.mrb[14].mxu1 }
 0x721   : > { %v5067_v41 = vpop.f32.mrb[15].mxu1 }
 0x722   : > { %v6417_v42 = vpop.f32.mrb[24].mxu0 }
 0x723   : > { %v5393_v46 = vpack.i.bf16 %v6417_v42, %v6415_v38  ;;  %v5072_v47 = vpop.f32.mrb[25].mxu0 }
 0x724   : > { %v2213_v48 = vpop.f32.mrb[26].mxu0 }
 0x725   : > { %v5073_v50 = vpop.f32.mrb[27].mxu0 }
 0x726   : > { %v2260_v51 = vpop.f32.mrb[16].mxu1 }
 0x727   : > { %v2261_v52 = vadd.f32 %v2260_v51, %v6339_v61  ;;  %v5078_v53 = vpop.f32.mrb[17].mxu1 }
 0x728   : > { %v2263_v54 = vpop.f32.mrb[18].mxu1 }
 0x729   : > { %v5079_v55 = vpop.f32.mrb[19].mxu1  ;;  %v2316_v56 = vsel %vm1786_vm5, %v2261_v52, -inf }
 0x72a   : > { %2317 = vmax.xlane.f32.xlu0 %v2316_v56  ;;  %v2310_v57 = vpop.f32.mrb[28].mxu0 }
 0x72b   : > { %v2311_v58 = vadd.f32 %v2310_v57, %v6341_v0  ;;  %v5084_v59 = vpop.f32.mrb[29].mxu0 }
 0x72c   : > { %v2313_v60 = vpop.f32.mrb[30].mxu0 }
 0x72d   : > { %v5085_v62 = vpop.f32.mrb[31].mxu0  ;;  %v2319_v63 = vsel %vm1786_vm5, %v2311_v58, -inf }
 0x72e   : > { %2320 = vmax.xlane.f32.xlu1 %v2319_v63 }
 0x73f   : > { %2340 = vrot.lane.b32.xlu1 %v6329_v44, %s5801_s11 }
 0x743   : > { %2438 = vrot.lane.b32.xlu1 %v6304_v26, %s5802_s2 }
 0x747   : > { %2488 = vrot.lane.b32.xlu1 %v6306_v30, %s5802_s2 }
 0x74b   : > { %2486 = vrot.lane.b32.xlu1 %v6316_v36, %s5802_s2 }
 0x7b7   : > { %v2318_v1 = vpop.xlane.xlu0 %2317 }
 0x7b8   : > { %v2322_v2 = vsub.f32 %v2261_v52, %v2318_v1 }
 0x7ba   : > { %v2324_v4 = vmul.f32 1.442695, %v2322_v2 }
 0x7bb   : > { %v2321_v7 = vpop.xlane.xlu1 %2320 }
 0x7bc   : > { %5467 = vpow2.f32 %v2324_v4  ;;  %v2323_v8 = vsub.f32 %v2311_v58, %v2321_v7 }
 0x7be   : > { %v2326_v9 = vmul.f32 1.442695, %v2323_v8 }
 0x7bf   : > { %v2341_v10 = vpop.permute.xlu1 %2340 }
 0x7c0   : > { %5469 = vpow2.f32 %v2326_v9  ;;  %v2346_v11 = vsel %vm1906_vm6, %v2341_v10, 0 }
 0x7c1   : > { %5087 = vmatpush3.bf16.msra.mxu1 %v2346_v11 }
 0x7c2   : > { %5098 = vmatprep.subr.bf16.mxu1 %v5796_v3 }
 0x7c3   : > { %v2439_v18 = vpop.permute.xlu1 %2438 }
 0x7c4   : > { %v2444_v22 = vsel %vm1786_vm5, %v2439_v18, 0 }
 0x7c6   : > { %v5468_v26 = vpop.eup %5467 }
 0x7c7   : > { %v2328_v30 = vsel %vm1786_vm5, %v5468_v26, 0.0 }
 0x7c8   : > { %2329 = vadd.xlane.f32.xlu0 %v2328_v30 }
 0x7ca   : > { %v5470_v12 = vpop.eup %5469 }
 0x7cb   : > { %v2331_v36 = vsel %vm1786_vm5, %v5470_v12, 0.0 }
 0x7cc   : > { %2332 = vadd.xlane.f32.xlu0 %v2331_v36 }
 0x7e2   : > { %2388 = vrot.lane.b32.xlu0 %v6331_v45, %s5801_s11 }
 0x7e6   : > { %2436 = vrot.lane.b32.xlu0 %v6314_v35, %s5802_s2  ;;  %v2489_v35 = vpop.permute.xlu1 %2488 }
 0x7e7   : > { %v2494_v25 = vsel %vm1786_vm5, %v2489_v35, 0 }
 0x7ea   : > { %v2487_v28 = vpop.permute.xlu1 %2486 }
 0x855   : > { %v2330_v13 = vpop.xlane.xlu0 %2329 }
 0x856   : > { %5471 = vrcp.f32 %v2330_v13  ;;  %v5429_v13 = vld [vmem:[%s6929_s16] sm:$0xff]  }
 0x859   : > { %v2333_v14 = vpop.xlane.xlu0 %2332 }
 0x85a   : > { %5473 = vrcp.f32 %v2333_v14  ;;  %v5430_v14 = vld [vmem:[%s6929_s16 + $0x8] sm:$0xff]  }
 0x85d   : > { %v2389_v15 = vpop.permute.xlu0 %2388 }
 0x85e   : > { %v2394_v16 = vsel %vm1906_vm6, %v2389_v15, 0 }
 0x85f   : > { %5093 = vmatpush3.bf16.msra.mxu0 %v2394_v16 }
 0x860   : > { %v5472_v17 = vpop.eup %5471  ;;  %5104 = vmatprep.subr.bf16.mxu0 %v5796_v3 }
 0x861   : > { %v2336_v19 = vmul.f32 %v5472_v17, %v5468_v26  ;;  %v2437_v27 = vpop.permute.xlu0 %2436 }
 0x863   : > { %v2338_v20 = vpack.c.bf16 %v2336_v19, %v2336_v19 }
 0x864   : > { %v5474_v21 = vpop.eup %5473 }
 0x865   : > { %v2337_v23 = vmul.f32 %v5474_v21, %v5470_v12  ;;  %5089 = vmatmul.mubr.msk.bf16.vlgmr.msra.gmra.mrb[20].mxu1 %vm1786_vm5, %v2338_v20 }
 0x866   : > { %5099 = vmatpush3.bf16.xpose.msra.mxu1 %v2444_v22  ;;  %5100 = vmatprep.mubr.msk.bf16.mxu1 %vm5797_vm1, %v5796_v3 }
 0x867   : > { %v2339_v24 = vpack.c.bf16 %v2337_v23, %v2337_v23  ;;  %5110 = vmatprep.subr.bf16.mxu1 %v5796_v3 }
 0x869   : > { %5095 = vmatmul.mubr.msk.bf16.vlgmr.msra.gmra.mrb[32].mxu0 %vm1786_vm5, %v2339_v24 }
 0x86a   : > { %5105 = vmatpush3.bf16.xpose.msra.mxu0 %v2494_v25  ;;  %5106 = vmatprep.mubr.msk.bf16.mxu0 %vm5797_vm1, %v5796_v3 }
 0x86b   : > { %5116 = vmatprep.subr.bf16.mxu0 %v5796_v3 }
 0x86d   : > { %5101 = vmatmul.mubr.msk.bf16.vlgmr.msra.gmra.mrb[24].mxu1 %vm1786_vm5, %v2437_v27 }
 0x86e   : > { %5112 = vmatprep.mubr.msk.bf16.mxu1 %vm5797_vm1, %v5796_v3 }
 0x871   : > { %5107 = vmatmul.mubr.msk.bf16.vlgmr.msra.gmra.mrb[36].mxu0 %vm1786_vm5, %v2487_v28 }
 0x872   : > { %5118 = vmatprep.mubr.msk.bf16.mxu0 %vm5797_vm1, %v5796_v3 }
 0x938   : > { %v2382_v29 = vpop.f32.mrb[20].mxu1 }
 0x939   : > { %v5090_v31 = vpop.f32.mrb[21].mxu1 }
 0x93a   : > { %v2385_v32 = vpop.f32.mrb[22].mxu1 }
 0x93b   : > { %v5091_v33 = vpop.f32.mrb[23].mxu1 }
 0x93c   : > { %v2430_v34 = vpop.f32.mrb[32].mxu0 }
 0x93d   : > { %v5398_v37 = vpack.i.bf16 %v2430_v34, %v2382_v29  ;;  %v5096_v39 = vpop.f32.mrb[33].mxu0 }
 0x93e   : > { %v2433_v40 = vpop.f32.mrb[34].mxu0 }
 0x93f   : > { %v5097_v41 = vpop.f32.mrb[35].mxu0 }
 0x940   : > { %v2480_v47 = vpop.f32.mrb[24].mxu1 }
 0x941   : > { %v2481_v48 = vadd.f32 %v2480_v47, %v6339_v61  ;;  %v5102_v50 = vpop.f32.mrb[25].mxu1 }
 0x942   : > { %v2483_v51 = vpop.f32.mrb[26].mxu1 }
 0x943   : > { %v5103_v52 = vpop.f32.mrb[27].mxu1  ;;  %v2536_v53 = vsel %vm1786_vm5, %v2481_v48, -inf }
 0x944   : > { %2537 = vmax.xlane.f32.xlu0 %v2536_v53  ;;  %v2530_v54 = vpop.f32.mrb[36].mxu0 }
 0x945   : > { %v2531_v55 = vadd.f32 %v2530_v54, %v6341_v0  ;;  %v5108_v56 = vpop.f32.mrb[37].mxu0 }
 0x946   : > { %v2533_v57 = vpop.f32.mrb[38].mxu0 }
 0x947   : > { %v5109_v58 = vpop.f32.mrb[39].mxu0  ;;  %v2539_v59 = vsel %vm1786_vm5, %v2531_v55, -inf }
 0x948   : > { %2540 = vmax.xlane.f32.xlu1 %v2539_v59 }
 0x959   : > { %2560 = vrot.lane.b32.xlu1 %v6329_v44, %s5802_s2 }
 0x95d   : > { %5394 = vrot.lane.b32.xlu1 %v5393_v46, %s5803_s1 }
 0x961   : > { %5399 = vrot.lane.b32.xlu1 %v5398_v37, %s5804_s13 }
 0x9d1   : > { %v2538_v61 = vpop.xlane.xlu0 %2537 }
 0x9d2   : > { %v2542_v0 = vsub.f32 %v2481_v48, %v2538_v61 }
 0x9d4   : > { %v2544_v60 = vmul.f32 1.442695, %v2542_v0 }
 0x9d5   : > { %v2541_v62 = vpop.xlane.xlu1 %2540 }
 0x9d6   : > { %5475 = vpow2.f32 %v2544_v60  ;;  %v2543_v63 = vsub.f32 %v2531_v55, %v2541_v62 }
 0x9d8   : > { %v2546_v1 = vmul.f32 1.442695, %v2543_v63 }
 0x9d9   : > { %v2561_v2 = vpop.permute.xlu1 %2560 }
 0x9da   : > { %5477 = vpow2.f32 %v2546_v1  ;;  %v2566_v44 = vsel %vm1906_vm6, %v2561_v2, 0 }
 0x9db   : > { %5111 = vmatpush3.bf16.msra.mxu1 %v2566_v44  ;;  %v5431_v44 = vld [vmem:[%s6235_s30] sm:$0xff]  }
 0x9dc   : > { %5122 = vmatprep.subr.bf16.mxu1 %v5796_v3 }
 0x9dd   : > { %v5395_v35 = vpop.permute.xlu1 %5394 }
 0x9de   : > { %v5397_v25 = vunpack.i.h.bf16 %v5395_v35  ;;  %v5396_v27 = vunpack.i.l.bf16 %v5395_v35 }
 0x9e0   : > { %v5476_v4 = vpop.eup %5475  ;;  %v2681_v32 = vsel %vm1786_vm5, %v6375_v49, %v5397_v25  ;;  %v2680_v33 = vsel %vm1786_vm5, %v6373_v43, %v5396_v27  ;;  %v4804_v49 = vld [vmem:[%s6931_s5] ss:$0 sm:$0xff] }
 0x9e1   : > { %v2548_v38 = vsel %vm1786_vm5, %v5476_v4, 0.0  ;;  %v5400_v24 = vpop.permute.xlu1 %5399 }
 0x9e2   : > { %2549 = vadd.xlane.f32.xlu0 %v2548_v38  ;;  %v5402_v28 = vunpack.i.h.bf16 %v5400_v24  ;;  %v5401_v29 = vunpack.i.l.bf16 %v5400_v24  ;;  %v5433_v38 = vld [vmem:[%s6932_s20] sm:$0xff]  }
 0x9e4   : > { %v5478_v42 = vpop.eup %5477  ;;  %v2683_v39 = vsel %vm2682_vm14, %v2680_v33, %v5401_v29  ;;  %v2684_v40 = vsel %vm2682_vm14, %v2681_v32, %v5402_v28 }
 0x9e5   : > { %v2551_v46 = vsel %vm1786_vm5, %v5478_v42, 0.0 }
 0x9e6   : > { %2552 = vadd.xlane.f32.xlu0 %v2551_v46  ;;  %v5435_v46 = vld [vmem:[%s6230_s0 + $0x8] sm:$0xff]  }
 0x9fc   : > { %2608 = vrot.lane.b32.xlu0 %v6331_v45, %s5802_s2 }
 0xa6f   : > { %v2550_v7 = vpop.xlane.xlu0 %2549 }
 0xa70   : > { %5479 = vrcp.f32 %v2550_v7 }
 0xa73   : > { %v2553_v8 = vpop.xlane.xlu0 %2552 }
 0xa74   : > { %5481 = vrcp.f32 %v2553_v8 }
 0xa77   : > { %v2609_v9 = vpop.permute.xlu0 %2608 }
 0xa78   : > { %v2614_v10 = vsel %vm1906_vm6, %v2609_v9, 0 }
 0xa79   : > { %5117 = vmatpush3.bf16.msra.mxu0 %v2614_v10 }
 0xa7a   : > { %v5480_v11 = vpop.eup %5479  ;;  %5130 = vmatprep.subr.bf16.mxu0 %v5796_v3 }
 0xa7b   : > { %v2556_v26 = vmul.f32 %v5480_v11, %v5476_v4  ;;  %v5432_v4 = vld [vmem:[%s6235_s30 + $0x8] sm:$0xff]  }
 0xa7d   : > { %v2558_v30 = vpack.c.bf16 %v2556_v26, %v2556_v26 }
 0xa7e   : > { %v5482_v12 = vpop.eup %5481 }
 0xa7f   : > { %v2557_v36 = vmul.f32 %v5482_v12, %v5478_v42  ;;  %5113 = vmatmul.mubr.msk.bf16.vlgmr.msra.gmra.mrb[28].mxu1 %vm1786_vm5, %v2558_v30  ;;  %v5434_v42 = vld [vmem:[%s6230_s0] sm:$0xff]   ;;  %s6935_s0 = sld [smem:[#allocation19_spill]] }
 0xa80   : > { %5126 = vmatprep.mubr.msk.bf16.mxu1 %vm5797_vm1, %v5796_v3  ;;  %5123 = vmatpush3.bf16.msra.mxu1 %v5429_v13  ;;  %v4809_v12 = vld [vmem:[%s1438_s17] ss:$0 sm:$0xff] }
 0xa81   : > { %v2559_v45 = vpack.c.bf16 %v2557_v36, %v2557_v36  ;;  %5124 = vmatprep.subr.bf16.mxu1 %v5796_v3 }
 0xa83   : > { %5119 = vmatmul.mubr.msk.bf16.vlgmr.msra.gmra.mrb[40].mxu0 %vm1786_vm5, %v2559_v45 }
 0xa84   : > { %5134 = vmatprep.mubr.msk.bf16.mxu0 %vm5797_vm1, %v5796_v3  ;;  %5125 = vmatpush3.bf16.msra.mxu1 %v5430_v14 }
 0xa85   : > { %5138 = vmatprep.subr.bf16.mxu1 %v5796_v3  ;;  %5131 = vmatpush3.bf16.msra.mxu0 %v5434_v42 }
 0xa86   : > { %5132 = vmatprep.subr.bf16.mxu0 %v5796_v3 }
 0xa89   : > { %5133 = vmatpush3.bf16.msra.mxu0 %v5435_v46 }
 0xa8a   : > { %5146 = vmatprep.subr.bf16.mxu0 %v5796_v3 }
 0xb52   : > { %v2602_v15 = vpop.f32.mrb[28].mxu1 }
 0xb53   : > { %v5114_v16 = vpop.f32.mrb[29].mxu1 }
 0xb54   : > { %v2605_v17 = vpop.f32.mrb[30].mxu1 }
 0xb55   : > { %v5115_v18 = vpop.f32.mrb[31].mxu1 }
 0xb56   : > { %v2650_v19 = vpop.f32.mrb[40].mxu0 }
 0xb57   : > { %v5403_v20 = vpack.i.bf16 %v2650_v19, %v2602_v15  ;;  %v5120_v21 = vpop.f32.mrb[41].mxu0  ;;  %v4810_v15 = vld [vmem:[%s1441_s6] ss:$0 sm:$0xff] }
 0xb58   : > { %v2653_v22 = vpop.f32.mrb[42].mxu0  ;;  %v5436_v19 = vld [vmem:[%s6240_s29] sm:$0xff]   ;;  %v5437_v21 = vld [vmem:[%s6240_s29 + $0x8] sm:$0xff]  }
 0xb59   : > { %5404 = vrot.lane.b32.xlu0 %v5403_v20, %s5805_s27  ;;  %v5121_v23 = vpop.f32.mrb[43].mxu0  ;;  %v5438_v22 = vld [vmem:[%s6935_s0] sm:$0xff]  }
 0xb5a   : > { %v4815_v23 = vld [vmem:[%s1457_s4] ss:$0 sm:$0xff] }
 0xbcb   : > { %v5405_v31 = vpop.permute.xlu0 %5404 }
 0xbcc   : > { %v5407_v34 = vunpack.i.h.bf16 %v5405_v31  ;;  %v5406_v37 = vunpack.i.l.bf16 %v5405_v31 }
 0xbce   : > { %v2687_v41 = vsel %vm2685_vm15, %v2684_v40, %v5407_v34  ;;  %v2686_v47 = vsel %vm2685_vm15, %v2683_v39, %v5406_v37  ;;  %v4811_v37 = vld [vmem:[%s1449_s25] ss:$0 sm:$0xff] }
 0xbcf   : > { %v4892_v48 = vpack.c.bf16 %v2687_v41, %v2686_v47 }
 0xbd1   : > { %5127 = vmatmul.mubr.msk.bf16.vlgmr.msra.gmra.mrb[32].mxu1 %vm1541_vm2, %v4892_v48 }
 0xbd2   : > { %5142 = vmatprep.mubr.msk.bf16.mxu1 %vm5797_vm1, %v5796_v3  ;;  %5139 = vmatpush3.bf16.msra.mxu1 %v5431_v44 }
 0xbd3   : > { %5140 = vmatprep.subr.bf16.mxu1 %v5796_v3 }
 0xbd6   : > { %5141 = vmatpush3.bf16.msra.mxu1 %v5432_v4 }
 0xbd7   : > { %5154 = vmatprep.subr.bf16.mxu1 %v5796_v3 }
 0xbd9   : > { %5143 = vmatmul.mubr.msk.bf16.vlgmr.msra.gmra.mrb[36].mxu1 %vm1541_vm2, %v5433_v38 }
 0xbda   : > { %5156 = vmatprep.mubr.msk.bf16.mxu1 %vm5797_vm1, %v5796_v3 }
 0xca4   : > { %v2750_v50 = vpop.f32.mrb[32].mxu1 }
 0xca5   : > { %v2751_v43 = vadd.f32 %v4804_v49, %v2750_v50  ;;  %v5128_v51 = vpop.f32.mrb[33].mxu1 }
 0xca6   : > { %v2753_v52 = vpop.f32.mrb[34].mxu1 }
 0xca7   : > { %v2754_v53 = vadd.f32 %v4804_v49, %v2753_v52  ;;  %v5129_v54 = vpop.f32.mrb[35].mxu1  ;;  %v2757_v55 = vadd.f32 %v2751_v43, %v6269_v5 }
 0xca9   : > { %v2761_v56 = vsel %vm1541_vm2, %v2757_v55, 0.0  ;;  %v2758_v57 = vadd.f32 %v2754_v53, %v6271_v6 }
 0xcaa   : > { %2762 = vadd.xlane.f32.xlu1 %v2761_v56 }
 0xcab   : > { %v2764_v58 = vsel %vm1541_vm2, %v2758_v57, 0.0 }
 0xcac   : > { %2765 = vadd.xlane.f32.xlu0 %v2764_v58  ;;  %v2953_v35 = vpop.f32.mrb[36].mxu1 }
 0xcad   : > { %v2954_v24 = vadd.f32 %v4815_v23, %v2953_v35  ;;  %v5144_v25 = vpop.f32.mrb[37].mxu1 }
 0xcae   : > { %v2956_v27 = vpop.f32.mrb[38].mxu1 }
 0xcaf   : > { %v2957_v28 = vadd.f32 %v4815_v23, %v2956_v27  ;;  %v5145_v29 = vpop.f32.mrb[39].mxu1  ;;  %v6547_v31 = vpack.c.bf16 %v2954_v24, %v2954_v24 }
 0xcb1   : > { %v6549_v32 = vpack.c.bf16 %v2957_v28, %v2957_v28  ;;  %v3049_v33 = vsel %vm1786_vm5, %v6547_v31, 0 }
 0xcb2   : > { %5155 = vmatpush3.bf16.xpose.msra.mxu1 %v3049_v33 }
 0xcb3   : > { %v3095_v34 = vsel %vm1786_vm5, %v6549_v32, 0  ;;  %5166 = vmatprep.subr.bf16.mxu1 %v5796_v3 }
 0xd37   : > { %v2763_v59 = vpop.xlane.xlu1 %2762 }
 0xd38   : > { %v2768_v61 = vmul.f32 0.03125, %v2763_v59 }
 0xd39   : > { %v2766_v0 = vpop.xlane.xlu0 %2765 }
 0xd3a   : > { %v2770_v60 = vsub.f32 %v2757_v55, %v2768_v61  ;;  %v2769_v62 = vmul.f32 0.03125, %v2766_v0 }
 0xd3c   : > { %v2771_v63 = vsub.f32 %v2758_v57, %v2769_v62  ;;  %v2772_v1 = vmul.f32 %v2770_v60, %v2770_v60  ;;  %v4820_v57 = vld [vmem:[%s1465_s3] ss:$0 sm:$0xff] }
 0xd3e   : > { %v2774_v5 = vsel %vm1541_vm2, %v2772_v1, 0.0  ;;  %v2773_v2 = vmul.f32 %v2771_v63, %v2771_v63 }
 0xd3f   : > { %2775 = vadd.xlane.f32.xlu0 %v2774_v5 }
 0xd40   : > { %v2777_v6 = vsel %vm1541_vm2, %v2773_v2, 0.0 }
 0xd41   : > { %2778 = vadd.xlane.f32.xlu1 %v2777_v6 }
 0xdcc   : > { %v2776_v7 = vpop.xlane.xlu0 %2775 }
 0xdcd   : > { %v2780_v8 = vmul.f32 0.03125, %v2776_v7 }
 0xdce   : > { %v2779_v9 = vpop.xlane.xlu1 %2778 }
 0xdcf   : > { %v2782_v10 = vadd.f32 1e-05, %v2780_v8  ;;  %v2781_v11 = vmul.f32 0.03125, %v2779_v9 }
 0xdd1   : > { %5483 = vrsqrt.f32 %v2782_v10  ;;  %v2783_v26 = vadd.f32 1e-05, %v2781_v11 }
 0xdd3   : > { %5485 = vrsqrt.f32 %v2783_v26 }
 0xddb   : > { %v5484_v30 = vpop.eup %5483 }
 0xddc   : > { %v2786_v36 = vmul.f32 %v5484_v30, %v2770_v60 }
 0xddd   : > { %v5486_v45 = vpop.eup %5485 }
 0xdde   : > { %v2794_v13 = vmul.f32 %v4809_v12, %v2786_v36  ;;  %v2787_v14 = vmul.f32 %v5486_v45, %v2771_v63 }
 0xde0   : > { %v2795_v16 = vmul.f32 %v4809_v12, %v2787_v14  ;;  %v6527_v17 = vadd.f32 %v4810_v15, %v2794_v13 }
 0xde2   : > { %v6529_v18 = vadd.f32 %v4810_v15, %v2795_v16 }
 0xde4   : > { %v2828_v20 = vpack.c.bf16 %v6529_v18, %v6527_v17 }
 0xde6   : > { %5135 = vmatmul.mubr.msk.bf16.vlgmr.msra.gmra.mrb[44].mxu0 %vm1541_vm2, %v2828_v20 }
 0xde7   : > { %5147 = vmatpush3.bf16.msra.mxu0 %v5436_v19  ;;  %5150 = vmatprep.mubr.msk.bf16.mxu0 %vm5797_vm1, %v5796_v3 }
 0xde8   : > { %5148 = vmatprep.subr.bf16.mxu0 %v5796_v3 }
 0xdeb   : > { %5149 = vmatpush3.bf16.msra.mxu0 %v5437_v21 }
 0xdec   : > { %5160 = vmatprep.subr.bf16.mxu0 %v5796_v3 }
 0xdee   : > { %5151 = vmatmul.mubr.msk.bf16.vlgmr.msra.gmra.mrb[48].mxu0 %vm1541_vm2, %v5438_v22 }
 0xdef   : > { %5162 = vmatprep.mubr.msk.bf16.mxu0 %vm5797_vm1, %v5796_v3 }
 0xdf4   : > { %5161 = vmatpush3.bf16.xpose.msra.mxu0 %v3095_v34 }
 0xdf5   : > { %5172 = vmatprep.subr.bf16.mxu0 %v5796_v3 }
 0xeb9   : > { %v2884_v39 = vpop.f32.mrb[44].mxu0 }
 0xeba   : > { %v2885_v40 = vadd.f32 %v4811_v37, %v2884_v39  ;;  %v5136_v41 = vpop.f32.mrb[45].mxu0 }
 0xebb   : > { %v2887_v47 = vpop.f32.mrb[46].mxu0 }
 0xebc   : > { %v2891_v48 = vmul.f32 0.35355338, %v2885_v40  ;;  %v2888_v49 = vadd.f32 %v4811_v37, %v2887_v47  ;;  %v5137_v50 = vpop.f32.mrb[47].mxu0 }
 0xebe   : > { %v6560_v43 = vpack.c.bf16 %v2891_v48, %v2891_v48  ;;  %v2892_v51 = vmul.f32 0.35355338, %v2888_v49 }
 0xec0   : > { %v6562_v52 = vpack.c.bf16 %v2892_v51, %v2892_v51  ;;  %5157 = vmatmul.mubr.msk.bf16.vlgmr.msra.gmra.mrb[40].mxu1 %vm1786_vm5, %v6560_v43 }
 0xec1   : > { %v3020_v53 = vpop.f32.mrb[48].mxu0  ;;  %5168 = vmatprep.mubr.msk.bf16.mxu1 %vm5797_vm1, %v5796_v3 }
 0xec2   : > { %5163 = vmatmul.mubr.msk.bf16.vlgmr.msra.gmra.mrb[52].mxu0 %vm1786_vm5, %v6562_v52  ;;  %v5152_v54 = vpop.f32.mrb[49].mxu0  ;;  %v3021_v58 = vadd.f32 %v4820_v57, %v3020_v53 }
 0xec3   : > { %v3023_v55 = vpop.f32.mrb[50].mxu0  ;;  %5174 = vmatprep.mubr.msk.bf16.mxu0 %vm5797_vm1, %v5796_v3 }
 0xec4   : > { %v5153_v56 = vpop.f32.mrb[51].mxu0  ;;  %v3024_v59 = vadd.f32 %v4820_v57, %v3023_v55  ;;  %v6575_v61 = vpack.c.bf16 %v3021_v58, %v3021_v58 }
 0xec6   : > { %v6577_v0 = vpack.c.bf16 %v3024_v59, %v3024_v59  ;;  %v3165_v60 = vsel %vm1906_vm6, %v6575_v61, 0 }
 0xec7   : > { %5167 = vmatpush3.bf16.msra.mxu1 %v3165_v60 }
 0xec8   : > { %v3211_v62 = vsel %vm1906_vm6, %v6577_v0, 0  ;;  %5178 = vmatprep.subr.bf16.mxu1 %v5796_v3 }
 0xec9   : > { %5173 = vmatpush3.bf16.msra.mxu0 %v3211_v62 }
 0xeca   : > { %5184 = vmatprep.subr.bf16.mxu0 %v5796_v3 }
 0xf93   : > { %v3085_v63 = vpop.f32.mrb[40].mxu1 }
 0xf94   : > { %v5158_v1 = vpop.f32.mrb[41].mxu1  ;;  %v3137_v5 = vsel %vm1786_vm5, %v3085_v63, -inf }
 0xf95   : > { %3138 = vmax.xlane.f32.xlu0 %v3137_v5  ;;  %v3088_v2 = vpop.f32.mrb[42].mxu1  ;;  %v3131_v6 = vpop.f32.mrb[52].mxu0 }
 0xf96   : > { %v5159_v44 = vpop.f32.mrb[43].mxu1  ;;  %v5164_v4 = vpop.f32.mrb[53].mxu0  ;;  %v3140_v38 = vsel %vm1786_vm5, %v3131_v6, -inf }
 0xf97   : > { %3141 = vmax.xlane.f32.xlu1 %v3140_v38  ;;  %v3134_v42 = vpop.f32.mrb[54].mxu0 }
 0xf98   : > { %v5165_v46 = vpop.f32.mrb[55].mxu0 }
0x1022   : > { %v3139_v7 = vpop.xlane.xlu0 %3138 }
0x1023   : > { %v3143_v8 = vsub.f32 %v3085_v63, %v3139_v7 }
0x1024   : > { %v3142_v9 = vpop.xlane.xlu1 %3141 }
0x1025   : > { %v3145_v10 = vmul.f32 1.442695, %v3143_v8  ;;  %v3144_v11 = vsub.f32 %v3131_v6, %v3142_v9 }
0x1027   : > { %5487 = vpow2.f32 %v3145_v10  ;;  %v3147_v26 = vmul.f32 1.442695, %v3144_v11 }
0x1029   : > { %5489 = vpow2.f32 %v3147_v26 }
0x1031   : > { %v5488_v30 = vpop.eup %5487 }
0x1032   : > { %v3149_v12 = vsel %vm1786_vm5, %v5488_v30, 0.0 }
0x1033   : > { %v5490_v36 = vpop.eup %5489  ;;  %3150 = vadd.xlane.f32.xlu0 %v3149_v12 }
0x1034   : > { %v3152_v45 = vsel %vm1786_vm5, %v5490_v36, 0.0 }
0x1035   : > { %3153 = vadd.xlane.f32.xlu1 %v3152_v45 }
0x1046   : > { %3305 = vrot.lane.b32.xlu1 %v6549_v32, %s5800_s18 }
0x1049   : > { %3255 = vrot.lane.b32.xlu0 %v6547_v31, %s5800_s18 }
0x104a   : > { %3253 = vrot.lane.b32.xlu1 %v6560_v43, %s5800_s18 }
0x104d   : > { %3303 = vrot.lane.b32.xlu0 %v6562_v52, %s5800_s18 }
0x10c0   : > { %v3151_v13 = vpop.xlane.xlu0 %3150 }
0x10c1   : > { %5491 = vrcp.f32 %v3151_v13 }
0x10c2   : > { %v3154_v14 = vpop.xlane.xlu1 %3153 }
0x10c3   : > { %5493 = vrcp.f32 %v3154_v14 }
0x10c4   : > { %v3256_v20 = vpop.permute.xlu0 %3255 }
0x10c5   : > { %v3261_v35 = vsel %vm1786_vm5, %v3256_v20, 0 }
0x10c6   : > { %v3306_v23 = vpop.permute.xlu1 %3305 }
0x10c7   : > { %v3311_v25 = vsel %vm1786_vm5, %v3306_v23, 0 }
0x10c8   : > { %v3304_v28 = vpop.permute.xlu0 %3303 }
0x10ca   : > { %v3254_v27 = vpop.permute.xlu1 %3253 }
0x10cb   : > { %v5492_v15 = vpop.eup %5491 }
0x10cc   : > { %v3157_v16 = vmul.f32 %v5492_v15, %v5488_v30 }
0x10cd   : > { %v5494_v19 = vpop.eup %5493 }
0x10ce   : > { %v3158_v21 = vmul.f32 %v5494_v19, %v5490_v36  ;;  %v3159_v22 = vpack.c.bf16 %v3157_v16, %v3157_v16 }
0x10d0   : > { %5169 = vmatmul.mubr.msk.bf16.vlgmr.msra.gmra.mrb[44].mxu1 %vm1786_vm5, %v3159_v22  ;;  %v3160_v24 = vpack.c.bf16 %v3158_v21, %v3158_v21 }
0x10d1   : > { %5179 = vmatpush3.bf16.xpose.msra.mxu1 %v3261_v35  ;;  %5180 = vmatprep.mubr.msk.bf16.mxu1 %vm5797_vm1, %v5796_v3 }
0x10d2   : > { %5175 = vmatmul.mubr.msk.bf16.vlgmr.msra.gmra.mrb[56].mxu0 %vm1786_vm5, %v3160_v24  ;;  %5190 = vmatprep.subr.bf16.mxu1 %v5796_v3 }
0x10d3   : > { %5185 = vmatpush3.bf16.xpose.msra.mxu0 %v3311_v25  ;;  %5186 = vmatprep.mubr.msk.bf16.mxu0 %vm5797_vm1, %v5796_v3 }
0x10d4   : > { %5196 = vmatprep.subr.bf16.mxu0 %v5796_v3 }
0x10d8   : > { %5181 = vmatmul.mubr.msk.bf16.vlgmr.msra.gmra.mrb[48].mxu1 %vm1786_vm5, %v3254_v27 }
0x10d9   : > { %5192 = vmatprep.mubr.msk.bf16.mxu1 %vm5797_vm1, %v5796_v3 }
0x10da   : > { %5187 = vmatmul.mubr.msk.bf16.vlgmr.msra.gmra.mrb[60].mxu0 %vm1786_vm5, %v3304_v28 }
0x10db   : > { %5198 = vmatprep.mubr.msk.bf16.mxu0 %vm5797_vm1, %v5796_v3 }
0x11a3   : > { %v6613_v29 = vpop.f32.mrb[44].mxu1 }
0x11a4   : > { %v5170_v33 = vpop.f32.mrb[45].mxu1 }
0x11a5   : > { %v3204_v34 = vpop.f32.mrb[46].mxu1  ;;  %v6615_v37 = vpop.f32.mrb[56].mxu0 }
0x11a6   : > { %v5171_v39 = vpop.f32.mrb[47].mxu1  ;;  %v5176_v40 = vpop.f32.mrb[57].mxu0 }
0x11a7   : > { %v3250_v41 = vpop.f32.mrb[58].mxu0 }
0x11a8   : > { %v5177_v47 = vpop.f32.mrb[59].mxu0 }
0x11ab   : > { %v3297_v48 = vpop.f32.mrb[48].mxu1 }
0x11ac   : > { %v5182_v49 = vpop.f32.mrb[49].mxu1  ;;  %v3353_v50 = vsel %vm1786_vm5, %v3297_v48, -inf }
0x11ad   : > { %3354 = vmax.xlane.f32.xlu1 %v3353_v50  ;;  %v3300_v51 = vpop.f32.mrb[50].mxu1  ;;  %v3347_v53 = vpop.f32.mrb[60].mxu0 }
0x11ae   : > { %v5183_v54 = vpop.f32.mrb[51].mxu1  ;;  %v5188_v55 = vpop.f32.mrb[61].mxu0  ;;  %v3356_v56 = vsel %vm1786_vm5, %v3347_v53, -inf }
0x11af   : > { %3357 = vmax.xlane.f32.xlu0 %v3356_v56  ;;  %v3350_v57 = vpop.f32.mrb[62].mxu0 }
0x11b0   : > { %v5189_v58 = vpop.f32.mrb[63].mxu0 }
0x11be   : > { %3425 = vrot.lane.b32.xlu1 %v6577_v0, %s5800_s18 }
0x11c5   : > { %3377 = vrot.lane.b32.xlu0 %v6575_v61, %s5800_s18 }
0x123a   : > { %v3355_v59 = vpop.xlane.xlu1 %3354 }
0x123b   : > { %v3359_v60 = vsub.f32 %v3297_v48, %v3355_v59 }
0x123c   : > { %v3358_v62 = vpop.xlane.xlu0 %3357 }
0x123d   : > { %v3361_v63 = vmul.f32 1.442695, %v3359_v60  ;;  %v3360_v1 = vsub.f32 %v3347_v53, %v3358_v62 }
0x123e   : > { %v3426_v5 = vpop.permute.xlu1 %3425 }
0x123f   : > { %5495 = vpow2.f32 %v3361_v63  ;;  %v3363_v2 = vmul.f32 1.442695, %v3360_v1  ;;  %v3431_v6 = vsel %vm1906_vm6, %v3426_v5, 0 }
0x1240   : > { %5197 = vmatpush3.bf16.msra.mxu0 %v3431_v6  ;;  %v3378_v44 = vpop.permute.xlu0 %3377 }
0x1241   : > { %5497 = vpow2.f32 %v3363_v2  ;;  %v3383_v4 = vsel %vm1906_vm6, %v3378_v44, 0  ;;  %5208 = vmatprep.subr.bf16.mxu0 %v5796_v3 }
0x1242   : > { %5191 = vmatpush3.bf16.msra.mxu1 %v3383_v4 }
0x1243   : > { %5202 = vmatprep.subr.bf16.mxu1 %v5796_v3 }
0x1249   : > { %v5496_v38 = vpop.eup %5495 }
0x124a   : > { %v3365_v42 = vsel %vm1786_vm5, %v5496_v38, 0.0 }
0x124b   : > { %v5498_v46 = vpop.eup %5497  ;;  %3366 = vadd.xlane.f32.xlu0 %v3365_v42 }
0x124c   : > { %v3368_v7 = vsel %vm1786_vm5, %v5498_v46, 0.0 }
0x124d   : > { %3369 = vadd.xlane.f32.xlu1 %v3368_v7 }
0x125e   : > { %3475 = vrot.lane.b32.xlu1 %v6547_v31, %s5801_s11 }
0x1261   : > { %3525 = vrot.lane.b32.xlu0 %v6549_v32, %s5801_s11 }
0x1262   : > { %3473 = vrot.lane.b32.xlu1 %v6560_v43, %s5801_s11 }
0x1265   : > { %3523 = vrot.lane.b32.xlu0 %v6562_v52, %s5801_s11 }
0x12d8   : > { %v3367_v8 = vpop.xlane.xlu0 %3366 }
0x12d9   : > { %5499 = vrcp.f32 %v3367_v8 }
0x12da   : > { %v3370_v9 = vpop.xlane.xlu1 %3369 }
0x12db   : > { %5501 = vrcp.f32 %v3370_v9 }
0x12dc   : > { %v3526_v45 = vpop.permute.xlu0 %3525 }
0x12dd   : > { %v3531_v15 = vsel %vm1786_vm5, %v3526_v45, 0 }
0x12de   : > { %v3476_v30 = vpop.permute.xlu1 %3475 }
0x12df   : > { %v3481_v13 = vsel %vm1786_vm5, %v3476_v30, 0 }
0x12e0   : > { %v3524_v19 = vpop.permute.xlu0 %3523 }
0x12e2   : > { %v3474_v16 = vpop.permute.xlu1 %3473 }
0x12e3   : > { %v5500_v10 = vpop.eup %5499 }
0x12e4   : > { %v3373_v11 = vmul.f32 %v5500_v10, %v5496_v38 }
0x12e5   : > { %v5502_v26 = vpop.eup %5501 }
0x12e6   : > { %v3374_v12 = vmul.f32 %v5502_v26, %v5498_v46  ;;  %v3375_v36 = vpack.c.bf16 %v3373_v11, %v3373_v11 }
0x12e8   : > { %5193 = vmatmul.mubr.msk.bf16.vlgmr.msra.gmra.mrb[52].mxu1 %vm1786_vm5, %v3375_v36  ;;  %v3376_v14 = vpack.c.bf16 %v3374_v12, %v3374_v12 }
0x12e9   : > { %5203 = vmatpush3.bf16.xpose.msra.mxu1 %v3481_v13  ;;  %5204 = vmatprep.mubr.msk.bf16.mxu1 %vm5797_vm1, %v5796_v3 }
0x12ea   : > { %5199 = vmatmul.mubr.msk.bf16.vlgmr.msra.gmra.mrb[64].mxu0 %vm1786_vm5, %v3376_v14  ;;  %5214 = vmatprep.subr.bf16.mxu1 %v5796_v3 }
0x12eb   : > { %5209 = vmatpush3.bf16.xpose.msra.mxu0 %v3531_v15  ;;  %5210 = vmatprep.mubr.msk.bf16.mxu0 %vm5797_vm1, %v5796_v3 }
0x12ec   : > { %5220 = vmatprep.subr.bf16.mxu0 %v5796_v3 }
0x12f0   : > { %5205 = vmatmul.mubr.msk.bf16.vlgmr.msra.gmra.mrb[56].mxu1 %vm1786_vm5, %v3474_v16 }
0x12f1   : > { %5216 = vmatprep.mubr.msk.bf16.mxu1 %vm5797_vm1, %v5796_v3 }
0x12f2   : > { %5211 = vmatmul.mubr.msk.bf16.vlgmr.msra.gmra.mrb[68].mxu0 %vm1786_vm5, %v3524_v19 }
0x12f3   : > { %5222 = vmatprep.mubr.msk.bf16.mxu0 %vm5797_vm1, %v5796_v3 }
0x13bb   : > { %v6653_v20 = vpop.f32.mrb[52].mxu1 }
0x13bc   : > { %v5194_v21 = vpop.f32.mrb[53].mxu1 }
0x13bd   : > { %v3422_v22 = vpop.f32.mrb[54].mxu1  ;;  %v6655_v23 = vpop.f32.mrb[64].mxu0 }
0x13be   : > { %v5408_v35 = vpack.i.bf16 %v6655_v23, %v6653_v20  ;;  %v5195_v24 = vpop.f32.mrb[55].mxu1  ;;  %v5200_v25 = vpop.f32.mrb[65].mxu0 }
0x13bf   : > { %v3470_v27 = vpop.f32.mrb[66].mxu0 }
0x13c0   : > { %v5201_v28 = vpop.f32.mrb[67].mxu0 }
0x13c3   : > { %v3517_v33 = vpop.f32.mrb[56].mxu1 }
0x13c4   : > { %v5206_v34 = vpop.f32.mrb[57].mxu1  ;;  %v3573_v39 = vsel %vm1786_vm5, %v3517_v33, -inf }
0x13c5   : > { %3574 = vmax.xlane.f32.xlu1 %v3573_v39  ;;  %v3520_v40 = vpop.f32.mrb[58].mxu1  ;;  %v3567_v41 = vpop.f32.mrb[68].mxu0 }
0x13c6   : > { %v5207_v47 = vpop.f32.mrb[59].mxu1  ;;  %v5212_v48 = vpop.f32.mrb[69].mxu0  ;;  %v3576_v49 = vsel %vm1786_vm5, %v3567_v41, -inf }
0x13c7   : > { %3577 = vmax.xlane.f32.xlu0 %v3576_v49  ;;  %v3570_v50 = vpop.f32.mrb[70].mxu0 }
0x13c8   : > { %v5213_v51 = vpop.f32.mrb[71].mxu0 }
0x13d6   : > { %3645 = vrot.lane.b32.xlu1 %v6577_v0, %s5801_s11 }
0x13dd   : > { %3597 = vrot.lane.b32.xlu0 %v6575_v61, %s5801_s11 }
0x1452   : > { %v3575_v53 = vpop.xlane.xlu1 %3574 }
0x1453   : > { %v3579_v54 = vsub.f32 %v3517_v33, %v3575_v53 }
0x1454   : > { %v3578_v55 = vpop.xlane.xlu0 %3577 }
0x1455   : > { %v3581_v56 = vmul.f32 1.442695, %v3579_v54  ;;  %v3580_v57 = vsub.f32 %v3567_v41, %v3578_v55 }
0x1456   : > { %v3646_v58 = vpop.permute.xlu1 %3645 }
0x1457   : > { %5503 = vpow2.f32 %v3581_v56  ;;  %v3583_v59 = vmul.f32 1.442695, %v3580_v57  ;;  %v3651_v60 = vsel %vm1906_vm6, %v3646_v58, 0 }
0x1458   : > { %5221 = vmatpush3.bf16.msra.mxu0 %v3651_v60  ;;  %v3598_v62 = vpop.permute.xlu0 %3597 }
0x1459   : > { %5505 = vpow2.f32 %v3583_v59  ;;  %v3603_v63 = vsel %vm1906_vm6, %v3598_v62, 0  ;;  %5232 = vmatprep.subr.bf16.mxu0 %v5796_v3 }
0x145a   : > { %5215 = vmatpush3.bf16.msra.mxu1 %v3603_v63 }
0x145b   : > { %5226 = vmatprep.subr.bf16.mxu1 %v5796_v3 }
0x1461   : > { %v5504_v1 = vpop.eup %5503 }
0x1462   : > { %v3585_v5 = vsel %vm1786_vm5, %v5504_v1, 0.0 }
0x1463   : > { %v5506_v2 = vpop.eup %5505  ;;  %3586 = vadd.xlane.f32.xlu0 %v3585_v5  ;;  %v5440_v5 = vld [vmem:[%s6245_s9 + $0x8] sm:$0xff]  }
0x1464   : > { %v3588_v6 = vsel %vm1786_vm5, %v5506_v2, 0.0 }
0x1465   : > { %3589 = vadd.xlane.f32.xlu1 %v3588_v6 }
0x1476   : > { %3695 = vrot.lane.b32.xlu1 %v6547_v31, %s5802_s2 }
0x1479   : > { %3745 = vrot.lane.b32.xlu0 %v6549_v32, %s5802_s2 }
0x147a   : > { %3693 = vrot.lane.b32.xlu1 %v6560_v43, %s5802_s2 }
0x147d   : > { %3743 = vrot.lane.b32.xlu0 %v6562_v52, %s5802_s2 }
0x14f0   : > { %v3587_v44 = vpop.xlane.xlu0 %3586 }
0x14f1   : > { %5507 = vrcp.f32 %v3587_v44 }
0x14f2   : > { %v3590_v4 = vpop.xlane.xlu1 %3589 }
0x14f3   : > { %5509 = vrcp.f32 %v3590_v4 }
0x14f4   : > { %v3746_v31 = vpop.permute.xlu0 %3745 }
0x14f5   : > { %v3751_v43 = vsel %vm1786_vm5, %v3746_v31, 0 }
0x14f6   : > { %v3696_v7 = vpop.permute.xlu1 %3695 }
0x14f7   : > { %v3701_v10 = vsel %vm1786_vm5, %v3696_v7, 0 }
0x14f8   : > { %v3744_v11 = vpop.permute.xlu0 %3743 }
0x14fa   : > { %v3694_v52 = vpop.permute.xlu1 %3693 }
0x14fb   : > { %v5508_v38 = vpop.eup %5507 }
0x14fc   : > { %v3593_v42 = vmul.f32 %v5508_v38, %v5504_v1  ;;  %v5439_v1 = vld [vmem:[%s6245_s9] sm:$0xff]  }
0x14fd   : > { %v5510_v46 = vpop.eup %5509 }
0x14fe   : > { %v3594_v8 = vmul.f32 %v5510_v46, %v5506_v2  ;;  %v3595_v9 = vpack.c.bf16 %v3593_v42, %v3593_v42 }
0x1500   : > { %5217 = vmatmul.mubr.msk.bf16.vlgmr.msra.gmra.mrb[60].mxu1 %vm1786_vm5, %v3595_v9  ;;  %v3596_v32 = vpack.c.bf16 %v3594_v8, %v3594_v8 }
0x1501   : > { %5227 = vmatpush3.bf16.xpose.msra.mxu1 %v3701_v10  ;;  %5228 = vmatprep.mubr.msk.bf16.mxu1 %vm5797_vm1, %v5796_v3 }
0x1502   : > { %5223 = vmatmul.mubr.msk.bf16.vlgmr.msra.gmra.mrb[72].mxu0 %vm1786_vm5, %v3596_v32  ;;  %5238 = vmatprep.subr.bf16.mxu1 %v5796_v3 }
0x1503   : > { %5233 = vmatpush3.bf16.xpose.msra.mxu0 %v3751_v43  ;;  %5234 = vmatprep.mubr.msk.bf16.mxu0 %vm5797_vm1, %v5796_v3 }
0x1504   : > { %5244 = vmatprep.subr.bf16.mxu0 %v5796_v3 }
0x1508   : > { %5229 = vmatmul.mubr.msk.bf16.vlgmr.msra.gmra.mrb[64].mxu1 %vm1786_vm5, %v3694_v52 }
0x1509   : > { %5240 = vmatprep.mubr.msk.bf16.mxu1 %vm5797_vm1, %v5796_v3 }
0x150a   : > { %5235 = vmatmul.mubr.msk.bf16.vlgmr.msra.gmra.mrb[76].mxu0 %vm1786_vm5, %v3744_v11 }
0x150b   : > { %5246 = vmatprep.mubr.msk.bf16.mxu0 %vm5797_vm1, %v5796_v3 }
0x15d3   : > { %v3639_v26 = vpop.f32.mrb[60].mxu1 }
0x15d4   : > { %v5218_v30 = vpop.f32.mrb[61].mxu1 }
0x15d5   : > { %v3642_v12 = vpop.f32.mrb[62].mxu1  ;;  %v3687_v36 = vpop.f32.mrb[72].mxu0 }
0x15d6   : > { %v5413_v45 = vpack.i.bf16 %v3687_v36, %v3639_v26  ;;  %v5219_v13 = vpop.f32.mrb[63].mxu1  ;;  %v5224_v14 = vpop.f32.mrb[73].mxu0 }
0x15d7   : > { %v3690_v15 = vpop.f32.mrb[74].mxu0 }
0x15d8   : > { %v5225_v16 = vpop.f32.mrb[75].mxu0 }
0x15db   : > { %v3737_v19 = vpop.f32.mrb[64].mxu1 }
0x15dc   : > { %v5230_v21 = vpop.f32.mrb[65].mxu1  ;;  %v3793_v22 = vsel %vm1786_vm5, %v3737_v19, -inf }
0x15dd   : > { %3794 = vmax.xlane.f32.xlu1 %v3793_v22  ;;  %v3740_v24 = vpop.f32.mrb[66].mxu1  ;;  %v3787_v25 = vpop.f32.mrb[76].mxu0 }
0x15de   : > { %v5231_v27 = vpop.f32.mrb[67].mxu1  ;;  %v5236_v28 = vpop.f32.mrb[77].mxu0  ;;  %v3796_v33 = vsel %vm1786_vm5, %v3787_v25, -inf }
0x15df   : > { %3797 = vmax.xlane.f32.xlu0 %v3796_v33  ;;  %v3790_v34 = vpop.f32.mrb[78].mxu0 }
0x15e0   : > { %v5237_v39 = vpop.f32.mrb[79].mxu0 }
0x166a   : > { %v3795_v40 = vpop.xlane.xlu1 %3794 }
0x166b   : > { %v3799_v41 = vsub.f32 %v3737_v19, %v3795_v40 }
0x166c   : > { %v3798_v47 = vpop.xlane.xlu0 %3797 }
0x166d   : > { %v3801_v48 = vmul.f32 1.442695, %v3799_v41  ;;  %v3800_v49 = vsub.f32 %v3787_v25, %v3798_v47 }
0x166f   : > { %5511 = vpow2.f32 %v3801_v48  ;;  %v3803_v50 = vmul.f32 1.442695, %v3800_v49 }
0x1671   : > { %5513 = vpow2.f32 %v3803_v50 }
0x1679   : > { %v5512_v51 = vpop.eup %5511 }
0x167a   : > { %v3805_v53 = vsel %vm1786_vm5, %v5512_v51, 0.0 }
0x167b   : > { %v5514_v54 = vpop.eup %5513  ;;  %3806 = vadd.xlane.f32.xlu0 %v3805_v53  ;;  %v5441_v53 = vld [vmem:[%s6254_s12] sm:$0xff]  }
0x167c   : > { %v3808_v55 = vsel %vm1786_vm5, %v5514_v54, 0.0 }
0x167d   : > { %3809 = vadd.xlane.f32.xlu1 %v3808_v55  ;;  %v5443_v55 = vld [vmem:[%s6258_s21] sm:$0xff]  }
0x168e   : > { %3865 = vrot.lane.b32.xlu1 %v6577_v0, %s5802_s2 }
0x1691   : > { %3817 = vrot.lane.b32.xlu0 %v6575_v61, %s5802_s2 }
0x1692   : > { %5409 = vrot.lane.b32.xlu1 %v5408_v35, %s5803_s1 }
0x1695   : > { %5414 = vrot.lane.b32.xlu0 %v5413_v45, %s5804_s13 }
0x1708   : > { %v3807_v56 = vpop.xlane.xlu0 %3806 }
0x1709   : > { %5515 = vrcp.f32 %v3807_v56  ;;  %v5444_v56 = vld [vmem:[%s6258_s21 + $0x8] sm:$0xff]  }
0x170a   : > { %v3810_v57 = vpop.xlane.xlu1 %3809 }
0x170b   : > { %5517 = vrcp.f32 %v3810_v57  ;;  %v5445_v57 = vld [vmem:[%s6258_s21 + $0x10] sm:$0xff]  }
0x170c   : > { %v3818_v58 = vpop.permute.xlu0 %3817 }
0x170d   : > { %v3823_v59 = vsel %vm1906_vm6, %v3818_v58, 0  ;;  %v5446_v58 = vld [vmem:[%s6258_s21 + $0x18] sm:$0xff]  }
0x170e   : > { %v3866_v60 = vpop.permute.xlu1 %3865  ;;  %5239 = vmatpush3.bf16.msra.mxu1 %v3823_v59  ;;  %v5447_v59 = vld [vmem:[%s6258_s21 + $0x20] sm:$0xff]  }
0x170f   : > { %v3871_v0 = vsel %vm1906_vm6, %v3866_v60, 0  ;;  %5250 = vmatprep.subr.bf16.mxu1 %v5796_v3  ;;  %v5448_v60 = vld [vmem:[%s6258_s21 + $0x28] sm:$0xff]  }
0x1710   : > { %5245 = vmatpush3.bf16.msra.mxu0 %v3871_v0  ;;  %v5415_v32 = vpop.permute.xlu0 %5414 }
0x1711   : > { %5258 = vmatprep.subr.bf16.mxu0 %v5796_v3  ;;  %v5417_v11 = vunpack.i.h.bf16 %v5415_v32  ;;  %v5416_v26 = vunpack.i.l.bf16 %v5415_v32 }
0x1712   : > { %v5410_v9 = vpop.permute.xlu1 %5409 }
0x1713   : > { %v5516_v61 = vpop.eup %5515  ;;  %v5412_v31 = vunpack.i.h.bf16 %v5410_v9  ;;  %v5411_v10 = vunpack.i.l.bf16 %v5410_v9  ;;  %v5450_v9 = vld [vmem:[%s6258_s21 + $0x38] sm:$0xff]  }
0x1714   : > { %v3813_v20 = vmul.f32 %v5516_v61, %v5512_v51 }
0x1715   : > { %v5518_v23 = vpop.eup %5517  ;;  %v3938_v43 = vsel %vm1786_vm5, %v6615_v37, %v5412_v31  ;;  %v3937_v52 = vsel %vm1786_vm5, %v6613_v29, %v5411_v10  ;;  %v4847_v29 = vld [vmem:[%s1473_s8] ss:$0 sm:$0xff]  ;;  %s6942_s8 = sld [smem:[#allocation54_spill]] }
0x1716   : > { %v3814_v35 = vmul.f32 %v5518_v23, %v5514_v54  ;;  %v3815_v62 = vpack.c.bf16 %v3813_v20, %v3813_v20  ;;  %v3939_v45 = vsel %vm2682_vm14, %v3937_v52, %v5416_v26  ;;  %v3940_v13 = vsel %vm2682_vm14, %v3938_v43, %v5417_v11  ;;  %v5442_v54 = vld [vmem:[%s6254_s12 + $0x8] sm:$0xff]  }
0x1718   : > { %5241 = vmatmul.mubr.msk.bf16.vlgmr.msra.gmra.mrb[68].mxu1 %vm1786_vm5, %v3815_v62  ;;  %v3816_v63 = vpack.c.bf16 %v3814_v35, %v3814_v35 }
0x1719   : > { %5254 = vmatprep.mubr.msk.bf16.mxu1 %vm5797_vm1, %v5796_v3  ;;  %5251 = vmatpush3.bf16.msra.mxu1 %v5439_v1 }
0x171a   : > { %5247 = vmatmul.mubr.msk.bf16.vlgmr.msra.gmra.mrb[80].mxu0 %vm1786_vm5, %v3816_v63  ;;  %5252 = vmatprep.subr.bf16.mxu1 %v5796_v3 }
0x171b   : > { %5262 = vmatprep.mubr.msk.bf16.mxu0 %vm5797_vm1, %v5796_v3  ;;  %5259 = vmatpush3.bf16.msra.mxu0 %v5441_v53  ;;  %s6943_s4 = scalar_lea.vmem [#allocation3], %s6942_s8  ;;  %s6947_s12 = scalar_lea.vmem [#allocation10], %s6942_s8 }
0x171c   : > { %5260 = vmatprep.subr.bf16.mxu0 %v5796_v3  ;;  %v4854_v31 = vld [vmem:[%s6943_s4] ss:$0 sm:$0xff]  ;;  %s6948_s6 = scalar_lea.vmem [#allocation11], %s6942_s8 }
0x171d   : > { %5253 = vmatpush3.bf16.msra.mxu1 %v5440_v5  ;;  %v4852_v5 = vld [vmem:[%s1476_s23] ss:$0 sm:$0xff]  ;;  %s6946_s23 = scalar_lea.vmem [#allocation8], %s6942_s8 }
0x171e   : > { %5266 = vmatprep.subr.bf16.mxu1 %v5796_v3 }
0x171f   : > { %5261 = vmatpush3.bf16.msra.mxu0 %v5442_v54 }
0x17eb   : > { %v3859_v2 = vpop.f32.mrb[68].mxu1 }
0x17ec   : > { %v5242_v6 = vpop.f32.mrb[69].mxu1 }
0x17ed   : > { %v3862_v44 = vpop.f32.mrb[70].mxu1  ;;  %v3907_v4 = vpop.f32.mrb[80].mxu0 }
0x17ee   : > { %v5418_v38 = vpack.i.bf16 %v3907_v4, %v3859_v2  ;;  %v5243_v42 = vpop.f32.mrb[71].mxu1  ;;  %v5248_v46 = vpop.f32.mrb[81].mxu0  ;;  %v4853_v4 = vld [vmem:[%s1479_s14] ss:$0 sm:$0xff]  ;;  %s6944_s14 = scalar_lea.vmem [#allocation5], %s6942_s8 }
0x17ef   : > { %v3910_v7 = vpop.f32.mrb[82].mxu0 }
0x17f0   : > { %5419 = vrot.lane.b32.xlu1 %v5418_v38, %s5805_s27  ;;  %v5249_v8 = vpop.f32.mrb[83].mxu0 }
0x17f1   : > { %v5449_v8 = vld [vmem:[%s6258_s21 + $0x30] sm:$0xff]   ;;  %s6945_s21 = scalar_lea.vmem [#allocation7], %s6942_s8 }
0x17f2   : > { %v4867_v54 = vld [vmem:[%s6945_s21] ss:$0 sm:$0xff] }
0x1862   : > { %v5420_v30 = vpop.permute.xlu1 %5419 }
0x1863   : > { %v5422_v12 = vunpack.i.h.bf16 %v5420_v30  ;;  %v5421_v36 = vunpack.i.l.bf16 %v5420_v30 }
0x1865   : > { %v3942_v14 = vsel %vm2685_vm15, %v3940_v13, %v5422_v12  ;;  %v3941_v15 = vsel %vm2685_vm15, %v3939_v45, %v5421_v36  ;;  %v4858_v45 = vld [vmem:[%s6944_s14] ss:$0 sm:$0xff] }
0x1866   : > { %v4899_v16 = vpack.c.bf16 %v3942_v14, %v3941_v15 }
0x1868   : > { %5255 = vmatmul.mubr.msk.bf16.vlgmr.msra.gmra.mrb[72].mxu1 %vm1541_vm2, %v4899_v16 }
0x1869   : > { %5282 = vmatprep.mubr.msk.bf16.mxu1 %vm5797_vm1, %v5796_v3  ;;  %5267 = vmatpush3.bf16.msra.mxu1 %v5443_v55 }
0x186a   : > { %5268 = vmatprep.subr.bf16.mxu1 %v5796_v3 }
0x186d   : > { %5269 = vmatpush3.bf16.msra.mxu1 %v5444_v56 }
0x186e   : > { %5270 = vmatprep.subr.bf16.mxu1 %v5796_v3 }
0x1871   : > { %5271 = vmatpush3.bf16.msra.mxu1 %v5445_v57  ;;  %v4868_v57 = vld [vmem:[%s6946_s23] ss:$0 sm:$0xff] }
0x1872   : > { %5272 = vmatprep.subr.bf16.mxu1 %v5796_v3 }
0x1875   : > { %5273 = vmatpush3.bf16.msra.mxu1 %v5446_v58 }
0x1876   : > { %5274 = vmatprep.subr.bf16.mxu1 %v5796_v3 }
0x1879   : > { %5275 = vmatpush3.bf16.msra.mxu1 %v5447_v59 }
0x187a   : > { %5276 = vmatprep.subr.bf16.mxu1 %v5796_v3 }
0x187d   : > { %5277 = vmatpush3.bf16.msra.mxu1 %v5448_v60 }
0x187e   : > { %5278 = vmatprep.subr.bf16.mxu1 %v5796_v3 }
0x1881   : > { %5279 = vmatpush3.bf16.msra.mxu1 %v5449_v8 }
0x1882   : > { %5280 = vmatprep.subr.bf16.mxu1 %v5796_v3 }
0x1885   : > { %5281 = vmatpush3.bf16.msra.mxu1 %v5450_v9 }
0x193b   : > { %v4005_v37 = vpop.f32.mrb[72].mxu1 }
0x193c   : > { %v4006_v19 = vadd.f32 %v4847_v29, %v4005_v37  ;;  %v5256_v21 = vpop.f32.mrb[73].mxu1 }
0x193d   : > { %v4008_v22 = vpop.f32.mrb[74].mxu1 }
0x193e   : > { %v4009_v24 = vadd.f32 %v4847_v29, %v4008_v22  ;;  %v5257_v25 = vpop.f32.mrb[75].mxu1  ;;  %v4012_v27 = vadd.f32 %v4006_v19, %v6527_v17 }
0x1940   : > { %v4016_v28 = vsel %vm1541_vm2, %v4012_v27, 0.0  ;;  %v4013_v33 = vadd.f32 %v4009_v24, %v6529_v18 }
0x1941   : > { %4017 = vadd.xlane.f32.xlu0 %v4016_v28 }
0x1942   : > { %v4019_v34 = vsel %vm1541_vm2, %v4013_v33, 0.0 }
0x1943   : > { %4020 = vadd.xlane.f32.xlu1 %v4019_v34 }
0x19ce   : > { %v4018_v39 = vpop.xlane.xlu0 %4017 }
0x19cf   : > { %v4022_v40 = vmul.f32 0.03125, %v4018_v39 }
0x19d0   : > { %v4021_v41 = vpop.xlane.xlu1 %4020 }
0x19d1   : > { %v4024_v47 = vsub.f32 %v4012_v27, %v4022_v40  ;;  %v4023_v48 = vmul.f32 0.03125, %v4021_v41 }
0x19d3   : > { %v4025_v49 = vsub.f32 %v4013_v33, %v4023_v48  ;;  %v4026_v50 = vmul.f32 %v4024_v47, %v4024_v47 }
0x19d5   : > { %v4028_v17 = vsel %vm1541_vm2, %v4026_v50, 0.0  ;;  %v4027_v51 = vmul.f32 %v4025_v49, %v4025_v49 }
0x19d6   : > { %4029 = vadd.xlane.f32.xlu0 %v4028_v17 }
0x19d7   : > { %v4031_v18 = vsel %vm1541_vm2, %v4027_v51, 0.0 }
0x19da   : > { %4032 = vadd.xlane.f32.xlu0 %v4031_v18 }
0x1a63   : > { %v4030_v0 = vpop.xlane.xlu0 %4029 }
0x1a64   : > { %v4034_v61 = vmul.f32 0.03125, %v4030_v0 }
0x1a66   : > { %v4036_v20 = vadd.f32 1e-05, %v4034_v61 }
0x1a67   : > { %v4033_v23 = vpop.xlane.xlu0 %4032 }
0x1a68   : > { %5519 = vrsqrt.f32 %v4036_v20  ;;  %v4035_v35 = vmul.f32 0.03125, %v4033_v23 }
0x1a6a   : > { %v4037_v62 = vadd.f32 1e-05, %v4035_v35 }
0x1a6c   : > { %5521 = vrsqrt.f32 %v4037_v62 }
0x1a72   : > { %v5520_v63 = vpop.eup %5519 }
0x1a73   : > { %v4040_v1 = vmul.f32 %v5520_v63, %v4024_v47 }
0x1a75   : > { %v4048_v6 = vmul.f32 %v4852_v5, %v4040_v1 }
0x1a76   : > { %v5522_v2 = vpop.eup %5521 }
0x1a77   : > { %v4041_v44 = vmul.f32 %v5522_v2, %v4025_v49  ;;  %v4056_v42 = vadd.f32 %v4853_v4, %v4048_v6 }
0x1a79   : > { %v4049_v38 = vmul.f32 %v4852_v5, %v4041_v44 }
0x1a7b   : > { %v6764_v46 = vadd.f32 %v4853_v4, %v4049_v38 }
0x1a7d   : > { %v4082_v7 = vpack.c.bf16 %v6764_v46, %v4056_v42 }
0x1a7f   : > { %5263 = vmatmul.mubr.msk.bf16.vlgmr.msra.gmra.mrb[84].mxu0 %vm1541_vm2, %v4082_v7 }
0x1b52   : > { %v4138_v10 = vpop.f32.mrb[84].mxu0 }
0x1b53   : > { %v4139_v32 = vadd.f32 %v4854_v31, %v4138_v10  ;;  %v5264_v43 = vpop.f32.mrb[85].mxu0 }
0x1b54   : > { %v4141_v52 = vpop.f32.mrb[86].mxu0 }
0x1b55   : > { %v4142_v11 = vadd.f32 %v4854_v31, %v4141_v52  ;;  %v5265_v26 = vpop.f32.mrb[87].mxu0  ;;  %v4145_v30 = vmax.f32 %v4139_v32, 0.0  ;;  %v4869_v52 = vld [vmem:[%s6947_s12] ss:$0 sm:$0xff] }
0x1b57   : > { %v4146_v12 = vmax.f32 %v4142_v11, 0.0 }
0x1b59   : > { %v4147_v36 = vpack.c.bf16 %v4146_v12, %v4145_v30  ;;  %v4870_v30 = vld [vmem:[%s6948_s6] ss:$0 sm:$0xff] }
0x1b5b   : > { %5283 = vmatmul.mubr.bf16.vlgmr.msra.gmra.mrb[76].mxu1 %v4147_v36 }
0x1c2e   : > { %v4236_v13 = vpop.f32.mrb[76].mxu1 }
0x1c2f   : > { %v4237_v14 = vadd.f32 %v4858_v45, %v4236_v13  ;;  %v5284_v15 = vpop.f32.mrb[77].mxu1 }
0x1c30   : > { %v4239_v3 = vpop.f32.mrb[78].mxu1 }
0x1c31   : > { %v4240_v16 = vadd.f32 %v4858_v45, %v4239_v3  ;;  %v5285_v29 = vpop.f32.mrb[79].mxu1  ;;  %v4243_v37 = vadd.f32 %v4237_v14, %v4056_v42 }
0x1c33   : > { %v4245_v19 = vsel %vm1541_vm2, %v4243_v37, 0.0  ;;  %v4244_v21 = vadd.f32 %v4240_v16, %v6764_v46 }
0x1c34   : > { %4246 = vadd.xlane.f32.xlu1 %v4245_v19 }
0x1c35   : > { %v4248_v22 = vsel %vm1541_vm2, %v4244_v21, 0.0 }
0x1c36   : > { %4249 = vadd.xlane.f32.xlu0 %v4248_v22 }
0x1cc1   : > { %v4247_v24 = vpop.xlane.xlu1 %4246 }
0x1cc2   : > { %v4251_v25 = vmul.f32 0.03125, %v4247_v24 }
0x1cc3   : > { %v4250_v27 = vpop.xlane.xlu0 %4249 }
0x1cc4   : > { %v4253_v28 = vsub.f32 %v4243_v37, %v4251_v25  ;;  %v4252_v33 = vmul.f32 0.03125, %v4250_v27 }
0x1cc6   : > { %v4254_v34 = vsub.f32 %v4244_v21, %v4252_v33  ;;  %v4255_v39 = vmul.f32 %v4253_v28, %v4253_v28 }
0x1cc8   : > { %v4257_v40 = vsel %vm1541_vm2, %v4255_v39, 0.0  ;;  %v4256_v41 = vmul.f32 %v4254_v34, %v4254_v34 }
0x1cc9   : > { %4258 = vadd.xlane.f32.xlu1 %v4257_v40 }
0x1cca   : > { %v4260_v47 = vsel %vm1541_vm2, %v4256_v41, 0.0 }
0x1ccb   : > { %4261 = vadd.xlane.f32.xlu0 %v4260_v47 }
0x1d56   : > { %v4259_v48 = vpop.xlane.xlu1 %4258 }
0x1d57   : > { %v4263_v49 = vmul.f32 0.03125, %v4259_v48 }
0x1d58   : > { %v4262_v50 = vpop.xlane.xlu0 %4261 }
0x1d59   : > { %v4265_v17 = vadd.f32 1e-05, %v4263_v49  ;;  %v4264_v51 = vmul.f32 0.03125, %v4262_v50 }
0x1d5b   : > { %5523 = vrsqrt.f32 %v4265_v17  ;;  %v4266_v18 = vadd.f32 1e-05, %v4264_v51 }
0x1d5d   : > { %5525 = vrsqrt.f32 %v4266_v18 }
0x1d65   : > { %v5524_v53 = vpop.eup %5523 }
0x1d66   : > { %v4269_v55 = vmul.f32 %v5524_v53, %v4253_v28 }
0x1d67   : > { %v5526_v56 = vpop.eup %5525 }
0x1d68   : > { %v4277_v58 = vmul.f32 %v4867_v54, %v4269_v55  ;;  %v4270_v59 = vmul.f32 %v5526_v56, %v4254_v34 }
0x1d6a   : > { %v4285_v60 = vadd.f32 %v4868_v57, %v4277_v58  ;;  %v4278_v0 = vmul.f32 %v4867_v54, %v4270_v59 }
0x1d6c   : > { %v4287_v61 = vadd.f32 %v4285_v60, %v4056_v42  ;;  %v4286_v20 = vadd.f32 %v4868_v57, %v4278_v0 }
0x1d6e   : > { %v4291_v23 = vsel %vm1541_vm2, %v4287_v61, 0.0  ;;  %v4288_v35 = vadd.f32 %v4286_v20, %v6764_v46 }
0x1d6f   : > { %4292 = vadd.xlane.f32.xlu1 %v4291_v23 }
0x1d70   : > { %v4294_v62 = vsel %vm1541_vm2, %v4288_v35, 0.0 }
0x1d71   : > { %4295 = vadd.xlane.f32.xlu0 %v4294_v62 }
0x1dfc   : > { %v4293_v63 = vpop.xlane.xlu1 %4292 }
0x1dfd   : > { %v4297_v1 = vmul.f32 0.03125, %v4293_v63 }
0x1dfe   : > { %v4296_v5 = vpop.xlane.xlu0 %4295 }
0x1dff   : > { %v4299_v2 = vsub.f32 %v4287_v61, %v4297_v1  ;;  %v4298_v6 = vmul.f32 0.03125, %v4296_v5 }
0x1e01   : > { %v4300_v44 = vsub.f32 %v4288_v35, %v4298_v6  ;;  %v4301_v4 = vmul.f32 %v4299_v2, %v4299_v2 }
0x1e03   : > { %v4303_v38 = vsel %vm1541_vm2, %v4301_v4, 0.0  ;;  %v4302_v42 = vmul.f32 %v4300_v44, %v4300_v44 }
0x1e04   : > { %4304 = vadd.xlane.f32.xlu1 %v4303_v38 }
0x1e05   : > { %v4306_v7 = vsel %vm1541_vm2, %v4302_v42, 0.0 }
0x1e06   : > { %4307 = vadd.xlane.f32.xlu0 %v4306_v7 }
0x1e91   : > { %v4305_v46 = vpop.xlane.xlu1 %4304 }
0x1e92   : > { %v4309_v8 = vmul.f32 0.03125, %v4305_v46 }
0x1e93   : > { %v4308_v9 = vpop.xlane.xlu0 %4307 }
0x1e94   : > { %v4311_v31 = vadd.f32 1e-05, %v4309_v8  ;;  %v4310_v10 = vmul.f32 0.03125, %v4308_v9 }
0x1e96   : > { %5527 = vrsqrt.f32 %v4311_v31  ;;  %v4312_v32 = vadd.f32 1e-05, %v4310_v10 }
0x1e98   : > { %5529 = vrsqrt.f32 %v4312_v32 }
0x1ea0   : > { %v5528_v43 = vpop.eup %5527 }
0x1ea1   : > { %v4315_v11 = vmul.f32 %v5528_v43, %v4299_v2 }
0x1ea2   : > { %v5530_v26 = vpop.eup %5529 }
0x1ea3   : > { %v4323_v12 = vmul.f32 %v4869_v52, %v4315_v11  ;;  %v4316_v36 = vmul.f32 %v5530_v26, %v4300_v44  ;;  %4338 = sbr.rel (%p4871_p4) target bundleno = 7852 (0x1eac), region = 176 }
0x1ea5   : > { %v4331_v45 = vadd.f32 %v4870_v30, %v4323_v12  ;;  %v4324_v13 = vmul.f32 %v4869_v52, %v4316_v36 }
0x1ea7   : > { %4333 = vst.msk [vmem:[#allocation2] sm:$0xff] %vm1541_vm2, %v4331_v45  ;;  %v4332_v14 = vadd.f32 %v4870_v30, %v4324_v13  ;;  %v4900_v15 = vpack.c.bf16 (!%p4871_p4), %v4331_v45, %v4331_v45 }
0x1ea9   : > { %4334 = vst.msk [vmem:[#allocation2 + $0x8] sm:$0xff] %vm1541_vm2, %v4332_v14  ;;  %v4901_v3 = vpack.c.bf16 (!%p4871_p4), %v4332_v14, %v4332_v14 }
0x1eaa   : > { %4348 = vst.msk [vmem:[%s6950_s7] sm:$0xf] %vm4347_vm0, %v4900_v15 }
0x1eab   : > { %4349 = vst.msk [vmem:[%s6950_s7 + $0x4] sm:$0xf] %vm4347_vm0, %v4901_v3 }
0x1eac PF: > { %s6951_s28 = sld [smem:[#allocation52_spill]]  ;;  %s6952_s22 = sld [smem:[#allocation49_spill]] }
0x1ead   : > { %s6953_s23 = sld [smem:[#allocation50_spill]]  ;;  %s6954_s26 = sld [smem:[#allocation53_spill]] }
0x1eb2   : > { %p82_p0 = scmp.ge.s32.totalorder %s6951_s28, 4  }
0x1eb4   :  { %84 = sbr.rel (!%p82_p0) target bundleno = 78 (0x4e), region = 346 }
0x1ebb   :  { %4361 = vsyncpa [#allocation4], 1 }
0x1ebc   :  { %4363 = vsyncpa [#allocation4 + $0x1], 1 }
0x1ebd   :  { %4364 = vsyncpa [#allocation6], 1 }
0x1ebe   :  { %4366 = vsyncpa [#allocation6 + $0x1], 1 }
0x1ebf   :  { %4367 = vsyncpa [#allocation9], 1 }
0x1ec0   :  { %4369 = vsyncpa [#allocation9 + $0x1], 1 }
0x1ec1   :  { %4370 = vsyncpa [#allocation12], 1 }
0x1ec2   :  { %4372 = vsyncpa [#allocation12 + $0x1], 1 }

</bundles_post_ra>
